<compile_context>
chip_gen: v5e
topology: v5e:2x2
jax: 0.10.0
libtpu: 0.0.40
codegen_flags: <defaults>
</compile_context>

<pallas_src>
import functools

import jax
import jax.numpy as jnp
from jax import lax
from jax.experimental import pallas as pl
from jax.experimental.pallas import tpu as pltpu


def _aspp_conv_kernel(x_ref, w_ref, b_ref, o_ref, acc_ref, *, rate):
    """One (batch, Cout-tile, Cin-tile) grid step.

    x_ref:   (Hp, Wp, tk)   bf16  padded input slab, Hp = H + 2*rate, Wp = Wc + 2*rate
    w_ref:   (3, 3, tk, tn) bf16  conv weights (BN scale already folded in)
    b_ref:   (1, tn)        f32   folded BN bias
    o_ref:   (H, Wc, tn)          output tile (Wc = W rounded up to a multiple of 8)
    acc_ref: (H*Wc, tn)     f32   scratch accumulator, resident across the Cin axis
    """
    ci = pl.program_id(2)
    n_ci = pl.num_programs(2)

    H, Wc, tn = o_ref.shape
    tk = x_ref.shape[-1]

    @pl.when(ci == 0)
    def _init():
        acc_ref[...] = jnp.zeros_like(acc_ref)

    # Dilated 3x3 conv == 9 shifted (H*Wc, tk) @ (tk, tn) MXU matmuls.
    # Hoist the W-shift slice (the one that forces a sublane relayout) to the
    # outer loop: 3 relayout copies per grid step instead of 9.
    for kw in range(3):
        xw = x_ref[:, kw * rate:kw * rate + Wc, :]        # (Hp, Wc, tk)
        for kh in range(3):
            xs = xw[kh * rate:kh * rate + H]              # (H, Wc, tk) leading-dim slice
            acc_ref[...] += jnp.dot(
                xs.reshape(H * Wc, tk), w_ref[kh, kw],
                preferred_element_type=jnp.float32)

    @pl.when(ci == n_ci - 1)
    def _epilogue():
        y = acc_ref[...] + b_ref[0]                       # (H*Wc, tn) + (tn,)
        y = jnp.maximum(y, 0.0)
        o_ref[...] = y.reshape(H, Wc, tn).astype(o_ref.dtype)


def aspp_conv(x_nchw, weight_oihw, gamma, beta, running_mean, running_var,
              *, rate, eps=1e-5, tile_cout=256, tile_cin=512):
    """Forward pass of _ASPPConv.  x is NCHW / weights OIHW (PyTorch convention)."""
    N, Cin, H, W = x_nchw.shape
    Cout = weight_oihw.shape[0]
    out_dtype = x_nchw.dtype

    # ---- BN folding (inference form): scale into the weights, keep only the bias. ----
    scale = (gamma / jnp.sqrt(running_var.astype(jnp.float32) + eps)).astype(jnp.float32)
    bias = (beta - running_mean * scale).astype(jnp.float32).reshape(1, Cout)

    # ---- Layout + dtype glue: NHWC, bf16 for the MXU, spatial zero padding. ----
    # Pad W up to a multiple of 8 so the in-kernel (H, Wc, tk) -> (H*Wc, tk) reshape is
    # sublane-aligned; the extra columns are sliced off after the kernel.
    Wc = ((W + 7) // 8) * 8
    x_nhwc = jnp.transpose(x_nchw, (0, 2, 3, 1)).astype(jnp.bfloat16)
    x_pad = jnp.pad(x_nhwc, ((0, 0), (rate, rate), (rate, rate + (Wc - W)), (0, 0)))
    w_hwio = (jnp.transpose(weight_oihw, (2, 3, 1, 0)).astype(jnp.float32)
              * scale[None, None, None, :]).astype(jnp.bfloat16)      # (3, 3, Cin, Cout)

    Hp, Wp = H + 2 * rate, Wc + 2 * rate

    # ---- Channel tiling: Cout tiles are parallel, Cin tiles are the reduction axis. ----
    # (For toy widths like Cin=4/Cout=8 the tiles collapse to the full dims; note that
    #  lane-sparse outputs (<128 channels) pay masked-store cost — production ASPP widths
    #  of 256-2048 channels are the intended regime.)
    tn = tile_cout if Cout % tile_cout == 0 else Cout
    tk = tile_cin if Cin % tile_cin == 0 else Cin
    n_co, n_ci = Cout // tn, Cin // tk
    grid = (N, n_co, n_ci)

    flops = 2 * N * H * Wc * Cin * Cout * 9
    bytes_accessed = int(N * n_co * Hp * Wp * Cin * 2     # x (re-read once per Cout tile)
                         + N * 9 * Cin * Cout * 2         # weights
                         + N * H * Wc * Cout * out_dtype.itemsize)

    out_padded = pl.pallas_call(
        functools.partial(_aspp_conv_kernel, rate=rate),
        out_shape=jax.ShapeDtypeStruct((N, H, Wc, Cout), out_dtype),
        grid=grid,
        in_specs=[
            pl.BlockSpec((None, Hp, Wp, tk), lambda n, co, ci: (n, 0, 0, ci)),
            pl.BlockSpec((3, 3, tk, tn), lambda n, co, ci: (0, 0, ci, co)),
            pl.BlockSpec((1, tn), lambda n, co, ci: (0, co)),
        ],
        out_specs=pl.BlockSpec((None, H, Wc, tn), lambda n, co, ci: (n, 0, 0, co)),
        scratch_shapes=[pltpu.VMEM((H * Wc, tn), jnp.float32)],
        compiler_params=pltpu.CompilerParams(
            dimension_semantics=("parallel", "parallel", "arbitrary"),
            vmem_limit_bytes=48 * 1024 * 1024),
        cost_estimate=pl.CostEstimate(
            flops=flops, transcendentals=0, bytes_accessed=bytes_accessed),
    )(x_pad, w_hwio, bias)

    out_nhwc = out_padded[:, :, :W, :]
    return jnp.transpose(out_nhwc, (0, 3, 1, 2))          # back to NCHW


# ------------------------------- references -----------------------------------
def _reference_f32(x, w, gamma, beta, mean, var, *, rate, eps=1e-5):
    """Exact module semantics in f32 (conv -> BN(eval) -> ReLU)."""
    y = lax.conv_general_dilated(
        x, w, window_strides=(1, 1), padding=[(rate, rate), (rate, rate)],
        rhs_dilation=(rate, rate), dimension_numbers=("NCHW", "OIHW", "NCHW"))
    scale = gamma / jnp.sqrt(var + eps)
    bias = beta - mean * scale
    return jnp.maximum(y * scale[None, :, None, None] + bias[None, :, None, None], 0.0)


def _reference_bf16(x, w, gamma, beta, mean, var, *, rate, eps=1e-5):
    """Same bf16 quantization / f32 accumulation as the kernel (tight tolerance)."""
    scale = gamma / jnp.sqrt(var + eps)
    bias = beta - mean * scale
    w_fold = (w * scale[:, None, None, None]).astype(jnp.bfloat16)
    y = lax.conv_general_dilated(
        x.astype(jnp.bfloat16), w_fold, window_strides=(1, 1),
        padding=[(rate, rate), (rate, rate)], rhs_dilation=(rate, rate),
        dimension_numbers=("NCHW", "OIHW", "NCHW"),
        preferred_element_type=jnp.float32)
    return jnp.maximum(y + bias[None, :, None, None], 0.0)


if __name__ == "__main__":
    # Small shapes consistent with the module: NCHW input.
    N, Cin, H, W = 2, 4, 16, 16
    Cout = 8
    rate = 2  # atrous_rate

    key = jax.random.PRNGKey(0)
    kx, kw, kg, kb, km, kv = jax.random.split(key, 6)

    x = jax.random.normal(kx, (N, Cin, H, W), dtype=jnp.float32)
    weight = jax.random.normal(kw, (Cout, Cin, 3, 3), dtype=jnp.float32) * 0.1
    gamma = 1.0 + 0.1 * jax.random.normal(kg, (Cout,), dtype=jnp.float32)
    beta = 0.1 * jax.random.normal(kb, (Cout,), dtype=jnp.float32)
    running_mean = 0.1 * jax.random.normal(km, (Cout,), dtype=jnp.float32)
    running_var = jnp.abs(jax.random.normal(kv, (Cout,), dtype=jnp.float32)) + 0.5

    out = aspp_conv(x, weight, gamma, beta, running_mean, running_var, rate=rate)
    out = jax.block_until_ready(out)
    assert out.shape == (N, Cout, H, W)

    # Loose check vs. exact f32 module semantics (kernel quantizes inputs to bf16).
    ref32 = _reference_f32(x, weight, gamma, beta, running_mean, running_var, rate=rate)
    assert jnp.allclose(out, ref32, atol=5e-2, rtol=5e-2), "mismatch vs f32 reference"

    # Tight check vs. a bf16-matched reference (same quantization, f32 accumulation).
    ref16 = _reference_bf16(x, weight, gamma, beta, running_mean, running_var, rate=rate)
    assert jnp.allclose(out, ref16, atol=2e-3, rtol=2e-3), "mismatch vs bf16 reference"

    print("KERNEL_OK")
</pallas_src>

<mosaic_0001>
module attributes {stable_mosaic.version = 11 : i64} {
  func.func @_aspp_conv_kernel(%arg0: i32, %arg1: i32, %arg2: i32, %arg3: memref<1x20x20x4xbf16, #tpu.memory_space<vmem>>, %arg4: memref<3x3x4x8xbf16, #tpu.memory_space<vmem>>, %arg5: memref<1x8xf32, #tpu.memory_space<vmem>>, %arg6: memref<1x16x16x8xf32, #tpu.memory_space<vmem>>, %arg7: memref<256x8xf32, #tpu.memory_space<vmem>>) attributes {dimension_semantics = [#tpu.dimension_semantics<parallel>, #tpu.dimension_semantics<parallel>, #tpu.dimension_semantics<arbitrary>], iteration_bounds = array<i64: 2, 1, 1>, scalar_prefetch = 0 : i64, scratch_operands = 1 : i64, tpu.core_type = #tpu.core_type<tc>, window_params = [{transform_indices = @transform_0, window_bounds = array<i64: 1, 20, 20, 4>}, {transform_indices = @transform_1, window_bounds = array<i64: 3, 3, 4, 8>}, {transform_indices = @transform_2, window_bounds = array<i64: 1, 8>}, {transform_indices = @transform_3, window_bounds = array<i64: 1, 16, 16, 8>}]} {
    %c0_i32 = arith.constant 0 : i32
    %0 = arith.cmpi eq, %arg2, %c0_i32 : i32
    %1 = arith.extui %0 : i1 to i32
    %c0_i32_0 = arith.constant 0 : i32
    %2 = arith.cmpi ne, %1, %c0_i32_0 : i32
    scf.if %2 {
      %cst_91 = arith.constant 0.000000e+00 : f32
      %84 = vector.broadcast %cst_91 : f32 to vector<256x8xf32>
      %c0_92 = arith.constant 0 : index
      %c0_93 = arith.constant 0 : index
      %85 = vector.load %arg7[%c0_92, %c0_93] : memref<256x8xf32, #tpu.memory_space<vmem>>, vector<256x8xf32>
      tpu.vector_store %arg7[%c0_92, %c0_93], %84 {strides = array<i32>} : memref<256x8xf32, #tpu.memory_space<vmem>>, vector<256x8xf32>,
    } else {
    }
    %c0 = arith.constant 0 : index
    %c0_1 = arith.constant 0 : index
    %c0_2 = arith.constant 0 : index
    %c0_3 = arith.constant 0 : index
    %3 = vector.load %arg3[%c0, %c0_1, %c0_2, %c0_3] : memref<1x20x20x4xbf16, #tpu.memory_space<vmem>>, vector<1x20x16x4xbf16>
    %4 = vector.shape_cast %3 : vector<1x20x16x4xbf16> to vector<20x16x4xbf16>
    %5 = vector.extract_strided_slice %4 {offsets = [0, 0, 0], sizes = [16, 16, 4], strides = [1, 1, 1]} : vector<20x16x4xbf16> to vector<16x16x4xbf16>
    %c0_4 = arith.constant 0 : index
    %c0_5 = arith.constant 0 : index
    %6 = vector.load %arg7[%c0_4, %c0_5] : memref<256x8xf32, #tpu.memory_space<vmem>>, vector<256x8xf32>
    %7 = vector.shape_cast %5 : vector<16x16x4xbf16> to vector<256x4xbf16>
    %c0_6 = arith.constant 0 : index
    %c0_7 = arith.constant 0 : index
    %c0_8 = arith.constant 0 : index
    %c0_9 = arith.constant 0 : index
    %8 = vector.load %arg4[%c0_6, %c0_7, %c0_8, %c0_9] : memref<3x3x4x8xbf16, #tpu.memory_space<vmem>>, vector<1x1x4x8xbf16>
    %9 = vector.shape_cast %8 : vector<1x1x4x8xbf16> to vector<4x8xbf16>
    %cst = arith.constant dense<0.000000e+00> : vector<256x8xf32>
    %10 = tpu.matmul %7, %9, %cst {dimension_numbers = #tpu.dot_dimension_numbers<[1], [0], [0], [1], [0, 0, 1, 1], [], []>} : vector<256x4xbf16>, vector<4x8xbf16>, vector<256x8xf32> -> vector<256x8xf32>
    %11 = arith.addf %6, %10 : vector<256x8xf32>
    %c0_10 = arith.constant 0 : index
    %c0_11 = arith.constant 0 : index
    %12 = vector.load %arg7[%c0_10, %c0_11] : memref<256x8xf32, #tpu.memory_space<vmem>>, vector<256x8xf32>
    tpu.vector_store %arg7[%c0_10, %c0_11], %11 {strides = array<i32>} : memref<256x8xf32, #tpu.memory_space<vmem>>, vector<256x8xf32>,
    %13 = vector.extract_strided_slice %4 {offsets = [2, 0, 0], sizes = [16, 16, 4], strides = [1, 1, 1]} : vector<20x16x4xbf16> to vector<16x16x4xbf16>
    %c0_12 = arith.constant 0 : index
    %c0_13 = arith.constant 0 : index
    %14 = vector.load %arg7[%c0_12, %c0_13] : memref<256x8xf32, #tpu.memory_space<vmem>>, vector<256x8xf32>
    %15 = vector.shape_cast %13 : vector<16x16x4xbf16> to vector<256x4xbf16>
    %c1 = arith.constant 1 : index
    %c0_14 = arith.constant 0 : index
    %c0_15 = arith.constant 0 : index
    %c0_16 = arith.constant 0 : index
    %16 = vector.load %arg4[%c1, %c0_14, %c0_15, %c0_16] : memref<3x3x4x8xbf16, #tpu.memory_space<vmem>>, vector<1x1x4x8xbf16>
    %17 = vector.shape_cast %16 : vector<1x1x4x8xbf16> to vector<4x8xbf16>
    %cst_17 = arith.constant dense<0.000000e+00> : vector<256x8xf32>
    %18 = tpu.matmul %15, %17, %cst_17 {dimension_numbers = #tpu.dot_dimension_numbers<[1], [0], [0], [1], [0, 0, 1, 1], [], []>} : vector<256x4xbf16>, vector<4x8xbf16>, vector<256x8xf32> -> vector<256x8xf32>
    %19 = arith.addf %14, %18 : vector<256x8xf32>
    %c0_18 = arith.constant 0 : index
    %c0_19 = arith.constant 0 : index
    %20 = vector.load %arg7[%c0_18, %c0_19] : memref<256x8xf32, #tpu.memory_space<vmem>>, vector<256x8xf32>
    tpu.vector_store %arg7[%c0_18, %c0_19], %19 {strides = array<i32>} : memref<256x8xf32, #tpu.memory_space<vmem>>, vector<256x8xf32>,
    %21 = vector.extract_strided_slice %4 {offsets = [4, 0, 0], sizes = [16, 16, 4], strides = [1, 1, 1]} : vector<20x16x4xbf16> to vector<16x16x4xbf16>
    %c0_20 = arith.constant 0 : index
    %c0_21 = arith.constant 0 : index
    %22 = vector.load %arg7[%c0_20, %c0_21] : memref<256x8xf32, #tpu.memory_space<vmem>>, vector<256x8xf32>
    %23 = vector.shape_cast %21 : vector<16x16x4xbf16> to vector<256x4xbf16>
    %c2 = arith.constant 2 : index
    %c0_22 = arith.constant 0 : index
    %c0_23 = arith.constant 0 : index
    %c0_24 = arith.constant 0 : index
    %24 = vector.load %arg4[%c2, %c0_22, %c0_23, %c0_24] : memref<3x3x4x8xbf16, #tpu.memory_space<vmem>>, vector<1x1x4x8xbf16>
    %25 = vector.shape_cast %24 : vector<1x1x4x8xbf16> to vector<4x8xbf16>
    %cst_25 = arith.constant dense<0.000000e+00> : vector<256x8xf32>
    %26 = tpu.matmul %23, %25, %cst_25 {dimension_numbers = #tpu.dot_dimension_numbers<[1], [0], [0], [1], [0, 0, 1, 1], [], []>} : vector<256x4xbf16>, vector<4x8xbf16>, vector<256x8xf32> -> vector<256x8xf32>
    %27 = arith.addf %22, %26 : vector<256x8xf32>
    %c0_26 = arith.constant 0 : index
    %c0_27 = arith.constant 0 : index
    %28 = vector.load %arg7[%c0_26, %c0_27] : memref<256x8xf32, #tpu.memory_space<vmem>>, vector<256x8xf32>
    tpu.vector_store %arg7[%c0_26, %c0_27], %27 {strides = array<i32>} : memref<256x8xf32, #tpu.memory_space<vmem>>, vector<256x8xf32>,
    %c0_28 = arith.constant 0 : index
    %c0_29 = arith.constant 0 : index
    %c2_30 = arith.constant 2 : index
    %c0_31 = arith.constant 0 : index
    %29 = vector.load %arg3[%c0_28, %c0_29, %c2_30, %c0_31] : memref<1x20x20x4xbf16, #tpu.memory_space<vmem>>, vector<1x20x16x4xbf16>
    %30 = vector.shape_cast %29 : vector<1x20x16x4xbf16> to vector<20x16x4xbf16>
    %31 = vector.extract_strided_slice %30 {offsets = [0, 0, 0], sizes = [16, 16, 4], strides = [1, 1, 1]} : vector<20x16x4xbf16> to vector<16x16x4xbf16>
    %c0_32 = arith.constant 0 : index
    %c0_33 = arith.constant 0 : index
    %32 = vector.load %arg7[%c0_32, %c0_33] : memref<256x8xf32, #tpu.memory_space<vmem>>, vector<256x8xf32>
    %33 = vector.shape_cast %31 : vector<16x16x4xbf16> to vector<256x4xbf16>
    %c0_34 = arith.constant 0 : index
    %c1_35 = arith.constant 1 : index
    %c0_36 = arith.constant 0 : index
    %c0_37 = arith.constant 0 : index
    %34 = vector.load %arg4[%c0_34, %c1_35, %c0_36, %c0_37] : memref<3x3x4x8xbf16, #tpu.memory_space<vmem>>, vector<1x1x4x8xbf16>
    %35 = vector.shape_cast %34 : vector<1x1x4x8xbf16> to vector<4x8xbf16>
    %cst_38 = arith.constant dense<0.000000e+00> : vector<256x8xf32>
    %36 = tpu.matmul %33, %35, %cst_38 {dimension_numbers = #tpu.dot_dimension_numbers<[1], [0], [0], [1], [0, 0, 1, 1], [], []>} : vector<256x4xbf16>, vector<4x8xbf16>, vector<256x8xf32> -> vector<256x8xf32>
    %37 = arith.addf %32, %36 : vector<256x8xf32>
    %c0_39 = arith.constant 0 : index
    %c0_40 = arith.constant 0 : index
    %38 = vector.load %arg7[%c0_39, %c0_40] : memref<256x8xf32, #tpu.memory_space<vmem>>, vector<256x8xf32>
    tpu.vector_store %arg7[%c0_39, %c0_40], %37 {strides = array<i32>} : memref<256x8xf32, #tpu.memory_space<vmem>>, vector<256x8xf32>,
    %39 = vector.extract_strided_slice %30 {offsets = [2, 0, 0], sizes = [16, 16, 4], strides = [1, 1, 1]} : vector<20x16x4xbf16> to vector<16x16x4xbf16>
    %c0_41 = arith.constant 0 : index
    %c0_42 = arith.constant 0 : index
    %40 = vector.load %arg7[%c0_41, %c0_42] : memref<256x8xf32, #tpu.memory_space<vmem>>, vector<256x8xf32>
    %41 = vector.shape_cast %39 : vector<16x16x4xbf16> to vector<256x4xbf16>
    %c1_43 = arith.constant 1 : index
    %c1_44 = arith.constant 1 : index
    %c0_45 = arith.constant 0 : index
    %c0_46 = arith.constant 0 : index
    %42 = vector.load %arg4[%c1_43, %c1_44, %c0_45, %c0_46] : memref<3x3x4x8xbf16, #tpu.memory_space<vmem>>, vector<1x1x4x8xbf16>
    %43 = vector.shape_cast %42 : vector<1x1x4x8xbf16> to vector<4x8xbf16>
    %cst_47 = arith.constant dense<0.000000e+00> : vector<256x8xf32>
    %44 = tpu.matmul %41, %43, %cst_47 {dimension_numbers = #tpu.dot_dimension_numbers<[1], [0], [0], [1], [0, 0, 1, 1], [], []>} : vector<256x4xbf16>, vector<4x8xbf16>, vector<256x8xf32> -> vector<256x8xf32>
    %45 = arith.addf %40, %44 : vector<256x8xf32>
    %c0_48 = arith.constant 0 : index
    %c0_49 = arith.constant 0 : index
    %46 = vector.load %arg7[%c0_48, %c0_49] : memref<256x8xf32, #tpu.memory_space<vmem>>, vector<256x8xf32>
    tpu.vector_store %arg7[%c0_48, %c0_49], %45 {strides = array<i32>} : memref<256x8xf32, #tpu.memory_space<vmem>>, vector<256x8xf32>,
    %47 = vector.extract_strided_slice %30 {offsets = [4, 0, 0], sizes = [16, 16, 4], strides = [1, 1, 1]} : vector<20x16x4xbf16> to vector<16x16x4xbf16>
    %c0_50 = arith.constant 0 : index
    %c0_51 = arith.constant 0 : index
    %48 = vector.load %arg7[%c0_50, %c0_51] : memref<256x8xf32, #tpu.memory_space<vmem>>, vector<256x8xf32>
    %49 = vector.shape_cast %47 : vector<16x16x4xbf16> to vector<256x4xbf16>
    %c2_52 = arith.constant 2 : index
    %c1_53 = arith.constant 1 : index
    %c0_54 = arith.constant 0 : index
    %c0_55 = arith.constant 0 : index
    %50 = vector.load %arg4[%c2_52, %c1_53, %c0_54, %c0_55] : memref<3x3x4x8xbf16, #tpu.memory_space<vmem>>, vector<1x1x4x8xbf16>
    %51 = vector.shape_cast %50 : vector<1x1x4x8xbf16> to vector<4x8xbf16>
    %cst_56 = arith.constant dense<0.000000e+00> : vector<256x8xf32>
    %52 = tpu.matmul %49, %51, %cst_56 {dimension_numbers = #tpu.dot_dimension_numbers<[1], [0], [0], [1], [0, 0, 1, 1], [], []>} : vector<256x4xbf16>, vector<4x8xbf16>, vector<256x8xf32> -> vector<256x8xf32>
    %53 = arith.addf %48, %52 : vector<256x8xf32>
    %c0_57 = arith.constant 0 : index
    %c0_58 = arith.constant 0 : index
    %54 = vector.load %arg7[%c0_57, %c0_58] : memref<256x8xf32, #tpu.memory_space<vmem>>, vector<256x8xf32>
    tpu.vector_store %arg7[%c0_57, %c0_58], %53 {strides = array<i32>} : memref<256x8xf32, #tpu.memory_space<vmem>>, vector<256x8xf32>,
    %c0_59 = arith.constant 0 : index
    %c0_60 = arith.constant 0 : index
    %c4 = arith.constant 4 : index
    %c0_61 = arith.constant 0 : index
    %55 = vector.load %arg3[%c0_59, %c0_60, %c4, %c0_61] : memref<1x20x20x4xbf16, #tpu.memory_space<vmem>>, vector<1x20x16x4xbf16>
    %56 = vector.shape_cast %55 : vector<1x20x16x4xbf16> to vector<20x16x4xbf16>
    %57 = vector.extract_strided_slice %56 {offsets = [0, 0, 0], sizes = [16, 16, 4], strides = [1, 1, 1]} : vector<20x16x4xbf16> to vector<16x16x4xbf16>
    %c0_62 = arith.constant 0 : index
    %c0_63 = arith.constant 0 : index
    %58 = vector.load %arg7[%c0_62, %c0_63] : memref<256x8xf32, #tpu.memory_space<vmem>>, vector<256x8xf32>
    %59 = vector.shape_cast %57 : vector<16x16x4xbf16> to vector<256x4xbf16>
    %c0_64 = arith.constant 0 : index
    %c2_65 = arith.constant 2 : index
    %c0_66 = arith.constant 0 : index
    %c0_67 = arith.constant 0 : index
    %60 = vector.load %arg4[%c0_64, %c2_65, %c0_66, %c0_67] : memref<3x3x4x8xbf16, #tpu.memory_space<vmem>>, vector<1x1x4x8xbf16>
    %61 = vector.shape_cast %60 : vector<1x1x4x8xbf16> to vector<4x8xbf16>
    %cst_68 = arith.constant dense<0.000000e+00> : vector<256x8xf32>
    %62 = tpu.matmul %59, %61, %cst_68 {dimension_numbers = #tpu.dot_dimension_numbers<[1], [0], [0], [1], [0, 0, 1, 1], [], []>} : vector<256x4xbf16>, vector<4x8xbf16>, vector<256x8xf32> -> vector<256x8xf32>
    %63 = arith.addf %58, %62 : vector<256x8xf32>
    %c0_69 = arith.constant 0 : index
    %c0_70 = arith.constant 0 : index
    %64 = vector.load %arg7[%c0_69, %c0_70] : memref<256x8xf32, #tpu.memory_space<vmem>>, vector<256x8xf32>
    tpu.vector_store %arg7[%c0_69, %c0_70], %63 {strides = array<i32>} : memref<256x8xf32, #tpu.memory_space<vmem>>, vector<256x8xf32>,
    %65 = vector.extract_strided_slice %56 {offsets = [2, 0, 0], sizes = [16, 16, 4], strides = [1, 1, 1]} : vector<20x16x4xbf16> to vector<16x16x4xbf16>
    %c0_71 = arith.constant 0 : index
    %c0_72 = arith.constant 0 : index
    %66 = vector.load %arg7[%c0_71, %c0_72] : memref<256x8xf32, #tpu.memory_space<vmem>>, vector<256x8xf32>
    %67 = vector.shape_cast %65 : vector<16x16x4xbf16> to vector<256x4xbf16>
    %c1_73 = arith.constant 1 : index
    %c2_74 = arith.constant 2 : index
    %c0_75 = arith.constant 0 : index
    %c0_76 = arith.constant 0 : index
    %68 = vector.load %arg4[%c1_73, %c2_74, %c0_75, %c0_76] : memref<3x3x4x8xbf16, #tpu.memory_space<vmem>>, vector<1x1x4x8xbf16>
    %69 = vector.shape_cast %68 : vector<1x1x4x8xbf16> to vector<4x8xbf16>
    %cst_77 = arith.constant dense<0.000000e+00> : vector<256x8xf32>
    %70 = tpu.matmul %67, %69, %cst_77 {dimension_numbers = #tpu.dot_dimension_numbers<[1], [0], [0], [1], [0, 0, 1, 1], [], []>} : vector<256x4xbf16>, vector<4x8xbf16>, vector<256x8xf32> -> vector<256x8xf32>
    %71 = arith.addf %66, %70 : vector<256x8xf32>
    %c0_78 = arith.constant 0 : index
    %c0_79 = arith.constant 0 : index
    %72 = vector.load %arg7[%c0_78, %c0_79] : memref<256x8xf32, #tpu.memory_space<vmem>>, vector<256x8xf32>
    tpu.vector_store %arg7[%c0_78, %c0_79], %71 {strides = array<i32>} : memref<256x8xf32, #tpu.memory_space<vmem>>, vector<256x8xf32>,
    %73 = vector.extract_strided_slice %56 {offsets = [4, 0, 0], sizes = [16, 16, 4], strides = [1, 1, 1]} : vector<20x16x4xbf16> to vector<16x16x4xbf16>
    %c0_80 = arith.constant 0 : index
    %c0_81 = arith.constant 0 : index
    %74 = vector.load %arg7[%c0_80, %c0_81] : memref<256x8xf32, #tpu.memory_space<vmem>>, vector<256x8xf32>
    %75 = vector.shape_cast %73 : vector<16x16x4xbf16> to vector<256x4xbf16>
    %c2_82 = arith.constant 2 : index
    %c2_83 = arith.constant 2 : index
    %c0_84 = arith.constant 0 : index
    %c0_85 = arith.constant 0 : index
    %76 = vector.load %arg4[%c2_82, %c2_83, %c0_84, %c0_85] : memref<3x3x4x8xbf16, #tpu.memory_space<vmem>>, vector<1x1x4x8xbf16>
    %77 = vector.shape_cast %76 : vector<1x1x4x8xbf16> to vector<4x8xbf16>
    %cst_86 = arith.constant dense<0.000000e+00> : vector<256x8xf32>
    %78 = tpu.matmul %75, %77, %cst_86 {dimension_numbers = #tpu.dot_dimension_numbers<[1], [0], [0], [1], [0, 0, 1, 1], [], []>} : vector<256x4xbf16>, vector<4x8xbf16>, vector<256x8xf32> -> vector<256x8xf32>
    %79 = arith.addf %74, %78 : vector<256x8xf32>
    %c0_87 = arith.constant 0 : index
    %c0_88 = arith.constant 0 : index
    %80 = vector.load %arg7[%c0_87, %c0_88] : memref<256x8xf32, #tpu.memory_space<vmem>>, vector<256x8xf32>
    tpu.vector_store %arg7[%c0_87, %c0_88], %79 {strides = array<i32>} : memref<256x8xf32, #tpu.memory_space<vmem>>, vector<256x8xf32>,
    %c0_i32_89 = arith.constant 0 : i32
    %81 = arith.cmpi eq, %arg2, %c0_i32_89 : i32
    %82 = arith.extui %81 : i1 to i32
    %c0_i32_90 = arith.constant 0 : i32
    %83 = arith.cmpi ne, %82, %c0_i32_90 : i32
    scf.if %83 {
      %c0_91 = arith.constant 0 : index
      %c0_92 = arith.constant 0 : index
      %84 = vector.load %arg7[%c0_91, %c0_92] : memref<256x8xf32, #tpu.memory_space<vmem>>, vector<256x8xf32>
      %c0_93 = arith.constant 0 : index
      %c0_94 = arith.constant 0 : index
      %85 = vector.load %arg5[%c0_93, %c0_94] : memref<1x8xf32, #tpu.memory_space<vmem>>, vector<1x8xf32>
      %86 = vector.shape_cast %85 : vector<1x8xf32> to vector<8xf32>
      %87 = vector.shape_cast %86 : vector<8xf32> to vector<1x8xf32>
      %88 = vector.broadcast %87 : vector<1x8xf32> to vector<256x8xf32>
      %89 = arith.addf %84, %88 : vector<256x8xf32>
      %cst_95 = arith.constant 0.000000e+00 : f32
      %90 = vector.broadcast %cst_95 : f32 to vector<256x8xf32>
      %91 = arith.maximumf %89, %90 : vector<256x8xf32>
      %92 = vector.shape_cast %91 : vector<256x8xf32> to vector<16x16x8xf32>
      %c0_96 = arith.constant 0 : index
      %c0_97 = arith.constant 0 : index
      %c0_98 = arith.constant 0 : index
      %c0_99 = arith.constant 0 : index
      %93 = vector.load %arg6[%c0_96, %c0_97, %c0_98, %c0_99] : memref<1x16x16x8xf32, #tpu.memory_space<vmem>>, vector<1x16x16x8xf32>
      %94 = vector.shape_cast %93 : vector<1x16x16x8xf32> to vector<16x16x8xf32>
      %95 = vector.shape_cast %92 : vector<16x16x8xf32> to vector<1x16x16x8xf32>
      tpu.vector_store %arg6[%c0_96, %c0_97, %c0_98, %c0_99], %95 {strides = array<i32>} : memref<1x16x16x8xf32, #tpu.memory_space<vmem>>, vector<1x16x16x8xf32>,
    } else {
    }
    return
  }
  func.func @transform_0(%arg0: i32, %arg1: i32, %arg2: i32) -> (i32, i32, i32, i32) {
    %c0_i32 = arith.constant 0 : i32
    %c0_i32_0 = arith.constant 0 : i32
    %c0_i32_1 = arith.constant 0 : i32
    return %arg0, %c0_i32, %c0_i32_0, %arg2 : i32, i32, i32, i32
  }
  func.func @transform_1(%arg0: i32, %arg1: i32, %arg2: i32) -> (i32, i32, i32, i32) {
    %c0_i32 = arith.constant 0 : i32
    %c0_i32_0 = arith.constant 0 : i32
    %c0_i32_1 = arith.constant 0 : i32
    return %c0_i32, %c0_i32_0, %arg2, %arg1 : i32, i32, i32, i32
  }
  func.func @transform_2(%arg0: i32, %arg1: i32, %arg2: i32) -> (i32, i32) {
    %c0_i32 = arith.constant 0 : i32
    %c0_i32_0 = arith.constant 0 : i32
    return %c0_i32, %arg1 : i32, i32
  }
  func.func @transform_3(%arg0: i32, %arg1: i32, %arg2: i32) -> (i32, i32, i32, i32) {
    %c0_i32 = arith.constant 0 : i32
    %c0_i32_0 = arith.constant 0 : i32
    %c0_i32_1 = arith.constant 0 : i32
    return %arg0, %c0_i32, %c0_i32_0, %arg1 : i32, i32, i32, i32
  }
}

</mosaic_0001>

<bundles_post_ra>
// kernel: tpu_custom_call.1
= control target key start
LH: loop header
LB: loop body
LE: loop exit
PB: predicated region body
PF: predicated region fallthrough
CT: control target
= control target key end

     0   :  { %s3602_s12 = smov 0   ;;  %s3604_s13 = smov 0   ;;  %s4945_s0 = inlined_call_operand.vmem [shape: bf16[2,20,20,4], index: 0, kind: input, shape index: {}]   ;;  %s4946_s1 = inlined_call_operand.vmem [shape: bf16[3,3,4,8], index: 1, kind: input, shape index: {}]   ;;  %s4947_s2 = inlined_call_operand.vmem [shape: f32[1,8], index: 2, kind: input, shape index: {}]   ;;  %s4948_s3 = inlined_call_operand.vmem [shape: f32[2,16,16,8], index: 3, kind: output, shape index: {}]  }
   0x1   :  { %s3606_s14 = smov 0  }
   0x2 LB: > { %s32_s15 = sadd.s32 1, %s3575_s13  ;;  %p3225_p0 = scmp.ge.s32.totalorder %s3579_s14, 1  ;;  %s3579_s14 = sphi %s3606_s14, %s13_s14   ;;  %s3575_s13 = sphi %s3604_s13, %s4954_s13   ;;  %s3571_s12 = sphi %s3602_s12, %s4953_s12  }
   0x3   : > { %p34_p1 = scmp.ge.s32.totalorder %s32_s15, 2  ;;  %p185_p2 = scmp.lt.s32.totalorder %s3579_s14, 3 }
   0x5   : > { %s4956_s15 = smov (%p34_p1, %s32_s15), 0  ;;  %p186_p3 = pnand %p3225_p0, %p185_p2 }
   0x6   : > { %p225_p4 = scmp.lt.s32.totalorder (!%p186_p3), %s3571_s12, 1 }
   0x7   : > { %189 = sbr.rel (%p186_p3) target bundleno = 760 (0x2f8), region = 32 }
   0xc   : > { %v361_v0 = vld [vmem:[%s4946_s1] sm:$0x3]  ;;  %vm491_vm0 = vcmask 1041408   ;;  %v3309_v2 = vld [vmem:[%s4946_s1 + $0x6] sm:$0x3]  ;;  %s4958_s12 = smov (!%p225_p4, %s3571_s12), 1 }
   0xd   : > { %v493_v1 = vsel %vm491_vm0, %v361_v0, 0  ;;  %v3334_v3 = vld [vmem:[%s4946_s1 + $0xc] sm:$0x3]  ;;  %v700_v4 = vsel %vm491_vm0, %v3309_v2, 0  ;;  %v3375_v6 = vld [vmem:[%s4946_s1 + $0x2] sm:$0x3] }
   0xe   : > { %3524 = vmatpush.bf16.msra.mxu1 %v493_v1  ;;  %3525 = vmatpush.bf16.msra.mxu2 %v493_v1  ;;  %v906_v5 = vsel %vm491_vm0, %v3334_v3, 0  ;;  %v1415_v7 = vsel %vm491_vm0, %v3375_v6, 0  ;;  %v3394_v8 = vld [vmem:[%s4946_s1 + $0x8] sm:$0x3]  ;;  %s3527_s26 = smul.u32 240, %s4958_s12  ;;  %vm442_vm1 = vcmask 31744  }
   0xf   : > { %3526 = vmatpush.bf16.msra.mxu3 %v493_v1  ;;  %v1637_v9 = vsel %vm491_vm0, %v3394_v8, 0  ;;  %502 = vmatpush.bf16.msra.mxu0 %v493_v1  ;;  %v3413_v22 = vld [vmem:[%s4946_s1 + $0xe] sm:$0x3]  ;;  %v3446_v23 = vld [vmem:[%s4946_s1 + $0x4] sm:$0x3]  ;;  %vm1201_vm2 = vcmask 1042432  }
  0x10   : > { %s3646_s29 = scalar_lea.vmem %s4945_s0, %s3527_s26  ;;  %v1859_v24 = vsel %vm491_vm0, %v3413_v22, 0  ;;  %v2368_v25 = vsel %vm491_vm0, %v3446_v23, 0  ;;  %v3465_v26 = vld [vmem:[%s4946_s1 + $0xa] sm:$0x3]  ;;  %vm1202_vm3 = vcmask 1046532   ;;  %vm256_vm5 = vcmask 64512  }
  0x11   : > { %v3649_v10 = vld [vmem:[%s3646_s29 + $0x30] sm:$0xff]  ;;  %v3652_v11 = vld [vmem:[%s3646_s29 + $0x60] sm:$0xff]  ;;  %v3683_v18 = vld [vmem:[%s3646_s29 + $0x48] sm:$0xff]  ;;  %v2590_v27 = vsel %vm491_vm0, %v3465_v26, 0  ;;  %vm2155_vm6 = vcmask 1045508   ;;  %s3503_s17 = sshll.u32 %s4958_s12, 8 }
  0x12   : > { %709 = vmatpush.bf16.msrb.mxu1 %v700_v4  ;;  %915 = vmatpush.bf16.msrb.mxu2 %v906_v5  ;;  %v3655_v12 = vld [vmem:[%s3646_s29 + $0x90] sm:$0xff]  ;;  %v3504_v13 = vld [vmem:[%s3646_s29] sm:$0xff]  ;;  %v3686_v19 = vld [vmem:[%s3646_s29 + $0x78] sm:$0xff]  ;;  %s4593_s19 = scalar_lea.vmem %s4948_s3, %s3503_s17 }
  0x13   : > { %1424 = vmatpush.bf16.msrb.mxu3 %v1415_v7  ;;  %1646 = vmatpush.bf16.msrb.mxu0 %v1637_v9  ;;  %v3666_v14 = vld [vmem:[%s3646_s29 + $0x3c] sm:$0xff]  ;;  %v3669_v15 = vld [vmem:[%s3646_s29 + $0x6c] sm:$0xff]  ;;  %v1062_v28 = vld [vmem:[%s3646_s29 + $0x4] sm:$0xf] }
  0x14   : > { %3297 = vmatmul.msk.bf16.vlgmr.msra.gmra.mxu1 %vm442_vm1, %v3649_v10  ;;  %3301 = vmatmul.msk.bf16.vlgmr.msra.gmra.mxu2 %vm442_vm1, %v3652_v11  ;;  %v3672_v16 = vld [vmem:[%s3646_s29 + $0x9c] sm:$0xff]  ;;  %v3505_v17 = vld [vmem:[%s3646_s29 + $0xc] sm:$0xff]  ;;  %v3713_v29 = vld [vmem:[%s3646_s29 + $0x54] sm:$0xff]  ;;  %v1206_v34 = vrot.slane %v1062_v28, 5 }
  0x15   : > { %3305 = vmatmul.msk.bf16.vlgmr.msra.gmra.mxu3 %vm442_vm1, %v3655_v12  ;;  %3293 = vmatmul.msk.bf16.vlgmr.msra.gmra.mxu0 %vm442_vm1, %v3504_v13  ;;  %v3689_v20 = vld [vmem:[%s3646_s29 + $0xa8] sm:$0xff]  ;;  %v3506_v21 = vld [vmem:[%s3646_s29 + $0x18] sm:$0xff]  ;;  %v1061_v35 = vld [vmem:[%s3646_s29] sm:$0xe] }
  0x16   : > { %1868 = vmatpush.bf16.msra.mxu1 %v1859_v24  ;;  %2377 = vmatpush.bf16.msra.mxu2 %v2368_v25  ;;  %v3716_v30 = vld [vmem:[%s3646_s29 + $0x84] sm:$0xff]  ;;  %v1068_v31 = vld [vmem:[%s3646_s29 + $0x1c] sm:$0xf]  ;;  %v3720_v32 = vld [vmem:[%s3646_s29 + $0xb4] sm:$0xff]  ;;  %v3359_v40 = vrot.slane %v1061_v35, 9  ;;  %v1208_v41 = vrot.slane %v1206_v34, 4 }
  0x17   : > { %2599 = vmatpush.bf16.msra.mxu3 %v2590_v27  ;;  %v3723_v33 = vld [vmem:[%s3646_s29 + $0x24] sm:$0xff]  ;;  %v1220_v36 = vrot.slane %v1068_v31, 5  ;;  %v1067_v38 = vld [vmem:[%s3646_s29 + $0x18] sm:$0xe]  ;;  %v1069_v39 = vld [vmem:[%s3646_s29 + $0x20] sm:$0x1] }
  0x18   : > { %v1063_v37 = vld [vmem:[%s3646_s29 + $0x8] sm:$0x1]  ;;  %v3484_v42 = vld [vmem:[%s4946_s1 + $0x10] sm:$0x3]  ;;  %v3361_v44 = vrot.slane %v1067_v38, 9  ;;  %v1223_v46 = vrot.slane %v1069_v39, 5  ;;  %vm3740_vm4 = vmor %vm1201_vm2, %vm1202_vm3 }
  0x19   : > { %v1209_v43 = vrot.slane %v1063_v37, 5  ;;  %v1222_v45 = vrot.slane %v1220_v36, 4  ;;  %v2812_v48 = vsel %vm491_vm0, %v3484_v42, 0  ;;  %v1207_v49 = vsel %vm3740_vm4, %v3359_v40, %v1206_v34  ;;  %v1065_v57 = vld [vmem:[%s3646_s29 + $0x10] sm:$0xf]  ;;  %vm4197_vm7 = vmor %vm491_vm0, %vm2155_vm6 }
  0x1a   : > { %2821 = vmatpush.bf16.msra.mxu0 %v2812_v48  ;;  %v1221_v51 = vsel %vm3740_vm4, %v3361_v44, %v1220_v36  ;;  %v1318_v53 = vunpack.c.l.b16 %v1207_v49  ;;  %v1071_v58 = vld [vmem:[%s3646_s29 + $0x28] sm:$0xf]  ;;  %v1213_v60 = vrot.slane %v1065_v57, 5  ;;  %v1064_v62 = vld [vmem:[%s3646_s29 + $0xc] sm:$0xe]  ;;  %v3581_v39 = vmov 0.0  }
  0x1b   : > { %v1210_v50 = vsel %vm3740_vm4, %v1208_v41, %v1209_v43  ;;  %v1224_v52 = vsel %vm3740_vm4, %v1222_v45, %v1223_v46  ;;  %v1322_v55 = vunpack.c.l.b16 %v1221_v51  ;;  %v1227_v63 = vrot.slane %v1071_v58, 5  ;;  %v1066_v0 = vld [vmem:[%s3646_s29 + $0x14] sm:$0x1]  ;;  %v1070_v1 = vld [vmem:[%s3646_s29 + $0x24] sm:$0xe]  ;;  %265 = vst.msk [vmem:[#allocation2 + $0x40] sm:$0xff] %vm256_vm5, %v3581_v39 }
  0x1c   : > { %v1319_v54 = vunpack.c.l.b16 %v1210_v50  ;;  %v1323_v56 = vunpack.c.l.b16 %v1224_v52  ;;  %v1072_v2 = vld [vmem:[%s3646_s29 + $0x2c] sm:$0x1]  ;;  %v3360_v3 = vrot.slane %v1064_v62, 9  ;;  %v1215_v4 = vrot.slane %v1213_v60, 4  ;;  %v1074_v26 = vld [vmem:[%s3646_s29 + $0x34] sm:$0xf] }
  0x1d   : > { %v1216_v5 = vrot.slane %v1066_v0, 5  ;;  %v3362_v6 = vrot.slane %v1070_v1, 9  ;;  %v1229_v7 = vrot.slane %v1227_v63, 4  ;;  %v1230_v8 = vrot.slane %v1072_v2, 5  ;;  %v1073_v34 = vld [vmem:[%s3646_s29 + $0x30] sm:$0xe] }
  0x1e   : > { %v1350_v59 = vpack.c.b16 %v1319_v54, %v1318_v53  ;;  %v3755_v61 = vpack.c.b16 %v1323_v56, %v1322_v55  ;;  %v1214_v9 = vsel %vm3740_vm4, %v3360_v3, %v1213_v60  ;;  %v1234_v31 = vrot.slane %v1074_v26, 5  ;;  %v1075_v35 = vld [vmem:[%s3646_s29 + $0x38] sm:$0x1]  ;;  %257 = vst.msk [vmem:[#allocation2] sm:$0xff] %vm256_vm5, %v3581_v39  ;;  %v1077_v43 = vld [vmem:[%s3646_s29 + $0x40] sm:$0xf] }
  0x1f   : > { %v1217_v13 = vsel %vm3740_vm4, %v1215_v4, %v1216_v5  ;;  %v1320_v22 = vunpack.c.l.b16 %v1214_v9  ;;  %v3363_v36 = vrot.slane %v1073_v34, 9  ;;  %v1237_v38 = vrot.slane %v1075_v35, 5  ;;  %258 = vst.msk [vmem:[#allocation2 + $0x8] sm:$0xff] %vm256_vm5, %v3581_v39  ;;  %v1076_v46 = vld [vmem:[%s3646_s29 + $0x3c] sm:$0xe] }
  0x20   : > { %v1321_v23 = vunpack.c.l.b16 %v1217_v13  ;;  %v1236_v37 = vrot.slane %v1234_v31, 4  ;;  %259 = vst.msk [vmem:[#allocation2 + $0x10] sm:$0xff] %vm256_vm5, %v3581_v39  ;;  %v1241_v45 = vrot.slane %v1077_v43, 5  ;;  %v1078_v48 = vld [vmem:[%s3646_s29 + $0x44] sm:$0x1]  ;;  %v3364_v49 = vrot.slane %v1076_v46, 9 }
  0x21   : > { %260 = vst.msk [vmem:[#allocation2 + $0x18] sm:$0xff] %vm256_vm5, %v3581_v39  ;;  %v1244_v51 = vrot.slane %v1078_v48, 5  ;;  %v1080_v55 = vld [vmem:[%s3646_s29 + $0x4c] sm:$0xf]  ;;  %v1079_v58 = vld [vmem:[%s3646_s29 + $0x48] sm:$0xe] }
  0x22   : > { %v1351_v27 = vpack.c.b16 %v1321_v23, %v1320_v22  ;;  %v1238_v40 = vsel %vm3740_vm4, %v1236_v37, %v1237_v38  ;;  %261 = vst.msk [vmem:[#allocation2 + $0x20] sm:$0xff] %vm256_vm5, %v3581_v39  ;;  %v1243_v50 = vrot.slane %v1241_v45, 4  ;;  %v1248_v57 = vrot.slane %v1080_v55, 5  ;;  %v337_v2 = vld [vmem:[#allocation2 + $0x40] sm:$0xff]  ;;  %v1083_v4 = vld [vmem:[%s3646_s29 + $0x58] sm:$0xf] }
  0x23   : > { %262 = vst.msk [vmem:[#allocation2 + $0x28] sm:$0xff] %vm256_vm5, %v3581_v39  ;;  %v1327_v42 = vunpack.c.l.b16 %v1238_v40  ;;  %v3365_v60 = vrot.slane %v1079_v58, 9  ;;  %v1255_v9 = vrot.slane %v1083_v4, 5 }
  0x24   : > { %3298 = vmatmul.msk.bf16.gmra.mxu1 %vm442_vm1, %v3666_v14  ;;  %3302 = vmatmul.msk.bf16.gmra.mxu2 %vm442_vm1, %v3669_v15  ;;  %263 = vst.msk [vmem:[#allocation2 + $0x30] sm:$0xff] %vm256_vm5, %v3581_v39  ;;  %v1245_v52 = vsel %vm3740_vm4, %v1243_v50, %v1244_v51 }
  0x25   : > { %3306 = vmatmul.msk.bf16.gmra.mxu3 %vm442_vm1, %v3672_v16  ;;  %3294 = vmatmul.msk.bf16.gmra.mxu0 %vm442_vm1, %v3505_v17  ;;  %v1228_v17 = vsel %vm3740_vm4, %v3362_v6, %v1227_v63  ;;  %264 = vst.msk [vmem:[#allocation2 + $0x38] sm:$0xff] %vm256_vm5, %v3581_v39  ;;  %v1329_v54 = vunpack.c.l.b16 %v1245_v52  ;;  %v329_v3 = vld [vmem:[#allocation2] sm:$0xff] }
  0x26   : > { %v1324_v24 = vunpack.c.l.b16 %v1228_v17  ;;  %266 = vst.msk [vmem:[#allocation2 + $0x48] sm:$0xff] %vm256_vm5, %v3581_v39  ;;  %v1082_v17 = vld [vmem:[%s3646_s29 + $0x54] sm:$0xe]  ;;  %v330_v34 = vld [vmem:[#allocation2 + $0x8] sm:$0xff] }
  0x27   : > { %267 = vst.msk [vmem:[#allocation2 + $0x50] sm:$0xff] %vm256_vm5, %v3581_v39  ;;  %v331_v51 = vld [vmem:[#allocation2 + $0x10] sm:$0xff] }
  0x28   : > { %268 = vst.msk [vmem:[#allocation2 + $0x58] sm:$0xff] %vm256_vm5, %v3581_v39 }
  0x29   : > { %269 = vst.msk [vmem:[#allocation2 + $0x60] sm:$0xff] %vm256_vm5, %v3581_v39 }
  0x2a   : > { %270 = vst.msk [vmem:[#allocation2 + $0x68] sm:$0xff] %vm256_vm5, %v3581_v39 }
  0x2b   : > { %271 = vst.msk [vmem:[#allocation2 + $0x70] sm:$0xff] %vm256_vm5, %v3581_v39 }
  0x2c   : > { %272 = vst.msk [vmem:[#allocation2 + $0x78] sm:$0xff] %vm256_vm5, %v3581_v39 }
  0x2d   : > { %273 = vst.msk [vmem:[#allocation2 + $0x80] sm:$0xff] %vm256_vm5, %v3581_v39 }
  0x2e   : > { %274 = vst.msk [vmem:[#allocation2 + $0x88] sm:$0xff] %vm256_vm5, %v3581_v39  ;;  %v339_v48 = vld [vmem:[#allocation2 + $0x50] sm:$0xff] }
  0x2f   : > { %275 = vst.msk [vmem:[#allocation2 + $0x90] sm:$0xff] %vm256_vm5, %v3581_v39 }
  0x30   : > { %276 = vst.msk [vmem:[#allocation2 + $0x98] sm:$0xff] %vm256_vm5, %v3581_v39 }
  0x31   : > { %277 = vst.msk [vmem:[#allocation2 + $0xa0] sm:$0xff] %vm256_vm5, %v3581_v39 }
  0x32   : > { %278 = vst.msk [vmem:[#allocation2 + $0xa8] sm:$0xff] %vm256_vm5, %v3581_v39 }
  0x33   : > { %279 = vst.msk [vmem:[#allocation2 + $0xb0] sm:$0xff] %vm256_vm5, %v3581_v39 }
  0x34   : > { %3299 = vmatmul.msk.bf16.gmra.mxu1 %vm442_vm1, %v3683_v18  ;;  %3303 = vmatmul.msk.bf16.gmra.mxu2 %vm442_vm1, %v3686_v19  ;;  %280 = vst.msk [vmem:[#allocation2 + $0xb8] sm:$0xff] %vm256_vm5, %v3581_v39  ;;  %v345_v22 = vld [vmem:[#allocation2 + $0x80] sm:$0xff] }
  0x35   : > { %3307 = vmatmul.msk.bf16.gmra.mxu3 %vm442_vm1, %v3689_v20  ;;  %3295 = vmatmul.msk.bf16.gmra.mxu0 %vm442_vm1, %v3506_v21  ;;  %281 = vst.msk [vmem:[#allocation2 + $0xc0] sm:$0xff] %vm256_vm5, %v3581_v39 }
  0x36   : > { %282 = vst.msk [vmem:[#allocation2 + $0xc8] sm:$0xff] %vm256_vm5, %v3581_v39 }
  0x37   : > { %283 = vst.msk [vmem:[#allocation2 + $0xd0] sm:$0xff] %vm256_vm5, %v3581_v39 }
  0x38   : > { %284 = vst.msk [vmem:[#allocation2 + $0xd8] sm:$0xff] %vm256_vm5, %v3581_v39 }
  0x39   : > { %285 = vst.msk [vmem:[#allocation2 + $0xe0] sm:$0xff] %vm256_vm5, %v3581_v39 }
  0x3a   : > { %286 = vst.msk [vmem:[#allocation2 + $0xe8] sm:$0xff] %vm256_vm5, %v3581_v39 }
  0x3b   : > { %287 = vst.msk [vmem:[#allocation2 + $0xf0] sm:$0xff] %vm256_vm5, %v3581_v39 }
  0x3c   : > { %288 = vst.msk [vmem:[#allocation2 + $0xf8] sm:$0xff] %vm256_vm5, %v3581_v39  ;;  %v353_v23 = vld [vmem:[#allocation2 + $0xc0] sm:$0xff] }
  0x44   : > { %3300 = vmatmul.msk.bf16.gmra.mxu1 %vm442_vm1, %v3713_v29  ;;  %3304 = vmatmul.msk.bf16.gmra.mxu2 %vm442_vm1, %v3716_v30 }
  0x45   : > { %3308 = vmatmul.msk.bf16.gmra.mxu3 %vm442_vm1, %v3720_v32  ;;  %3296 = vmatmul.msk.bf16.gmra.mxu0 %vm442_vm1, %v3723_v33 }
  0x54   : > { %3318 = vmatmul.msk.bf16.vlgmr.msrb.gmra.mxu1 %vm442_vm1, %v3506_v21  ;;  %3343 = vmatmul.msk.bf16.vlgmr.msrb.gmra.mxu2 %vm442_vm1, %v3649_v10  ;;  %v1231_v21 = vsel %vm3740_vm4, %v1229_v7, %v1230_v8 }
  0x55   : > { %3376 = vmatmul.msk.bf16.vlgmr.msrb.gmra.mxu3 %vm442_vm1, %v1350_v59  ;;  %3395 = vmatmul.msk.bf16.vlgmr.msrb.gmra.mxu0 %vm442_vm1, %v3755_v61  ;;  %v1325_v25 = vunpack.c.l.b16 %v1231_v21  ;;  %v1081_v59 = vld [vmem:[%s3646_s29 + $0x50] sm:$0x1]  ;;  %v1084_v21 = vld [vmem:[%s3646_s29 + $0x5c] sm:$0x1] }
  0x56   : > { %v1251_v62 = vrot.slane %v1081_v59, 5  ;;  %v1258_v26 = vrot.slane %v1084_v21, 5 }
  0x57   : > { %v3776_v28 = vpack.c.b16 %v1325_v25, %v1324_v24  ;;  %v3366_v24 = vrot.slane %v1082_v17, 9  ;;  %v1257_v25 = vrot.slane %v1255_v9, 4 }
  0x59   : > { %v1256_v39 = vsel %vm3740_vm4, %v3366_v24, %v1255_v9 }
  0x64   : > { %3319 = vmatmul.msk.bf16.gmra.mxu1 %vm442_vm1, %v3723_v33  ;;  %3344 = vmatmul.msk.bf16.gmra.mxu2 %vm442_vm1, %v3666_v14  ;;  %v1235_v33 = vsel %vm3740_vm4, %v3363_v36, %v1234_v31 }
  0x65   : > { %3377 = vmatmul.msk.bf16.gmra.mxu3 %vm442_vm1, %v1351_v27  ;;  %3396 = vmatmul.msk.bf16.gmra.mxu0 %vm442_vm1, %v3776_v28  ;;  %v1326_v41 = vunpack.c.l.b16 %v1235_v33  ;;  %v1259_v33 = vsel %vm3740_vm4, %v1257_v25, %v1258_v26  ;;  %v356_v26 = vld [vmem:[#allocation2 + $0xd8] sm:$0xff] }
  0x66   : > { %v1333_v43 = vunpack.c.l.b16 %v1259_v33 }
  0x67   : > { %v3803_v44 = vpack.c.b16 %v1327_v42, %v1326_v41  ;;  %v346_v41 = vld [vmem:[#allocation2 + $0x88] sm:$0xff]  ;;  %v1332_v42 = vunpack.c.l.b16 %v1256_v39 }
  0x74   : > { %3320 = vmatmul.msk.bf16.gmra.mxu1 %vm442_vm1, %v3649_v10  ;;  %3345 = vmatmul.msk.bf16.gmra.mxu2 %vm442_vm1, %v3683_v18  ;;  %v1242_v10 = vsel %vm3740_vm4, %v3364_v49, %v1241_v45  ;;  %v354_v45 = vld [vmem:[#allocation2 + $0xc8] sm:$0xff] }
  0x75   : > { %3378 = vmatmul.msk.bf16.gmra.mxu3 %vm442_vm1, %v3755_v61  ;;  %3397 = vmatmul.msk.bf16.gmra.mxu0 %vm442_vm1, %v3803_v44  ;;  %v1328_v53 = vunpack.c.l.b16 %v1242_v10  ;;  %v1250_v61 = vrot.slane %v1248_v57, 4  ;;  %v1086_v10 = vld [vmem:[%s3646_s29 + $0x64] sm:$0xf] }
  0x76   : > { %v1262_v58 = vrot.slane %v1086_v10, 5  ;;  %v342_v10 = vld [vmem:[#allocation2 + $0x68] sm:$0xff] }
  0x77   : > { %v3837_v56 = vpack.c.b16 %v1329_v54, %v1328_v53  ;;  %v1252_v63 = vsel %vm3740_vm4, %v1250_v61, %v1251_v62  ;;  %v3881_v54 = vpack.c.b16 %v1333_v43, %v1332_v42  ;;  %v1087_v61 = vld [vmem:[%s3646_s29 + $0x68] sm:$0x1]  ;;  %v347_v62 = vld [vmem:[#allocation2 + $0x90] sm:$0xff]  ;;  %v1088_v42 = vld [vmem:[%s3646_s29 + $0x6c] sm:$0xe] }
  0x78   : > { %v1331_v1 = vunpack.c.l.b16 %v1252_v63  ;;  %v1090_v43 = vld [vmem:[%s3646_s29 + $0x74] sm:$0x1] }
  0x84   : > { %3321 = vmatmul.msk.bf16.gmra.mxu1 %vm442_vm1, %v3666_v14  ;;  %3346 = vmatmul.msk.bf16.gmra.mxu2 %vm442_vm1, %v3713_v29  ;;  %v1249_v14 = vsel %vm3740_vm4, %v3365_v60, %v1248_v57  ;;  %v1085_v60 = vld [vmem:[%s3646_s29 + $0x60] sm:$0xe] }
  0x85   : > { %3379 = vmatmul.msk.bf16.gmra.mxu3 %vm442_vm1, %v3776_v28  ;;  %3398 = vmatmul.msk.bf16.gmra.mxu0 %vm442_vm1, %v3837_v56  ;;  %v1330_v0 = vunpack.c.l.b16 %v1249_v14  ;;  %v338_v28 = vld [vmem:[#allocation2 + $0x48] sm:$0xff]  ;;  %v355_v14 = vld [vmem:[#allocation2 + $0xd0] sm:$0xff]  ;;  %v3367_v63 = vrot.slane %v1085_v60, 9 }
  0x87   : > { %v3858_v6 = vpack.c.b16 %v1331_v1, %v1330_v0  ;;  %v1264_v0 = vrot.slane %v1262_v58, 4  ;;  %v1265_v1 = vrot.slane %v1087_v61, 5  ;;  %v1263_v17 = vsel %vm3740_vm4, %v3367_v63, %v1262_v58 }
  0x88   : > { %v1334_v24 = vunpack.c.l.b16 %v1263_v17 }
  0x89   : > { %v1266_v21 = vsel %vm3740_vm4, %v1264_v0, %v1265_v1  ;;  %v358_v1 = vld [vmem:[#allocation2 + $0xe8] sm:$0xff] }
  0x8a   : > { %v1335_v25 = vunpack.c.l.b16 %v1266_v21 }
  0x91   : > { %v524_v5 = vpop.f32.mrf.mxu1 }
  0x92   : > { %v592_v7 = vadd.f32 %v524_v5, %v337_v2  ;;  %v504_v8 = vpop.f32.mrf.mxu0  ;;  %v332_v5 = vld [vmem:[#allocation2 + $0x18] sm:$0xff] }
  0x93   : > { %v584_v13 = vadd.f32 %v504_v8, %v329_v3  ;;  %v340_v3 = vld [vmem:[#allocation2 + $0x58] sm:$0xff] }
  0x94   : > { %625 = vst.msk [vmem:[#allocation2 + $0x40] sm:$0xff] %vm256_vm5, %v592_v7  ;;  %3322 = vmatmul.msk.bf16.gmra.mxu1 %vm442_vm1, %v3683_v18  ;;  %3347 = vmatmul.msk.bf16.gmra.mxu2 %vm442_vm1, %v3652_v11 }
  0x95   : > { %3380 = vmatmul.msk.bf16.gmra.mxu3 %vm442_vm1, %v3803_v44  ;;  %617 = vst.msk [vmem:[#allocation2] sm:$0xff] %vm256_vm5, %v584_v13  ;;  %3399 = vmatmul.msk.bf16.gmra.mxu0 %vm442_vm1, %v3858_v6 }
  0x97   : > { %v544_v27 = vpop.f32.mrf.mxu2 }
  0x98   : > { %v600_v31 = vadd.f32 %v544_v27, %v345_v22  ;;  %v564_v18 = vpop.f32.mrf.mxu3 }
  0x99   : > { %v526_v35 = vpop.f32.mrf.mxu1  ;;  %v608_v36 = vadd.f32 %v564_v18, %v353_v23  ;;  %v348_v23 = vld [vmem:[#allocation2 + $0x98] sm:$0xff] }
  0x9a   : > { %633 = vst.msk [vmem:[#allocation2 + $0x80] sm:$0xff] %vm256_vm5, %v600_v31  ;;  %v593_v37 = vadd.f32 %v526_v35, %v338_v28  ;;  %v506_v38 = vpop.f32.mrf.mxu0  ;;  %v341_v28 = vld [vmem:[#allocation2 + $0x60] sm:$0xff]  ;;  %v1089_v35 = vld [vmem:[%s3646_s29 + $0x70] sm:$0xf] }
  0x9b   : > { %641 = vst.msk [vmem:[#allocation2 + $0xc0] sm:$0xff] %vm256_vm5, %v608_v36  ;;  %v585_v40 = vadd.f32 %v506_v38, %v330_v34  ;;  %v333_v34 = vld [vmem:[#allocation2 + $0x20] sm:$0xff]  ;;  %v3906_v38 = vpack.c.b16 %v1335_v25, %v1334_v24  ;;  %v1091_v24 = vld [vmem:[%s3646_s29 + $0x78] sm:$0xe] }
  0x9c   : > { %626 = vst.msk [vmem:[#allocation2 + $0x48] sm:$0xff] %vm256_vm5, %v593_v37  ;;  %v1093_v25 = vld [vmem:[%s3646_s29 + $0x80] sm:$0x1] }
  0x9d   : > { %618 = vst.msk [vmem:[#allocation2 + $0x8] sm:$0xff] %vm256_vm5, %v585_v40  ;;  %v1269_v40 = vrot.slane %v1089_v35, 5  ;;  %v344_v35 = vld [vmem:[#allocation2 + $0x78] sm:$0xff] }
  0x9f   : > { %v546_v46 = vpop.f32.mrf.mxu2 }
  0xa0   : > { %v601_v49 = vadd.f32 %v546_v46, %v346_v41  ;;  %v566_v50 = vpop.f32.mrf.mxu3  ;;  %v357_v46 = vld [vmem:[#allocation2 + $0xe0] sm:$0xff] }
  0xa1   : > { %v529_v52 = vpop.f32.mrf.mxu1  ;;  %v609_v53 = vadd.f32 %v566_v50, %v354_v45  ;;  %v349_v45 = vld [vmem:[#allocation2 + $0xa0] sm:$0xff]  ;;  %v1272_v50 = vrot.slane %v1090_v43, 5 }
  0xa2   : > { %634 = vst.msk [vmem:[#allocation2 + $0x88] sm:$0xff] %vm256_vm5, %v601_v49  ;;  %v594_v55 = vadd.f32 %v529_v52, %v339_v48  ;;  %v509_v57 = vpop.f32.mrf.mxu0  ;;  %v3368_v48 = vrot.slane %v1088_v42, 9  ;;  %v1271_v49 = vrot.slane %v1269_v40, 4 }
  0xa3   : > { %642 = vst.msk [vmem:[#allocation2 + $0xc8] sm:$0xff] %vm256_vm5, %v609_v53  ;;  %v586_v59 = vadd.f32 %v509_v57, %v331_v51  ;;  %v334_v53 = vld [vmem:[#allocation2 + $0x28] sm:$0xff] }
  0xa4   : > { %627 = vst.msk [vmem:[#allocation2 + $0x50] sm:$0xff] %vm256_vm5, %v594_v55  ;;  %3323 = vmatmul.msk.bf16.gmra.mxu1 %vm442_vm1, %v3713_v29  ;;  %3348 = vmatmul.msk.bf16.gmra.mxu2 %vm442_vm1, %v3669_v15  ;;  %v1270_v60 = vsel %vm3740_vm4, %v3368_v48, %v1269_v40  ;;  %v1273_v61 = vsel %vm3740_vm4, %v1271_v49, %v1272_v50  ;;  %v360_v50 = vld [vmem:[#allocation2 + $0xf8] sm:$0xff] }
  0xa5   : > { %3381 = vmatmul.msk.bf16.gmra.mxu3 %vm442_vm1, %v3837_v56  ;;  %619 = vst.msk [vmem:[#allocation2 + $0x10] sm:$0xff] %vm256_vm5, %v586_v59  ;;  %3400 = vmatmul.msk.bf16.gmra.mxu0 %vm442_vm1, %v3881_v54  ;;  %v1336_v63 = vunpack.c.l.b16 %v1270_v60  ;;  %v1337_v0 = vunpack.c.l.b16 %v1273_v61 }
  0xa7   : > { %v549_v2 = vpop.f32.mrf.mxu2 }
  0xa8   : > { %v602_v4 = vadd.f32 %v549_v2, %v347_v62  ;;  %v569_v29 = vpop.f32.mrf.mxu3 }
  0xa9   : > { %v531_v7 = vpop.f32.mrf.mxu1  ;;  %v610_v8 = vadd.f32 %v569_v29, %v355_v14  ;;  %v350_v14 = vld [vmem:[#allocation2 + $0xa8] sm:$0xff] }
  0xaa   : > { %635 = vst.msk [vmem:[#allocation2 + $0x90] sm:$0xff] %vm256_vm5, %v602_v4  ;;  %v595_v9 = vadd.f32 %v531_v7, %v340_v3  ;;  %v511_v13 = vpop.f32.mrf.mxu0  ;;  %v343_v3 = vld [vmem:[#allocation2 + $0x70] sm:$0xff]  ;;  %v1092_v7 = vld [vmem:[%s3646_s29 + $0x7c] sm:$0xf] }
  0xab   : > { %643 = vst.msk [vmem:[#allocation2 + $0xd0] sm:$0xff] %vm256_vm5, %v610_v8  ;;  %v587_v22 = vadd.f32 %v511_v13, %v332_v5  ;;  %v335_v5 = vld [vmem:[#allocation2 + $0x30] sm:$0xff]  ;;  %v3931_v13 = vpack.c.b16 %v1337_v0, %v1336_v63 }
  0xac   : > { %628 = vst.msk [vmem:[#allocation2 + $0x58] sm:$0xff] %vm256_vm5, %v595_v9 }
  0xad   : > { %620 = vst.msk [vmem:[#allocation2 + $0x18] sm:$0xff] %vm256_vm5, %v587_v22  ;;  %v1276_v22 = vrot.slane %v1092_v7, 5 }
  0xaf   : > { %v551_v27 = vpop.f32.mrf.mxu2 }
  0xb0   : > { %v603_v31 = vadd.f32 %v551_v27, %v348_v23  ;;  %v571_v18 = vpop.f32.mrf.mxu3  ;;  %v359_v27 = vld [vmem:[#allocation2 + $0xf0] sm:$0xff] }
  0xb1   : > { %v534_v36 = vpop.f32.mrf.mxu1  ;;  %v611_v37 = vadd.f32 %v571_v18, %v356_v26  ;;  %v351_v26 = vld [vmem:[#allocation2 + $0xb0] sm:$0xff]  ;;  %v1279_v18 = vrot.slane %v1093_v25, 5 }
  0xb2   : > { %636 = vst.msk [vmem:[#allocation2 + $0x98] sm:$0xff] %vm256_vm5, %v603_v31  ;;  %v596_v39 = vadd.f32 %v534_v36, %v341_v28  ;;  %v514_v33 = vpop.f32.mrf.mxu0  ;;  %v3369_v28 = vrot.slane %v1091_v24, 9  ;;  %v1278_v31 = vrot.slane %v1276_v22, 4  ;;  %v1098_v25 = vld [vmem:[%s3646_s29 + $0x94] sm:$0xf] }
  0xb3   : > { %644 = vst.msk [vmem:[#allocation2 + $0xd8] sm:$0xff] %vm256_vm5, %v611_v37  ;;  %v588_v41 = vadd.f32 %v514_v33, %v333_v34  ;;  %v336_v37 = vld [vmem:[#allocation2 + $0x38] sm:$0xff] }
  0xb4   : > { %629 = vst.msk [vmem:[#allocation2 + $0x60] sm:$0xff] %vm256_vm5, %v596_v39  ;;  %3324 = vmatmul.msk.bf16.gmra.mxu1 %vm442_vm1, %v3652_v11  ;;  %3349 = vmatmul.msk.bf16.gmra.mxu2 %vm442_vm1, %v3686_v19  ;;  %v1277_v42 = vsel %vm3740_vm4, %v3369_v28, %v1276_v22  ;;  %v1280_v43 = vsel %vm3740_vm4, %v1278_v31, %v1279_v18 }
  0xb5   : > { %3382 = vmatmul.msk.bf16.gmra.mxu3 %vm442_vm1, %v3858_v6  ;;  %621 = vst.msk [vmem:[#allocation2 + $0x20] sm:$0xff] %vm256_vm5, %v588_v41  ;;  %3401 = vmatmul.msk.bf16.gmra.mxu0 %vm442_vm1, %v3906_v38  ;;  %v1338_v48 = vunpack.c.l.b16 %v1277_v42  ;;  %v1339_v49 = vunpack.c.l.b16 %v1280_v43 }
  0xb7   : > { %v554_v51 = vpop.f32.mrf.mxu2 }
  0xb8   : > { %v604_v52 = vadd.f32 %v554_v51, %v349_v45  ;;  %v574_v11 = vpop.f32.mrf.mxu3 }
  0xb9   : > { %v536_v55 = vpop.f32.mrf.mxu1  ;;  %v612_v57 = vadd.f32 %v574_v11, %v357_v46  ;;  %v352_v46 = vld [vmem:[#allocation2 + $0xb8] sm:$0xff]  ;;  %v1095_v11 = vld [vmem:[%s3646_s29 + $0x88] sm:$0xf] }
  0xba   : > { %637 = vst.msk [vmem:[#allocation2 + $0xa0] sm:$0xff] %vm256_vm5, %v604_v52  ;;  %v597_v58 = vadd.f32 %v536_v55, %v342_v10  ;;  %v516_v59 = vpop.f32.mrf.mxu0  ;;  %v1283_v61 = vrot.slane %v1095_v11, 5 }
  0xbb   : > { %645 = vst.msk [vmem:[#allocation2 + $0xe0] sm:$0xff] %vm256_vm5, %v612_v57  ;;  %v589_v62 = vadd.f32 %v516_v59, %v334_v53  ;;  %v649_v53 = vld [vmem:[#allocation2] sm:$0xff] }
  0xbc   : > { %630 = vst.msk [vmem:[#allocation2 + $0x68] sm:$0xff] %vm256_vm5, %v597_v58  ;;  %v3956_v58 = vpack.c.b16 %v1339_v49, %v1338_v48  ;;  %v1285_v0 = vrot.slane %v1283_v61, 4 }
  0xbd   : > { %622 = vst.msk [vmem:[#allocation2 + $0x28] sm:$0xff] %vm256_vm5, %v589_v62  ;;  %v1094_v62 = vld [vmem:[%s3646_s29 + $0x84] sm:$0xe] }
  0xbe   : > { %v3370_v63 = vrot.slane %v1094_v62, 9 }
  0xbf   : > { %v556_v2 = vpop.f32.mrf.mxu2 }
  0xc0   : > { %v605_v4 = vadd.f32 %v556_v2, %v350_v14  ;;  %v576_v29 = vpop.f32.mrf.mxu3  ;;  %v1096_v14 = vld [vmem:[%s3646_s29 + $0x8c] sm:$0x1] }
  0xc1   : > { %v539_v8 = vpop.f32.mrf.mxu1  ;;  %v613_v9 = vadd.f32 %v576_v29, %v358_v1  ;;  %v1286_v1 = vrot.slane %v1096_v14, 5 }
  0xc2   : > { %638 = vst.msk [vmem:[#allocation2 + $0xa8] sm:$0xff] %vm256_vm5, %v605_v4  ;;  %v598_v17 = vadd.f32 %v539_v8, %v343_v3  ;;  %v519_v21 = vpop.f32.mrf.mxu0  ;;  %v650_v4 = vld [vmem:[#allocation2 + $0x8] sm:$0xff] }
  0xc3   : > { %646 = vst.msk [vmem:[#allocation2 + $0xe8] sm:$0xff] %vm256_vm5, %v613_v9  ;;  %v590_v23 = vadd.f32 %v519_v21, %v335_v5  ;;  %v1287_v8 = vsel %vm3740_vm4, %v1285_v0, %v1286_v1  ;;  %v653_v0 = vld [vmem:[#allocation2 + $0x20] sm:$0xff] }
  0xc4   : > { %631 = vst.msk [vmem:[#allocation2 + $0x70] sm:$0xff] %vm256_vm5, %v598_v17  ;;  %3325 = vmatmul.msk.bf16.gmra.mxu1 %vm442_vm1, %v3669_v15  ;;  %3350 = vmatmul.msk.bf16.gmra.mxu2 %vm442_vm1, %v3716_v30  ;;  %v1341_v22 = vunpack.c.l.b16 %v1287_v8  ;;  %v1102_v8 = vld [vmem:[%s3646_s29 + $0xa4] sm:$0x1] }
  0xc5   : > { %3383 = vmatmul.msk.bf16.gmra.mxu3 %vm442_vm1, %v3881_v54  ;;  %623 = vst.msk [vmem:[#allocation2 + $0x30] sm:$0xff] %vm256_vm5, %v590_v23  ;;  %3402 = vmatmul.msk.bf16.gmra.mxu0 %vm442_vm1, %v3931_v13 }
  0xc7   : > { %v559_v34 = vpop.f32.mrf.mxu2 }
  0xc8   : > { %v606_v36 = vadd.f32 %v559_v34, %v351_v26  ;;  %v579_v15 = vpop.f32.mrf.mxu3  ;;  %v651_v26 = vld [vmem:[#allocation2 + $0x10] sm:$0xff]  ;;  %v1290_v34 = vrot.slane %v1098_v25, 5 }
  0xc9   : > { %v541_v39 = vpop.f32.mrf.mxu1  ;;  %v614_v33 = vadd.f32 %v579_v15, %v359_v27  ;;  %v1099_v15 = vld [vmem:[%s3646_s29 + $0x98] sm:$0x1] }
  0xca   : > { %639 = vst.msk [vmem:[#allocation2 + $0xb0] sm:$0xff] %vm256_vm5, %v606_v36  ;;  %v599_v40 = vadd.f32 %v541_v39, %v344_v35  ;;  %v521_v41 = vpop.f32.mrf.mxu0  ;;  %v1097_v36 = vld [vmem:[%s3646_s29 + $0x90] sm:$0xe]  ;;  %v1293_v42 = vrot.slane %v1099_v15, 5 }
  0xcb   : > { %647 = vst.msk [vmem:[#allocation2 + $0xf0] sm:$0xff] %vm256_vm5, %v614_v33  ;;  %v591_v45 = vadd.f32 %v521_v41, %v336_v37  ;;  %v1292_v41 = vrot.slane %v1290_v34, 4 }
  0xcc   : > { %632 = vst.msk [vmem:[#allocation2 + $0x78] sm:$0xff] %vm256_vm5, %v599_v40  ;;  %v3371_v40 = vrot.slane %v1097_v36, 9 }
  0xcd   : > { %624 = vst.msk [vmem:[#allocation2 + $0x38] sm:$0xff] %vm256_vm5, %v591_v45  ;;  %v652_v45 = vld [vmem:[#allocation2 + $0x18] sm:$0xff] }
  0xcf   : > { %v561_v51 = vpop.f32.mrf.mxu2 }
  0xd0   : > { %v607_v10 = vadd.f32 %v561_v51, %v352_v46  ;;  %v581_v52 = vpop.f32.mrf.mxu3  ;;  %v1294_v51 = vsel %vm3740_vm4, %v1292_v41, %v1293_v42 }
  0xd1   : > { %v711_v55 = vpop.f32.mrf.mxu1  ;;  %v615_v57 = vadd.f32 %v581_v52, %v360_v50  ;;  %v1291_v50 = vsel %vm3740_vm4, %v3371_v40, %v1290_v34 }
  0xd2   : > { %640 = vst.msk [vmem:[#allocation2 + $0xb8] sm:$0xff] %vm256_vm5, %v607_v10  ;;  %v791_v59 = vadd.f32 %v711_v55, %v649_v53  ;;  %v3959_v60 = vpop.f32.mrf.mxu0  ;;  %v1342_v53 = vunpack.c.l.b16 %v1291_v50  ;;  %v1343_v55 = vunpack.c.l.b16 %v1294_v51 }
  0xd3   : > { %648 = vst.msk [vmem:[#allocation2 + $0xf8] sm:$0xff] %vm256_vm5, %v615_v57 }
  0xd4   : > { %823 = vst.msk [vmem:[#allocation2] sm:$0xff] %vm256_vm5, %v791_v59  ;;  %3326 = vmatmul.msk.bf16.gmra.mxu1 %vm442_vm1, %v3686_v19  ;;  %3351 = vmatmul.msk.bf16.gmra.mxu2 %vm442_vm1, %v3655_v12  ;;  %v1284_v19 = vsel %vm3740_vm4, %v3370_v63, %v1283_v61  ;;  %v1101_v63 = vld [vmem:[%s3646_s29 + $0xa0] sm:$0xf] }
  0xd5   : > { %3384 = vmatmul.msk.bf16.gmra.mxu3 %vm442_vm1, %v3906_v38  ;;  %3403 = vmatmul.msk.bf16.gmra.mxu0 %vm442_vm1, %v3956_v58  ;;  %v1340_v21 = vunpack.c.l.b16 %v1284_v19  ;;  %v1100_v19 = vld [vmem:[%s3646_s29 + $0x9c] sm:$0xe] }
  0xd7   : > { %v917_v2 = vpop.f32.mrf.mxu2  ;;  %v3982_v28 = vpack.c.b16 %v1341_v22, %v1340_v21  ;;  %v3372_v21 = vrot.slane %v1100_v19, 9 }
  0xd8   : > { %v1426_v3 = vpop.f32.mrf.mxu3 }
  0xd9   : > { %v713_v29 = vpop.f32.mrf.mxu1 }
  0xda   : > { %v792_v5 = vadd.f32 %v713_v29, %v650_v4  ;;  %v3973_v7 = vpop.f32.mrf.mxu0  ;;  %v1297_v29 = vrot.slane %v1101_v63, 5 }
  0xdb   : > { %v855_v9 = vld [vmem:[#allocation2] sm:$0xff] }
  0xdc   : > { %v997_v17 = vadd.f32 %v917_v2, %v855_v9  ;;  %824 = vst.msk [vmem:[#allocation2 + $0x8] sm:$0xff] %vm256_vm5, %v792_v5  ;;  %v4010_v2 = vpack.c.b16 %v1343_v55, %v1342_v53  ;;  %v1299_v22 = vrot.slane %v1297_v29, 4  ;;  %v1103_v53 = vld [vmem:[%s3646_s29 + $0xa8] sm:$0xe]  ;;  %v1105_v55 = vld [vmem:[%s3646_s29 + $0xb0] sm:$0x1] }
  0xde   : > { %1029 = vst.msk [vmem:[#allocation2] sm:$0xff] %vm256_vm5, %v997_v17 }
  0xdf   : > { %v919_v23 = vpop.f32.mrf.mxu2 }
  0xe0   : > { %v1428_v24 = vpop.f32.mrf.mxu3 }
  0xe1   : > { %v716_v27 = vpop.f32.mrf.mxu1 }
  0xe2   : > { %v793_v31 = vadd.f32 %v716_v27, %v651_v26  ;;  %v3984_v18 = vpop.f32.mrf.mxu0  ;;  %v654_v26 = vld [vmem:[#allocation2 + $0x28] sm:$0xff] }
  0xe3   : > { %v856_v35 = vld [vmem:[#allocation2 + $0x8] sm:$0xff] }
  0xe4   : > { %v998_v37 = vadd.f32 %v919_v23, %v856_v35  ;;  %825 = vst.msk [vmem:[#allocation2 + $0x10] sm:$0xff] %vm256_vm5, %v793_v31  ;;  %3327 = vmatmul.msk.bf16.gmra.mxu1 %vm442_vm1, %v3716_v30  ;;  %3352 = vmatmul.msk.bf16.gmra.mxu2 %vm442_vm1, %v3672_v16  ;;  %v1300_v23 = vrot.slane %v1102_v8, 5  ;;  %v1298_v35 = vsel %vm3740_vm4, %v3372_v21, %v1297_v29 }
  0xe5   : > { %v1121_v39 = vld [vmem:[#allocation2] sm:$0xff]  ;;  %3385 = vmatmul.msk.bf16.gmra.mxu3 %vm442_vm1, %v3931_v13  ;;  %3404 = vmatmul.msk.bf16.gmra.mxu0 %vm442_vm1, %v3982_v28 }
  0xe6   : > { %v1506_v33 = vadd.f32 %v1426_v3, %v1121_v39  ;;  %1030 = vst.msk [vmem:[#allocation2 + $0x8] sm:$0xff] %vm256_vm5, %v998_v37  ;;  %v1301_v36 = vsel %vm3740_vm4, %v1299_v22, %v1300_v23  ;;  %v1344_v39 = vunpack.c.l.b16 %v1298_v35 }
  0xe7   : > { %v922_v43 = vpop.f32.mrf.mxu2 }
  0xe8   : > { %1538 = vst.msk [vmem:[#allocation2] sm:$0xff] %vm256_vm5, %v1506_v33  ;;  %v1431_v30 = vpop.f32.mrf.mxu3  ;;  %v1345_v33 = vunpack.c.l.b16 %v1301_v36 }
  0xe9   : > { %v718_v46 = vpop.f32.mrf.mxu1 }
  0xea   : > { %v794_v48 = vadd.f32 %v718_v46, %v652_v45  ;;  %v3999_v49 = vpop.f32.mrf.mxu0  ;;  %v1104_v45 = vld [vmem:[%s3646_s29 + $0xac] sm:$0xf]  ;;  %v655_v46 = vld [vmem:[#allocation2 + $0x30] sm:$0xff]  ;;  %v4041_v50 = vpack.c.b16 %v1345_v33, %v1344_v39  ;;  %v1108_v33 = vld [vmem:[%s3646_s29 + $0xbc] sm:$0x1] }
  0xeb   : > { %v857_v10 = vld [vmem:[#allocation2 + $0x10] sm:$0xff] }
  0xec   : > { %v999_v52 = vadd.f32 %v922_v43, %v857_v10  ;;  %826 = vst.msk [vmem:[#allocation2 + $0x18] sm:$0xff] %vm256_vm5, %v794_v48  ;;  %v1106_v39 = vld [vmem:[%s3646_s29 + $0xb4] sm:$0xe] }
  0xed   : > { %v1122_v11 = vld [vmem:[#allocation2 + $0x8] sm:$0xff] }
  0xee   : > { %v1507_v57 = vadd.f32 %v1428_v24, %v1122_v11  ;;  %1031 = vst.msk [vmem:[#allocation2 + $0x10] sm:$0xff] %vm256_vm5, %v999_v52  ;;  %v1304_v52 = vrot.slane %v1104_v45, 5  ;;  %v1314_v45 = vrot.slane %v1108_v33, 5 }
  0xef   : > { %v1570_v59 = vld [vmem:[#allocation2] sm:$0xff]  ;;  %v924_v61 = vpop.f32.mrf.mxu2 }
  0xf0   : > { %1539 = vst.msk [vmem:[#allocation2 + $0x8] sm:$0xff] %vm256_vm5, %v1507_v57  ;;  %v1728_v62 = vadd.f32 %v3959_v60, %v1570_v59  ;;  %v1433_v14 = vpop.f32.mrf.mxu3 }
  0xf1   : > { %v721_v1 = vpop.f32.mrf.mxu1 }
  0xf2   : > { %1760 = vst.msk [vmem:[#allocation2] sm:$0xff] %vm256_vm5, %v1728_v62  ;;  %v795_v3 = vadd.f32 %v721_v1, %v653_v0  ;;  %v4013_v4 = vpop.f32.mrf.mxu0  ;;  %v1306_v62 = vrot.slane %v1304_v52, 4  ;;  %v656_v1 = vld [vmem:[#allocation2 + $0x38] sm:$0xff] }
  0xf3   : > { %v858_v5 = vld [vmem:[#allocation2 + $0x18] sm:$0xff] }
  0xf4   : > { %v1000_v9 = vadd.f32 %v924_v61, %v858_v5  ;;  %827 = vst.msk [vmem:[#allocation2 + $0x20] sm:$0xff] %vm256_vm5, %v795_v3  ;;  %3328 = vmatmul.msk.bf16.gmra.mxu1 %vm442_vm1, %v3655_v12  ;;  %3353 = vmatmul.msk.bf16.gmra.mxu2 %vm442_vm1, %v3689_v20  ;;  %v3373_v61 = vrot.slane %v1103_v53, 9 }
  0xf5   : > { %v1123_v60 = vld [vmem:[#allocation2 + $0x10] sm:$0xff]  ;;  %3386 = vmatmul.msk.bf16.gmra.mxu3 %vm442_vm1, %v3956_v58  ;;  %3405 = vmatmul.msk.bf16.gmra.mxu0 %vm442_vm1, %v4010_v2 }
  0xf6   : > { %v1508_v17 = vadd.f32 %v1431_v30, %v1123_v60  ;;  %1032 = vst.msk [vmem:[#allocation2 + $0x18] sm:$0xff] %vm256_vm5, %v1000_v9  ;;  %v1305_v19 = vsel %vm3740_vm4, %v3373_v61, %v1304_v52 }
  0xf7   : > { %v1571_v24 = vld [vmem:[#allocation2 + $0x8] sm:$0xff]  ;;  %v927_v25 = vpop.f32.mrf.mxu2 }
  0xf8   : > { %1540 = vst.msk [vmem:[#allocation2 + $0x10] sm:$0xff] %vm256_vm5, %v1508_v17  ;;  %v1729_v12 = vadd.f32 %v3973_v7, %v1571_v24  ;;  %v1436_v20 = vpop.f32.mrf.mxu3  ;;  %v1346_v17 = vunpack.c.l.b16 %v1305_v19  ;;  %v1110_v19 = vld [vmem:[%s3646_s29 + $0xc4] sm:$0xf] }
  0xf9   : > { %v723_v27 = vpop.f32.mrf.mxu1 }
  0xfa   : > { %1761 = vst.msk [vmem:[#allocation2 + $0x8] sm:$0xff] %vm256_vm5, %v1729_v12  ;;  %v796_v31 = vadd.f32 %v723_v27, %v654_v26  ;;  %v4030_v34 = vpop.f32.mrf.mxu0  ;;  %v4072_v12 = vld [vmem:[%s3646_s29 + $0xc0] sm:$0xff]  ;;  %v1107_v26 = vld [vmem:[%s3646_s29 + $0xb8] sm:$0xf] }
  0xfb   : > { %v859_v15 = vld [vmem:[#allocation2 + $0x20] sm:$0xff] }
  0xfc   : > { %v1001_v37 = vadd.f32 %v927_v25, %v859_v15  ;;  %828 = vst.msk [vmem:[#allocation2 + $0x28] sm:$0xff] %vm256_vm5, %v796_v31  ;;  %v657_v27 = vld [vmem:[#allocation2 + $0x40] sm:$0xff] }
  0xfd   : > { %v1124_v7 = vld [vmem:[#allocation2 + $0x18] sm:$0xff] }
  0xfe   : > { %v1509_v40 = vadd.f32 %v1433_v14, %v1124_v7  ;;  %1033 = vst.msk [vmem:[#allocation2 + $0x20] sm:$0xff] %vm256_vm5, %v1001_v37  ;;  %v1307_v14 = vrot.slane %v1105_v55, 5  ;;  %v1311_v37 = vrot.slane %v1107_v26, 5 }
  0xff   : > { %v1572_v41 = vld [vmem:[#allocation2 + $0x10] sm:$0xff]  ;;  %v929_v42 = vpop.f32.mrf.mxu2 }
 0x100   : > { %1541 = vst.msk [vmem:[#allocation2 + $0x18] sm:$0xff] %vm256_vm5, %v1509_v40  ;;  %v1730_v43 = vadd.f32 %v3984_v18, %v1572_v41  ;;  %v1438_v30 = vpop.f32.mrf.mxu3  ;;  %v1308_v8 = vsel %vm3740_vm4, %v1306_v62, %v1307_v14 }
 0x101   : > { %v726_v48 = vpop.f32.mrf.mxu1  ;;  %v1347_v21 = vunpack.c.l.b16 %v1308_v8  ;;  %v659_v8 = vld [vmem:[#allocation2 + $0x50] sm:$0xff] }
 0x102   : > { %1762 = vst.msk [vmem:[#allocation2 + $0x10] sm:$0xff] %vm256_vm5, %v1730_v43  ;;  %v797_v51 = vadd.f32 %v726_v48, %v655_v46  ;;  %v4044_v10 = vpop.f32.mrf.mxu0  ;;  %v3374_v43 = vrot.slane %v1106_v39, 9 }
 0x103   : > { %v860_v11 = vld [vmem:[#allocation2 + $0x28] sm:$0xff]  ;;  %v4075_v35 = vpack.c.b16 %v1347_v21, %v1346_v17  ;;  %v1610_v21 = vrot.slane %v1110_v19, 5 }
 0x104   : > { %v1002_v57 = vadd.f32 %v929_v42, %v860_v11  ;;  %829 = vst.msk [vmem:[#allocation2 + $0x30] sm:$0xff] %vm256_vm5, %v797_v51  ;;  %3329 = vmatmul.msk.bf16.gmra.mxu1 %vm442_vm1, %v3672_v16  ;;  %3354 = vmatmul.msk.bf16.gmra.mxu2 %vm442_vm1, %v3720_v32  ;;  %v658_v11 = vld [vmem:[#allocation2 + $0x48] sm:$0xff] }
 0x105   : > { %v1125_v18 = vld [vmem:[#allocation2 + $0x20] sm:$0xff]  ;;  %3387 = vmatmul.msk.bf16.gmra.mxu3 %vm442_vm1, %v3982_v28  ;;  %3406 = vmatmul.msk.bf16.gmra.mxu0 %vm442_vm1, %v4041_v50 }
 0x106   : > { %v1510_v59 = vadd.f32 %v1436_v20, %v1125_v18  ;;  %1034 = vst.msk [vmem:[#allocation2 + $0x28] sm:$0xff] %vm256_vm5, %v1002_v57  ;;  %v1312_v18 = vsel %vm3740_vm4, %v3374_v43, %v1311_v37 }
 0x107   : > { %v1573_v63 = vld [vmem:[#allocation2 + $0x18] sm:$0xff]  ;;  %v932_v0 = vpop.f32.mrf.mxu2  ;;  %v1348_v14 = vunpack.c.l.b16 %v1312_v18 }
 0x108   : > { %1542 = vst.msk [vmem:[#allocation2 + $0x20] sm:$0xff] %vm256_vm5, %v1510_v59  ;;  %v1731_v16 = vadd.f32 %v3999_v49, %v1573_v63  ;;  %v1441_v32 = vpop.f32.mrf.mxu3  ;;  %v3522_v18 = vld [vmem:[%s3646_s29 + $0xd8] sm:$0xff] }
 0x109   : > { %v728_v3 = vpop.f32.mrf.mxu1 }
 0x10a   : > { %1763 = vst.msk [vmem:[#allocation2 + $0x18] sm:$0xff] %vm256_vm5, %v1731_v16  ;;  %v798_v29 = vadd.f32 %v728_v3, %v656_v1  ;;  %v4061_v5 = vpop.f32.mrf.mxu0  ;;  %v4106_v3 = vld [vmem:[%s3646_s29 + $0xcc] sm:$0xff] }
 0x10b   : > { %v861_v9 = vld [vmem:[#allocation2 + $0x30] sm:$0xff] }
 0x10c   : > { %v1003_v60 = vadd.f32 %v932_v0, %v861_v9  ;;  %830 = vst.msk [vmem:[#allocation2 + $0x38] sm:$0xff] %vm256_vm5, %v798_v29 }
 0x10d   : > { %v1126_v49 = vld [vmem:[#allocation2 + $0x28] sm:$0xff] }
 0x10e   : > { %v1511_v22 = vadd.f32 %v1438_v30, %v1126_v49  ;;  %1035 = vst.msk [vmem:[#allocation2 + $0x30] sm:$0xff] %vm256_vm5, %v1003_v60  ;;  %v1313_v30 = vrot.slane %v1311_v37, 4 }
 0x10f   : > { %v1574_v23 = vld [vmem:[#allocation2 + $0x20] sm:$0xff]  ;;  %v934_v24 = vpop.f32.mrf.mxu2 }
 0x110   : > { %1543 = vst.msk [vmem:[#allocation2 + $0x28] sm:$0xff] %vm256_vm5, %v1511_v22  ;;  %v1732_v25 = vadd.f32 %v4013_v4, %v1574_v23  ;;  %v1443_v20 = vpop.f32.mrf.mxu3  ;;  %v3554_v4 = vld [vmem:[%s3646_s29 + $0xa8] sm:$0xff]  ;;  %v1315_v59 = vsel %vm3740_vm4, %v1313_v30, %v1314_v45  ;;  %v1109_v23 = vld [vmem:[%s3646_s29 + $0xc0] sm:$0xe] }
 0x111   : > { %v731_v31 = vpop.f32.mrf.mxu1  ;;  %v1349_v63 = vunpack.c.l.b16 %v1315_v59 }
 0x112   : > { %1764 = vst.msk [vmem:[#allocation2 + $0x20] sm:$0xff] %vm256_vm5, %v1732_v25  ;;  %v799_v36 = vadd.f32 %v731_v31, %v657_v27  ;;  %v4078_v15 = vpop.f32.mrf.mxu0  ;;  %v3392_v27 = vrot.slane %v1109_v23, 9  ;;  %v1612_v31 = vrot.slane %v1610_v21, 4 }
 0x113   : > { %v862_v7 = vld [vmem:[#allocation2 + $0x38] sm:$0xff]  ;;  %v4109_v60 = vpack.c.b16 %v1349_v63, %v1348_v14 }
 0x114   : > { %v1004_v40 = vadd.f32 %v934_v24, %v862_v7  ;;  %831 = vst.msk [vmem:[#allocation2 + $0x40] sm:$0xff] %vm256_vm5, %v799_v36  ;;  %3330 = vmatmul.msk.bf16.gmra.mxu1 %vm442_vm1, %v3554_v4  ;;  %3355 = vmatmul.msk.bf16.gmra.mxu2 %vm442_vm1, %v4072_v12  ;;  %v1111_v24 = vld [vmem:[%s3646_s29 + $0xc8] sm:$0x1]  ;;  %v1611_v43 = vsel %vm3740_vm4, %v3392_v27, %v1610_v21 }
 0x115   : > { %v1127_v41 = vld [vmem:[#allocation2 + $0x30] sm:$0xff]  ;;  %3388 = vmatmul.msk.bf16.gmra.mxu3 %vm442_vm1, %v4010_v2  ;;  %3407 = vmatmul.msk.bf16.gmra.mxu0 %vm442_vm1, %v4075_v35  ;;  %v1613_v36 = vrot.slane %v1111_v24, 5 }
 0x116   : > { %v1512_v42 = vadd.f32 %v1441_v32, %v1127_v41  ;;  %1036 = vst.msk [vmem:[#allocation2 + $0x38] sm:$0xff] %vm256_vm5, %v1004_v40  ;;  %v660_v40 = vld [vmem:[#allocation2 + $0x58] sm:$0xff] }
 0x117   : > { %v1575_v46 = vld [vmem:[#allocation2 + $0x28] sm:$0xff]  ;;  %v937_v48 = vpop.f32.mrf.mxu2  ;;  %v1614_v30 = vsel %vm3740_vm4, %v1612_v31, %v1613_v36 }
 0x118   : > { %1544 = vst.msk [vmem:[#allocation2 + $0x30] sm:$0xff] %vm256_vm5, %v1512_v42  ;;  %v1733_v51 = vadd.f32 %v4030_v34, %v1575_v46  ;;  %v1446_v52 = vpop.f32.mrf.mxu3 }
 0x119   : > { %v733_v53 = vpop.f32.mrf.mxu1 }
 0x11a   : > { %1765 = vst.msk [vmem:[#allocation2 + $0x28] sm:$0xff] %vm256_vm5, %v1733_v51  ;;  %v800_v55 = vadd.f32 %v733_v53, %v658_v11  ;;  %v4095_v57 = vpop.f32.mrf.mxu0  ;;  %v1625_v51 = vunpack.c.l.b16 %v1614_v30 }
 0x11b   : > { %v863_v61 = vld [vmem:[#allocation2 + $0x40] sm:$0xff] }
 0x11c   : > { %v1005_v62 = vadd.f32 %v937_v48, %v863_v61  ;;  %832 = vst.msk [vmem:[#allocation2 + $0x48] sm:$0xff] %vm256_vm5, %v800_v55  ;;  %v1624_v48 = vunpack.c.l.b16 %v1611_v43  ;;  %v1113_v61 = vld [vmem:[%s3646_s29 + $0xd0] sm:$0xf] }
 0x11d   : > { %v1128_v34 = vld [vmem:[#allocation2 + $0x38] sm:$0xff] }
 0x11e   : > { %v1513_v0 = vadd.f32 %v1443_v20, %v1128_v34  ;;  %1037 = vst.msk [vmem:[#allocation2 + $0x40] sm:$0xff] %vm256_vm5, %v1005_v62  ;;  %v661_v62 = vld [vmem:[#allocation2 + $0x60] sm:$0xff]  ;;  %v4141_v14 = vpack.c.b16 %v1625_v51, %v1624_v48  ;;  %v2027_v48 = vld [vmem:[%s3646_s29 + $0x34] sm:$0xf] }
 0x11f   : > { %v1576_v16 = vld [vmem:[#allocation2 + $0x30] sm:$0xff]  ;;  %v939_v32 = vpop.f32.mrf.mxu2 }
 0x120   : > { %1545 = vst.msk [vmem:[#allocation2 + $0x38] sm:$0xff] %vm256_vm5, %v1513_v0  ;;  %v1734_v1 = vadd.f32 %v4044_v10, %v1576_v16  ;;  %v1448_v29 = vpop.f32.mrf.mxu3  ;;  %v3555_v10 = vld [vmem:[%s3646_s29 + $0xb4] sm:$0xff]  ;;  %v1617_v16 = vrot.slane %v1113_v61, 5 }
 0x121   : > { %v736_v9 = vpop.f32.mrf.mxu1  ;;  %v663_v51 = vld [vmem:[#allocation2 + $0x70] sm:$0xff] }
 0x122   : > { %1766 = vst.msk [vmem:[#allocation2 + $0x30] sm:$0xff] %vm256_vm5, %v1734_v1  ;;  %v801_v49 = vadd.f32 %v736_v9, %v659_v8  ;;  %v4112_v17 = vpop.f32.mrf.mxu0  ;;  %v1112_v1 = vld [vmem:[%s3646_s29 + $0xcc] sm:$0xe] }
 0x123   : > { %v864_v22 = vld [vmem:[#allocation2 + $0x48] sm:$0xff]  ;;  %v3393_v9 = vrot.slane %v1112_v1, 9 }
 0x124   : > { %v1006_v25 = vadd.f32 %v939_v32, %v864_v22  ;;  %833 = vst.msk [vmem:[#allocation2 + $0x50] sm:$0xff] %vm256_vm5, %v801_v49  ;;  %3331 = vmatmul.msk.bf16.gmra.mxu1 %vm442_vm1, %v3555_v10  ;;  %3356 = vmatmul.msk.bf16.gmra.mxu2 %vm442_vm1, %v4106_v3  ;;  %v1619_v49 = vrot.slane %v1617_v16, 4 }
 0x125   : > { %v1129_v20 = vld [vmem:[#allocation2 + $0x40] sm:$0xff]  ;;  %3389 = vmatmul.msk.bf16.gmra.mxu3 %vm442_vm1, %v4041_v50  ;;  %3408 = vmatmul.msk.bf16.gmra.mxu0 %vm442_vm1, %v4109_v60  ;;  %v1618_v27 = vsel %vm3740_vm4, %v3393_v9, %v1617_v16  ;;  %v2026_v16 = vld [vmem:[%s3646_s29 + $0x30] sm:$0xc] }
 0x126   : > { %v1514_v26 = vadd.f32 %v1446_v52, %v1129_v20  ;;  %1038 = vst.msk [vmem:[#allocation2 + $0x48] sm:$0xff] %vm256_vm5, %v1006_v25  ;;  %v662_v25 = vld [vmem:[#allocation2 + $0x68] sm:$0xff] }
 0x127   : > { %v1577_v37 = vld [vmem:[#allocation2 + $0x38] sm:$0xff]  ;;  %v942_v7 = vpop.f32.mrf.mxu2 }
 0x128   : > { %1546 = vst.msk [vmem:[#allocation2 + $0x40] sm:$0xff] %vm256_vm5, %v1514_v26  ;;  %v1735_v39 = vadd.f32 %v4061_v5, %v1577_v37  ;;  %v1451_v33 = vpop.f32.mrf.mxu3 }
 0x129   : > { %v738_v4 = vpop.f32.mrf.mxu1 }
 0x12a   : > { %1767 = vst.msk [vmem:[#allocation2 + $0x38] sm:$0xff] %vm256_vm5, %v1735_v39  ;;  %v802_v41 = vadd.f32 %v738_v4, %v660_v40  ;;  %v4129_v42 = vpop.f32.mrf.mxu0  ;;  %v1626_v39 = vunpack.c.l.b16 %v1618_v27  ;;  %v2021_v4 = vld [vmem:[%s3646_s29 + $0x1c] sm:$0xf] }
 0x12b   : > { %v865_v45 = vld [vmem:[#allocation2 + $0x50] sm:$0xff] }
 0x12c   : > { %v1007_v46 = vadd.f32 %v942_v7, %v865_v45  ;;  %834 = vst.msk [vmem:[#allocation2 + $0x58] sm:$0xff] %vm256_vm5, %v802_v41  ;;  %v2015_v7 = vld [vmem:[%s3646_s29 + $0x4] sm:$0xf] }
 0x12d   : > { %v1130_v5 = vld [vmem:[#allocation2 + $0x48] sm:$0xff] }
 0x12e   : > { %v1515_v52 = vadd.f32 %v1448_v29, %v1130_v5  ;;  %1039 = vst.msk [vmem:[#allocation2 + $0x50] sm:$0xff] %vm256_vm5, %v1007_v46  ;;  %v1114_v29 = vld [vmem:[%s3646_s29 + $0xd4] sm:$0x1]  ;;  %v3523_v45 = vld [vmem:[%s3646_s29 + $0xe4] sm:$0xff]  ;;  %v2159_v5 = vrot.slane %v2015_v7, 6 }
 0x12f   : > { %v1578_v11 = vld [vmem:[#allocation2 + $0x40] sm:$0xff]  ;;  %v944_v53 = vpop.f32.mrf.mxu2  ;;  %v1620_v21 = vrot.slane %v1114_v29, 5 }
 0x130   : > { %1547 = vst.msk [vmem:[#allocation2 + $0x48] sm:$0xff] %vm256_vm5, %v1515_v52  ;;  %v1736_v55 = vadd.f32 %v4078_v15, %v1578_v11  ;;  %v1453_v59 = vpop.f32.mrf.mxu3  ;;  %v2014_v11 = vld [vmem:[%s3646_s29] sm:$0xc]  ;;  %v2161_v29 = vrot.slane %v2159_v5, 4 }
 0x131   : > { %v741_v34 = vpop.f32.mrf.mxu1  ;;  %v1621_v31 = vsel %vm3740_vm4, %v1619_v49, %v1620_v21  ;;  %v3430_v1 = vrot.slane %v2014_v11, 10 }
 0x132   : > { %1768 = vst.msk [vmem:[#allocation2 + $0x40] sm:$0xff] %vm256_vm5, %v1736_v55  ;;  %v803_v63 = vadd.f32 %v741_v34, %v661_v62  ;;  %v4144_v0 = vpop.f32.mrf.mxu0  ;;  %v2022_v62 = vld [vmem:[%s3646_s29 + $0x20] sm:$0x3]  ;;  %v2187_v34 = vrot.slane %v2027_v48, 6 }
 0x133   : > { %v866_v32 = vld [vmem:[#allocation2 + $0x58] sm:$0xff]  ;;  %v2176_v21 = vrot.slane %v2022_v62, 6 }
 0x134   : > { %v1008_v19 = vadd.f32 %v944_v53, %v866_v32  ;;  %835 = vst.msk [vmem:[#allocation2 + $0x60] sm:$0xff] %vm256_vm5, %v803_v63  ;;  %3332 = vmatmul.msk.bf16.gmra.mxu1 %vm442_vm1, %v4072_v12  ;;  %3357 = vmatmul.msk.bf16.gmra.mxu2 %vm442_vm1, %v3522_v18  ;;  %v2016_v53 = vld [vmem:[%s3646_s29 + $0x8] sm:$0x3]  ;;  %v2173_v18 = vrot.slane %v2021_v4, 6 }
 0x135   : > { %v1131_v15 = vld [vmem:[#allocation2 + $0x50] sm:$0xff]  ;;  %3390 = vmatmul.msk.bf16.gmra.mxu3 %vm442_vm1, %v4075_v35  ;;  %3409 = vmatmul.msk.bf16.gmra.mxu0 %vm442_vm1, %v4141_v14 }
 0x136   : > { %v1516_v8 = vadd.f32 %v1451_v33, %v1131_v15  ;;  %1040 = vst.msk [vmem:[#allocation2 + $0x58] sm:$0xff] %vm256_vm5, %v1008_v19  ;;  %v1627_v33 = vunpack.c.l.b16 %v1621_v31  ;;  %v2028_v19 = vld [vmem:[%s3646_s29 + $0x38] sm:$0x3]  ;;  %v2175_v49 = vrot.slane %v2173_v18, 4 }
 0x137   : > { %v1579_v22 = vld [vmem:[#allocation2 + $0x48] sm:$0xff]  ;;  %v947_v23 = vpop.f32.mrf.mxu2 }
 0x138   : > { %1548 = vst.msk [vmem:[#allocation2 + $0x50] sm:$0xff] %vm256_vm5, %v1516_v8  ;;  %v1737_v12 = vadd.f32 %v4095_v57, %v1579_v22  ;;  %v1456_v24 = vpop.f32.mrf.mxu3  ;;  %v4178_v55 = vpack.c.b16 %v1627_v33, %v1626_v39  ;;  %v2162_v8 = vrot.slane %v2016_v53, 6 }
 0x139   : > { %v743_v10 = vpop.f32.mrf.mxu1 }
 0x13a   : > { %1769 = vst.msk [vmem:[#allocation2 + $0x48] sm:$0xff] %vm256_vm5, %v1737_v12  ;;  %v804_v20 = vadd.f32 %v743_v10, %v662_v25  ;;  %v4160_v26 = vpop.f32.mrf.mxu0  ;;  %v2189_v12 = vrot.slane %v2187_v34, 4  ;;  %v2190_v25 = vrot.slane %v2028_v19, 6 }
 0x13b   : > { %v867_v36 = vld [vmem:[#allocation2 + $0x60] sm:$0xff] }
 0x13c   : > { %v1009_v37 = vadd.f32 %v947_v23, %v867_v36  ;;  %836 = vst.msk [vmem:[#allocation2 + $0x68] sm:$0xff] %vm256_vm5, %v804_v20  ;;  %v3434_v23 = vrot.slane %v2026_v16, 10  ;;  %v664_v36 = vld [vmem:[#allocation2 + $0x78] sm:$0xff]  ;;  %v2191_v4 = vsel %vm4197_vm7, %v2189_v12, %v2190_v25 }
 0x13d   : > { %v1132_v57 = vld [vmem:[#allocation2 + $0x58] sm:$0xff]  ;;  %v2280_v53 = vunpack.c.l.b16 %v2191_v4 }
 0x13e   : > { %v1517_v40 = vadd.f32 %v1453_v59, %v1132_v57  ;;  %1041 = vst.msk [vmem:[#allocation2 + $0x60] sm:$0xff] %vm256_vm5, %v1009_v37  ;;  %v2160_v57 = vsel %vm4197_vm7, %v3430_v1, %v2159_v5  ;;  %v2030_v1 = vld [vmem:[%s3646_s29 + $0x40] sm:$0xf] }
 0x13f   : > { %v1580_v41 = vld [vmem:[#allocation2 + $0x50] sm:$0xff]  ;;  %v949_v43 = vpop.f32.mrf.mxu2  ;;  %v2194_v12 = vrot.slane %v2030_v1, 6 }
 0x140   : > { %1549 = vst.msk [vmem:[#allocation2 + $0x58] sm:$0xff] %vm256_vm5, %v1517_v40  ;;  %v1738_v30 = vadd.f32 %v4112_v17, %v1580_v41  ;;  %v4173_v46 = vpop.f32.mrf.mxu3  ;;  %v2020_v17 = vld [vmem:[%s3646_s29 + $0x18] sm:$0xc]  ;;  %v2188_v40 = vsel %vm4197_vm7, %v3434_v23, %v2187_v34  ;;  %v2025_v23 = vld [vmem:[%s3646_s29 + $0x2c] sm:$0x3] }
 0x141   : > { %v746_v52 = vpop.f32.mrf.mxu1  ;;  %v3432_v9 = vrot.slane %v2020_v17, 10  ;;  %v2279_v11 = vunpack.c.l.b16 %v2188_v40  ;;  %v2196_v4 = vrot.slane %v2194_v12, 4 }
 0x142   : > { %1770 = vst.msk [vmem:[#allocation2 + $0x50] sm:$0xff] %vm256_vm5, %v1738_v30  ;;  %v805_v59 = vadd.f32 %v746_v52, %v663_v51  ;;  %v4181_v61 = vpop.f32.mrf.mxu0  ;;  %v2271_v30 = vunpack.c.l.b16 %v2160_v57  ;;  %v2018_v52 = vld [vmem:[%s3646_s29 + $0x10] sm:$0xf] }
 0x143   : > { %v868_v63 = vld [vmem:[#allocation2 + $0x68] sm:$0xff]  ;;  %v2174_v7 = vsel %vm4197_vm7, %v3432_v9, %v2173_v18 }
 0x144   : > { %v1010_v32 = vadd.f32 %v949_v43, %v868_v63  ;;  %837 = vst.msk [vmem:[#allocation2 + $0x70] sm:$0xff] %vm256_vm5, %v805_v59  ;;  %3333 = vmatmul.msk.bf16.gmra.mxu1 %vm442_vm1, %v4106_v3  ;;  %3358 = vmatmul.msk.bf16.gmra.mxu2 %vm442_vm1, %v3523_v45  ;;  %v2275_v48 = vunpack.c.l.b16 %v2174_v7  ;;  %v2024_v59 = vld [vmem:[%s3646_s29 + $0x28] sm:$0xf] }
 0x145   : > { %v1133_v15 = vld [vmem:[#allocation2 + $0x60] sm:$0xff]  ;;  %3391 = vmatmul.msk.bf16.gmra.mxu3 %vm442_vm1, %v4109_v60  ;;  %3410 = vmatmul.msk.bf16.gmra.mxu0 %vm442_vm1, %v4178_v55  ;;  %v2180_v9 = vrot.slane %v2024_v59, 6 }
 0x146   : > { %v1518_v22 = vadd.f32 %v1456_v24, %v1133_v15  ;;  %1042 = vst.msk [vmem:[#allocation2 + $0x68] sm:$0xff] %vm256_vm5, %v1010_v32  ;;  %v2163_v24 = vsel %vm4197_vm7, %v2161_v29, %v2162_v8  ;;  %v2166_v32 = vrot.slane %v2018_v52, 6  ;;  %v665_v29 = vld [vmem:[#allocation2 + $0x80] sm:$0xff]  ;;  %v2017_v15 = vld [vmem:[%s3646_s29 + $0xc] sm:$0xc] }
 0x147   : > { %v1581_v10 = vld [vmem:[#allocation2 + $0x58] sm:$0xff]  ;;  %v952_v20 = vpop.f32.mrf.mxu2  ;;  %v2272_v45 = vunpack.c.l.b16 %v2163_v24  ;;  %v2019_v8 = vld [vmem:[%s3646_s29 + $0x14] sm:$0x3] }
 0x148   : > { %1550 = vst.msk [vmem:[#allocation2 + $0x60] sm:$0xff] %vm256_vm5, %v1518_v22  ;;  %v1739_v27 = vadd.f32 %v4129_v42, %v1581_v10  ;;  %v4204_v31 = vpop.f32.mrf.mxu3  ;;  %v2177_v42 = vsel %vm4197_vm7, %v2175_v49, %v2176_v21  ;;  %v4235_v49 = vpack.c.b16 %v2280_v53, %v2279_v11  ;;  %v2023_v22 = vld [vmem:[%s3646_s29 + $0x24] sm:$0xc]  ;;  %v2029_v10 = vld [vmem:[%s3646_s29 + $0x3c] sm:$0xc]  ;;  %v2169_v24 = vrot.slane %v2019_v8, 6 }
 0x149   : > { %v748_v37 = vpop.f32.mrf.mxu1  ;;  %v2276_v51 = vunpack.c.l.b16 %v2177_v42  ;;  %v2303_v63 = vpack.c.b16 %v2272_v45, %v2271_v30  ;;  %v3433_v7 = vrot.slane %v2023_v22, 10  ;;  %v2183_v42 = vrot.slane %v2025_v23, 6 }
 0x14a   : > { %1771 = vst.msk [vmem:[#allocation2 + $0x58] sm:$0xff] %vm256_vm5, %v1739_v27  ;;  %v806_v39 = vadd.f32 %v748_v37, %v664_v36  ;;  %v4215_v33 = vpop.f32.mrf.mxu0  ;;  %v3431_v36 = vrot.slane %v2017_v15, 10  ;;  %v2168_v37 = vrot.slane %v2166_v32, 4 }
 0x14b   : > { %v869_v41 = vld [vmem:[#allocation2 + $0x70] sm:$0xff]  ;;  %v4231_v19 = vpack.c.b16 %v2276_v51, %v2275_v48  ;;  %v666_v48 = vld [vmem:[#allocation2 + $0x88] sm:$0xff]  ;;  %v2181_v11 = vsel %vm4197_vm7, %v3433_v7, %v2180_v9 }
 0x14c   : > { %v1011_v43 = vadd.f32 %v952_v20, %v869_v41  ;;  %838 = vst.msk [vmem:[#allocation2 + $0x78] sm:$0xff] %vm256_vm5, %v806_v39  ;;  %v2031_v20 = vld [vmem:[%s3646_s29 + $0x44] sm:$0x3]  ;;  %v2182_v39 = vrot.slane %v2180_v9, 4  ;;  %v2167_v52 = vsel %vm4197_vm7, %v3431_v36, %v2166_v32 }
 0x14d   : > { %v1134_v5 = vld [vmem:[#allocation2 + $0x68] sm:$0xff]  ;;  %v2197_v41 = vrot.slane %v2031_v20, 6  ;;  %v667_v20 = vld [vmem:[#allocation2 + $0x90] sm:$0xff] }
 0x14e   : > { %v1519_v18 = vadd.f32 %v4173_v46, %v1134_v5  ;;  %1043 = vst.msk [vmem:[#allocation2 + $0x70] sm:$0xff] %vm256_vm5, %v1011_v43 }
 0x14f   : > { %v1582_v17 = vld [vmem:[#allocation2 + $0x60] sm:$0xff]  ;;  %v954_v62 = vpop.f32.mrf.mxu2 }
 0x150   : > { %1551 = vst.msk [vmem:[#allocation2 + $0x68] sm:$0xff] %vm256_vm5, %v1519_v18  ;;  %v1740_v34 = vadd.f32 %v4144_v0, %v1582_v17  ;;  %v4228_v16 = vpop.f32.mrf.mxu3  ;;  %v2184_v18 = vsel %vm4197_vm7, %v2182_v39, %v2183_v42  ;;  %v2198_v17 = vsel %vm4197_vm7, %v2196_v4, %v2197_v41  ;;  %v2032_v39 = vld [vmem:[%s3646_s29 + $0x48] sm:$0xc]  ;;  %v2034_v42 = vld [vmem:[%s3646_s29 + $0x50] sm:$0x3] }
 0x151   : > { %v751_v46 = vpop.f32.mrf.mxu1  ;;  %v2282_v8 = vunpack.c.l.b16 %v2198_v17  ;;  %v3436_v4 = vrot.slane %v2032_v39, 10 }
 0x152   : > { %1772 = vst.msk [vmem:[#allocation2 + $0x60] sm:$0xff] %vm256_vm5, %v1740_v34  ;;  %v807_v0 = vadd.f32 %v751_v46, %v665_v29  ;;  %v4238_v21 = vpop.f32.mrf.mxu0  ;;  %v2277_v29 = vunpack.c.l.b16 %v2181_v11  ;;  %v2278_v46 = vunpack.c.l.b16 %v2184_v18 }
 0x153   : > { %v870_v25 = vld [vmem:[#allocation2 + $0x78] sm:$0xff] }
 0x154   : > { %v1012_v27 = vadd.f32 %v954_v62, %v870_v25  ;;  %839 = vst.msk [vmem:[#allocation2 + $0x80] sm:$0xff] %vm256_vm5, %v807_v0  ;;  %3414 = vmatmul.msk.bf16.vlgmr.msra.gmra.mxu1 %vm442_vm1, %v3803_v44  ;;  %3447 = vmatmul.msk.bf16.vlgmr.msra.gmra.mxu2 %vm442_vm1, %v2303_v63  ;;  %v3435_v44 = vrot.slane %v2029_v10, 10  ;;  %v2273_v63 = vunpack.c.l.b16 %v2167_v52  ;;  %v2033_v10 = vld [vmem:[%s3646_s29 + $0x4c] sm:$0xf]  ;;  %v4277_v36 = vpack.c.b16 %v2278_v46, %v2277_v29  ;;  %v2036_v46 = vld [vmem:[%s3646_s29 + $0x58] sm:$0xf] }
 0x155   : > { %v1135_v57 = vld [vmem:[#allocation2 + $0x70] sm:$0xff]  ;;  %3466 = vmatmul.msk.bf16.vlgmr.msra.gmra.mxu3 %vm442_vm1, %v4231_v19  ;;  %3485 = vmatmul.msk.bf16.vlgmr.msra.gmra.mxu0 %vm442_vm1, %v4235_v49 }
 0x156   : > { %v1520_v40 = vadd.f32 %v4204_v31, %v1135_v57  ;;  %1044 = vst.msk [vmem:[#allocation2 + $0x78] sm:$0xff] %vm256_vm5, %v1012_v27  ;;  %v2170_v31 = vsel %vm4197_vm7, %v2168_v37, %v2169_v24  ;;  %v2201_v24 = vrot.slane %v2033_v10, 6  ;;  %v2037_v10 = vld [vmem:[%s3646_s29 + $0x5c] sm:$0x3] }
 0x157   : > { %v1583_v43 = vld [vmem:[#allocation2 + $0x68] sm:$0xff]  ;;  %v957_v30 = vpop.f32.mrf.mxu2  ;;  %v2274_v32 = vunpack.c.l.b16 %v2170_v31 }
 0x158   : > { %1552 = vst.msk [vmem:[#allocation2 + $0x70] sm:$0xff] %vm256_vm5, %v1520_v40  ;;  %v1741_v45 = vadd.f32 %v4160_v26, %v1583_v43  ;;  %v1466_v5 = vpop.f32.mrf.mxu3  ;;  %v2195_v26 = vsel %vm4197_vm7, %v3435_v44, %v2194_v12  ;;  %v2203_v41 = vrot.slane %v2201_v24, 4  ;;  %v2204_v43 = vrot.slane %v2034_v42, 6 }
 0x159   : > { %v753_v51 = vpop.f32.mrf.mxu1  ;;  %v2281_v15 = vunpack.c.l.b16 %v2195_v26  ;;  %v2304_v12 = vpack.c.b16 %v2274_v32, %v2273_v63 }
 0x15a   : > { %1773 = vst.msk [vmem:[#allocation2 + $0x68] sm:$0xff] %vm256_vm5, %v1741_v45  ;;  %v808_v53 = vadd.f32 %v753_v51, %v666_v48  ;;  %v4265_v59 = vpop.f32.mrf.mxu0  ;;  %v668_v51 = vld [vmem:[#allocation2 + $0x98] sm:$0xff] }
 0x15b   : > { %v871_v62 = vld [vmem:[#allocation2 + $0x80] sm:$0xff]  ;;  %v4279_v37 = vpack.c.b16 %v2282_v8, %v2281_v15 }
 0x15c   : > { %v1013_v34 = vadd.f32 %v957_v30, %v871_v62  ;;  %840 = vst.msk [vmem:[#allocation2 + $0x88] sm:$0xff] %vm256_vm5, %v808_v53  ;;  %v2205_v53 = vsel %vm4197_vm7, %v2203_v41, %v2204_v43  ;;  %v669_v15 = vld [vmem:[#allocation2 + $0xa0] sm:$0xff] }
 0x15d   : > { %v1136_v1 = vld [vmem:[#allocation2 + $0x78] sm:$0xff]  ;;  %v2284_v62 = vunpack.c.l.b16 %v2205_v53 }
 0x15e   : > { %v1521_v9 = vadd.f32 %v4228_v16, %v1136_v1  ;;  %1045 = vst.msk [vmem:[#allocation2 + $0x80] sm:$0xff] %vm256_vm5, %v1013_v34 }
 0x15f   : > { %v1584_v0 = vld [vmem:[#allocation2 + $0x70] sm:$0xff]  ;;  %v959_v22 = vpop.f32.mrf.mxu2 }
 0x160   : > { %1553 = vst.msk [vmem:[#allocation2 + $0x78] sm:$0xff] %vm256_vm5, %v1521_v9  ;;  %v1742_v23 = vadd.f32 %v4181_v61, %v1584_v0  ;;  %v1468_v25 = vpop.f32.mrf.mxu3 }
 0x161   : > { %v756_v27 = vpop.f32.mrf.mxu1 }
 0x162   : > { %1774 = vst.msk [vmem:[#allocation2 + $0x70] sm:$0xff] %vm256_vm5, %v1742_v23  ;;  %v809_v16 = vadd.f32 %v756_v27, %v667_v20  ;;  %v4282_v57 = vpop.f32.mrf.mxu0  ;;  %v2208_v23 = vrot.slane %v2036_v46, 6 }
 0x163   : > { %v872_v7 = vld [vmem:[#allocation2 + $0x88] sm:$0xff] }
 0x164   : > { %v1014_v40 = vadd.f32 %v959_v22, %v872_v7  ;;  %841 = vst.msk [vmem:[#allocation2 + $0x90] sm:$0xff] %vm256_vm5, %v809_v16  ;;  %3415 = vmatmul.msk.bf16.gmra.mxu1 %vm442_vm1, %v3837_v56  ;;  %3448 = vmatmul.msk.bf16.gmra.mxu2 %vm442_vm1, %v2304_v12  ;;  %v2211_v7 = vrot.slane %v2037_v10, 6  ;;  %v672_v10 = vld [vmem:[#allocation2 + $0xb8] sm:$0xff] }
 0x165   : > { %v1137_v61 = vld [vmem:[#allocation2 + $0x80] sm:$0xff]  ;;  %3467 = vmatmul.msk.bf16.gmra.mxu3 %vm442_vm1, %v4277_v36  ;;  %3486 = vmatmul.msk.bf16.gmra.mxu0 %vm442_vm1, %v4279_v37 }
 0x166   : > { %v1522_v44 = vadd.f32 %v1466_v5, %v1137_v61  ;;  %1046 = vst.msk [vmem:[#allocation2 + $0x88] sm:$0xff] %vm256_vm5, %v1014_v40  ;;  %v2202_v5 = vsel %vm4197_vm7, %v3436_v4, %v2201_v24  ;;  %v2210_v24 = vrot.slane %v2208_v23, 4  ;;  %v670_v40 = vld [vmem:[#allocation2 + $0xa8] sm:$0xff] }
 0x167   : > { %v1585_v30 = vld [vmem:[#allocation2 + $0x78] sm:$0xff]  ;;  %v962_v45 = vpop.f32.mrf.mxu2  ;;  %v2283_v17 = vunpack.c.l.b16 %v2202_v5 }
 0x168   : > { %1554 = vst.msk [vmem:[#allocation2 + $0x80] sm:$0xff] %vm256_vm5, %v1522_v44  ;;  %v1743_v56 = vadd.f32 %v4215_v33, %v1585_v30  ;;  %v1471_v48 = vpop.f32.mrf.mxu3  ;;  %v2212_v43 = vsel %vm4197_vm7, %v2210_v24, %v2211_v7 }
 0x169   : > { %v758_v52 = vpop.f32.mrf.mxu1  ;;  %v4309_v9 = vpack.c.b16 %v2284_v62, %v2283_v17 }
 0x16a   : > { %1775 = vst.msk [vmem:[#allocation2 + $0x78] sm:$0xff] %vm256_vm5, %v1743_v56  ;;  %v810_v31 = vadd.f32 %v758_v52, %v668_v51  ;;  %v4298_v11 = vpop.f32.mrf.mxu0 }
 0x16b   : > { %v873_v18 = vld [vmem:[#allocation2 + $0x90] sm:$0xff] }
 0x16c   : > { %v1015_v26 = vadd.f32 %v962_v45, %v873_v18  ;;  %842 = vst.msk [vmem:[#allocation2 + $0x98] sm:$0xff] %vm256_vm5, %v810_v31  ;;  %v2039_v18 = vld [vmem:[%s3646_s29 + $0x64] sm:$0xf] }
 0x16d   : > { %v1138_v33 = vld [vmem:[#allocation2 + $0x88] sm:$0xff] }
 0x16e   : > { %v1523_v34 = vadd.f32 %v1468_v25, %v1138_v33  ;;  %1047 = vst.msk [vmem:[#allocation2 + $0x90] sm:$0xff] %vm256_vm5, %v1015_v26  ;;  %v2035_v25 = vld [vmem:[%s3646_s29 + $0x54] sm:$0xc] }
 0x16f   : > { %v1586_v63 = vld [vmem:[#allocation2 + $0x80] sm:$0xff]  ;;  %v964_v32 = vpop.f32.mrf.mxu2  ;;  %v3437_v16 = vrot.slane %v2035_v25, 10  ;;  %v671_v26 = vld [vmem:[#allocation2 + $0xb0] sm:$0xff] }
 0x170   : > { %1555 = vst.msk [vmem:[#allocation2 + $0x88] sm:$0xff] %vm256_vm5, %v1523_v34  ;;  %v1744_v1 = vadd.f32 %v4238_v21, %v1586_v63  ;;  %v1473_v29 = vpop.f32.mrf.mxu3  ;;  %v2215_v63 = vrot.slane %v2039_v18, 6 }
 0x171   : > { %v761_v8 = vpop.f32.mrf.mxu1  ;;  %v2209_v41 = vsel %vm4197_vm7, %v3437_v16, %v2208_v23 }
 0x172   : > { %1776 = vst.msk [vmem:[#allocation2 + $0x80] sm:$0xff] %vm256_vm5, %v1744_v1  ;;  %v811_v0 = vadd.f32 %v761_v8, %v669_v15  ;;  %v4312_v22 = vpop.f32.mrf.mxu0  ;;  %v2285_v56 = vunpack.c.l.b16 %v2209_v41  ;;  %v2038_v1 = vld [vmem:[%s3646_s29 + $0x60] sm:$0xc] }
 0x173   : > { %v874_v12 = vld [vmem:[#allocation2 + $0x98] sm:$0xff]  ;;  %v3438_v8 = vrot.slane %v2038_v1, 10  ;;  %v674_v1 = vld [vmem:[#allocation2 + $0xc8] sm:$0xff] }
 0x174   : > { %v1016_v20 = vadd.f32 %v964_v32, %v874_v12  ;;  %843 = vst.msk [vmem:[#allocation2 + $0xa0] sm:$0xff] %vm256_vm5, %v811_v0  ;;  %3416 = vmatmul.msk.bf16.gmra.mxu1 %vm442_vm1, %v3858_v6  ;;  %3449 = vmatmul.msk.bf16.gmra.mxu2 %vm442_vm1, %v4231_v19  ;;  %v2217_v0 = vrot.slane %v2215_v63, 4 }
 0x175   : > { %v1139_v21 = vld [vmem:[#allocation2 + $0x90] sm:$0xff]  ;;  %3468 = vmatmul.msk.bf16.gmra.mxu3 %vm442_vm1, %v4235_v49  ;;  %3487 = vmatmul.msk.bf16.gmra.mxu0 %vm442_vm1, %v4309_v9  ;;  %v2216_v16 = vsel %vm4197_vm7, %v3438_v8, %v2215_v63 }
 0x176   : > { %v1524_v27 = vadd.f32 %v1471_v48, %v1139_v21  ;;  %1048 = vst.msk [vmem:[#allocation2 + $0x98] sm:$0xff] %vm256_vm5, %v1016_v20  ;;  %v2286_v48 = vunpack.c.l.b16 %v2212_v43  ;;  %v2042_v43 = vld [vmem:[%s3646_s29 + $0x70] sm:$0xf] }
 0x177   : > { %v1587_v39 = vld [vmem:[#allocation2 + $0x88] sm:$0xff]  ;;  %v967_v42 = vpop.f32.mrf.mxu2 }
 0x178   : > { %1556 = vst.msk [vmem:[#allocation2 + $0x90] sm:$0xff] %vm256_vm5, %v1524_v27  ;;  %v1745_v6 = vadd.f32 %v4265_v59, %v1587_v39  ;;  %v1476_v19 = vpop.f32.mrf.mxu3  ;;  %v4340_v17 = vpack.c.b16 %v2286_v48, %v2285_v56 }
 0x179   : > { %v763_v61 = vpop.f32.mrf.mxu1 }
 0x17a   : > { %1777 = vst.msk [vmem:[#allocation2 + $0x88] sm:$0xff] %vm256_vm5, %v1745_v6  ;;  %v812_v44 = vadd.f32 %v763_v61, %v670_v40  ;;  %v4329_v4 = vpop.f32.mrf.mxu0 }
 0x17b   : > { %v875_v30 = vld [vmem:[#allocation2 + $0xa0] sm:$0xff] }
 0x17c   : > { %v1017_v45 = vadd.f32 %v967_v42, %v875_v30  ;;  %844 = vst.msk [vmem:[#allocation2 + $0xa8] sm:$0xff] %vm256_vm5, %v812_v44  ;;  %v2287_v42 = vunpack.c.l.b16 %v2216_v16  ;;  %v673_v30 = vld [vmem:[#allocation2 + $0xc0] sm:$0xff]  ;;  %v2045_v16 = vld [vmem:[%s3646_s29 + $0x7c] sm:$0xf] }
 0x17d   : > { %v1140_v59 = vld [vmem:[#allocation2 + $0x98] sm:$0xff] }
 0x17e   : > { %v1525_v51 = vadd.f32 %v1473_v29, %v1140_v59  ;;  %1049 = vst.msk [vmem:[#allocation2 + $0xa0] sm:$0xff] %vm256_vm5, %v1017_v45  ;;  %v2040_v29 = vld [vmem:[%s3646_s29 + $0x68] sm:$0x3] }
 0x17f   : > { %v1588_v52 = vld [vmem:[#allocation2 + $0x90] sm:$0xff]  ;;  %v969_v31 = vpop.f32.mrf.mxu2  ;;  %v2218_v23 = vrot.slane %v2040_v29, 6 }
 0x180   : > { %1557 = vst.msk [vmem:[#allocation2 + $0x98] sm:$0xff] %vm256_vm5, %v1525_v51  ;;  %v1746_v5 = vadd.f32 %v4282_v57, %v1588_v52  ;;  %v1478_v53 = vpop.f32.mrf.mxu3  ;;  %v2222_v51 = vrot.slane %v2042_v43, 6 }
 0x181   : > { %v766_v33 = vpop.f32.mrf.mxu1  ;;  %v2219_v24 = vsel %vm4197_vm7, %v2217_v0, %v2218_v23 }
 0x182   : > { %1778 = vst.msk [vmem:[#allocation2 + $0x90] sm:$0xff] %vm256_vm5, %v1746_v5  ;;  %v813_v62 = vadd.f32 %v766_v33, %v671_v26  ;;  %v4343_v34 = vpop.f32.mrf.mxu0  ;;  %v2288_v6 = vunpack.c.l.b16 %v2219_v24  ;;  %v2043_v5 = vld [vmem:[%s3646_s29 + $0x74] sm:$0x3]  ;;  %v2224_v33 = vrot.slane %v2222_v51, 4 }
 0x183   : > { %v876_v32 = vld [vmem:[#allocation2 + $0xa8] sm:$0xff]  ;;  %v675_v24 = vld [vmem:[#allocation2 + $0xd0] sm:$0xff] }
 0x184   : > { %v1018_v46 = vadd.f32 %v969_v31, %v876_v32  ;;  %845 = vst.msk [vmem:[#allocation2 + $0xb0] sm:$0xff] %vm256_vm5, %v813_v62  ;;  %3417 = vmatmul.msk.bf16.gmra.mxu1 %vm442_vm1, %v3881_v54  ;;  %3450 = vmatmul.msk.bf16.gmra.mxu2 %vm442_vm1, %v4277_v36  ;;  %v4371_v59 = vpack.c.b16 %v2288_v6, %v2287_v42  ;;  %v2041_v31 = vld [vmem:[%s3646_s29 + $0x6c] sm:$0xc]  ;;  %v2225_v62 = vrot.slane %v2043_v5, 6  ;;  %v2229_v6 = vrot.slane %v2045_v16, 6 }
 0x185   : > { %v1141_v57 = vld [vmem:[#allocation2 + $0xa0] sm:$0xff]  ;;  %3469 = vmatmul.msk.bf16.gmra.mxu3 %vm442_vm1, %v4279_v37  ;;  %3488 = vmatmul.msk.bf16.gmra.mxu0 %vm442_vm1, %v4340_v17  ;;  %v3439_v26 = vrot.slane %v2041_v31, 10 }
 0x186   : > { %v1526_v15 = vadd.f32 %v1476_v19, %v1141_v57  ;;  %1050 = vst.msk [vmem:[#allocation2 + $0xa8] sm:$0xff] %vm256_vm5, %v1018_v46  ;;  %v2226_v8 = vsel %vm4197_vm7, %v2224_v33, %v2225_v62 }
 0x187   : > { %v1589_v12 = vld [vmem:[#allocation2 + $0x98] sm:$0xff]  ;;  %v972_v25 = vpop.f32.mrf.mxu2 }
 0x188   : > { %1558 = vst.msk [vmem:[#allocation2 + $0xa0] sm:$0xff] %vm256_vm5, %v1526_v15  ;;  %v1747_v54 = vadd.f32 %v4298_v11, %v1589_v12  ;;  %v1481_v36 = vpop.f32.mrf.mxu3  ;;  %v2223_v15 = vsel %vm4197_vm7, %v3439_v26, %v2222_v51 }
 0x189   : > { %v768_v20 = vpop.f32.mrf.mxu1  ;;  %v2289_v12 = vunpack.c.l.b16 %v2223_v15  ;;  %v677_v15 = vld [vmem:[#allocation2 + $0xe0] sm:$0xff] }
 0x18a   : > { %1779 = vst.msk [vmem:[#allocation2 + $0x98] sm:$0xff] %vm256_vm5, %v1747_v54  ;;  %v814_v21 = vadd.f32 %v768_v20, %v672_v10  ;;  %v4360_v27 = vpop.f32.mrf.mxu0 }
 0x18b   : > { %v877_v7 = vld [vmem:[#allocation2 + $0xb0] sm:$0xff] }
 0x18c   : > { %v1019_v39 = vadd.f32 %v972_v25, %v877_v7  ;;  %846 = vst.msk [vmem:[#allocation2 + $0xb8] sm:$0xff] %vm256_vm5, %v814_v21  ;;  %v2290_v25 = vunpack.c.l.b16 %v2226_v8 }
 0x18d   : > { %v1142_v11 = vld [vmem:[#allocation2 + $0xa8] sm:$0xff] }
 0x18e   : > { %v1527_v19 = vadd.f32 %v1478_v53, %v1142_v11  ;;  %1051 = vst.msk [vmem:[#allocation2 + $0xb0] sm:$0xff] %vm256_vm5, %v1019_v39  ;;  %v4402_v39 = vpack.c.b16 %v2290_v25, %v2289_v12 }
 0x18f   : > { %v1590_v40 = vld [vmem:[#allocation2 + $0xa0] sm:$0xff]  ;;  %v974_v61 = vpop.f32.mrf.mxu2 }
 0x190   : > { %1559 = vst.msk [vmem:[#allocation2 + $0xa8] sm:$0xff] %vm256_vm5, %v1527_v19  ;;  %v1748_v44 = vadd.f32 %v4312_v22, %v1590_v40  ;;  %v1483_v41 = vpop.f32.mrf.mxu3  ;;  %v2044_v40 = vld [vmem:[%s3646_s29 + $0x78] sm:$0xc] }
 0x191   : > { %v771_v45 = vpop.f32.mrf.mxu1  ;;  %v3440_v43 = vrot.slane %v2044_v40, 10 }
 0x192   : > { %1780 = vst.msk [vmem:[#allocation2 + $0xa0] sm:$0xff] %vm256_vm5, %v1748_v44  ;;  %v815_v56 = vadd.f32 %v771_v45, %v673_v30  ;;  %v4374_v48 = vpop.f32.mrf.mxu0  ;;  %v2231_v30 = vrot.slane %v2229_v6, 4 }
 0x193   : > { %v878_v52 = vld [vmem:[#allocation2 + $0xb8] sm:$0xff] }
 0x194   : > { %v1020_v53 = vadd.f32 %v974_v61, %v878_v52  ;;  %847 = vst.msk [vmem:[#allocation2 + $0xc0] sm:$0xff] %vm256_vm5, %v815_v56  ;;  %3418 = vmatmul.msk.bf16.gmra.mxu1 %vm442_vm1, %v3906_v38  ;;  %3451 = vmatmul.msk.bf16.gmra.mxu2 %vm442_vm1, %v4235_v49  ;;  %v2046_v61 = vld [vmem:[%s3646_s29 + $0x80] sm:$0x3]  ;;  %v676_v52 = vld [vmem:[#allocation2 + $0xd8] sm:$0xff] }
 0x195   : > { %v1143_v22 = vld [vmem:[#allocation2 + $0xb0] sm:$0xff]  ;;  %3470 = vmatmul.msk.bf16.gmra.mxu3 %vm442_vm1, %v4309_v9  ;;  %3489 = vmatmul.msk.bf16.gmra.mxu0 %vm442_vm1, %v4371_v59  ;;  %v2232_v45 = vrot.slane %v2046_v61, 6 }
 0x196   : > { %v1528_v18 = vadd.f32 %v1481_v36, %v1143_v22  ;;  %1052 = vst.msk [vmem:[#allocation2 + $0xb8] sm:$0xff] %vm256_vm5, %v1020_v53  ;;  %v2230_v22 = vsel %vm4197_vm7, %v3440_v43, %v2229_v6  ;;  %v678_v6 = vld [vmem:[#allocation2 + $0xe8] sm:$0xff] }
 0x197   : > { %v1591_v63 = vld [vmem:[#allocation2 + $0xa8] sm:$0xff]  ;;  %v977_v32 = vpop.f32.mrf.mxu2  ;;  %v2291_v62 = vunpack.c.l.b16 %v2230_v22 }
 0x198   : > { %1560 = vst.msk [vmem:[#allocation2 + $0xb0] sm:$0xff] %vm256_vm5, %v1528_v18  ;;  %v1749_v38 = vadd.f32 %v4329_v4, %v1591_v63  ;;  %v1486_v49 = vpop.f32.mrf.mxu3  ;;  %v2233_v18 = vsel %vm4197_vm7, %v2231_v30, %v2232_v45 }
 0x199   : > { %v773_v29 = vpop.f32.mrf.mxu1  ;;  %v2292_v63 = vunpack.c.l.b16 %v2233_v18 }
 0x19a   : > { %1781 = vst.msk [vmem:[#allocation2 + $0xa8] sm:$0xff] %vm256_vm5, %v1749_v38  ;;  %v816_v46 = vadd.f32 %v773_v29, %v674_v1  ;;  %v4391_v57 = vpop.f32.mrf.mxu0 }
 0x19b   : > { %v879_v0 = vld [vmem:[#allocation2 + $0xc0] sm:$0xff] }
 0x19c   : > { %v1021_v23 = vadd.f32 %v977_v32, %v879_v0  ;;  %848 = vst.msk [vmem:[#allocation2 + $0xc8] sm:$0xff] %vm256_vm5, %v816_v46  ;;  %v2048_v46 = vld [vmem:[%s3646_s29 + $0x88] sm:$0xf]  ;;  %v4433_v0 = vpack.c.b16 %v2292_v63, %v2291_v62  ;;  %v2050_v63 = vld [vmem:[%s3646_s29 + $0x90] sm:$0xc] }
 0x19d   : > { %v1144_v4 = vld [vmem:[#allocation2 + $0xb8] sm:$0xff]  ;;  %v2236_v12 = vrot.slane %v2048_v46, 6 }
 0x19e   : > { %v1529_v54 = vadd.f32 %v1483_v41, %v1144_v4  ;;  %1053 = vst.msk [vmem:[#allocation2 + $0xc0] sm:$0xff] %vm256_vm5, %v1021_v23 }
 0x19f   : > { %v1592_v36 = vld [vmem:[#allocation2 + $0xb0] sm:$0xff]  ;;  %v979_v10 = vpop.f32.mrf.mxu2  ;;  %v2238_v16 = vrot.slane %v2236_v12, 4 }
 0x1a0   : > { %1561 = vst.msk [vmem:[#allocation2 + $0xb8] sm:$0xff] %vm256_vm5, %v1529_v54  ;;  %v1750_v20 = vadd.f32 %v4343_v34, %v1592_v36  ;;  %v1488_v21 = vpop.f32.mrf.mxu3  ;;  %v2047_v54 = vld [vmem:[%s3646_s29 + $0x84] sm:$0xc]  ;;  %v2049_v36 = vld [vmem:[%s3646_s29 + $0x8c] sm:$0x3] }
 0x1a1   : > { %v776_v7 = vpop.f32.mrf.mxu1 }
 0x1a2   : > { %1782 = vst.msk [vmem:[#allocation2 + $0xb0] sm:$0xff] %vm256_vm5, %v1750_v20  ;;  %v817_v11 = vadd.f32 %v776_v7, %v675_v24  ;;  %v4405_v42 = vpop.f32.mrf.mxu0  ;;  %v2239_v24 = vrot.slane %v2049_v36, 6 }
 0x1a3   : > { %v880_v19 = vld [vmem:[#allocation2 + $0xc8] sm:$0xff] }
 0x1a4   : > { %v1022_v44 = vadd.f32 %v979_v10, %v880_v19  ;;  %849 = vst.msk [vmem:[#allocation2 + $0xd0] sm:$0xff] %vm256_vm5, %v817_v11  ;;  %3419 = vmatmul.msk.bf16.gmra.mxu1 %vm442_vm1, %v3931_v13  ;;  %3452 = vmatmul.msk.bf16.gmra.mxu2 %vm442_vm1, %v4279_v37 }
 0x1a5   : > { %v1145_v34 = vld [vmem:[#allocation2 + $0xc0] sm:$0xff]  ;;  %3471 = vmatmul.msk.bf16.gmra.mxu3 %vm442_vm1, %v4340_v17  ;;  %3490 = vmatmul.msk.bf16.gmra.mxu0 %vm442_vm1, %v4402_v39 }
 0x1a6   : > { %v1530_v41 = vadd.f32 %v1486_v49, %v1145_v34  ;;  %1054 = vst.msk [vmem:[#allocation2 + $0xc8] sm:$0xff] %vm256_vm5, %v1022_v44  ;;  %v2240_v34 = vsel %vm4197_vm7, %v2238_v16, %v2239_v24 }
 0x1a7   : > { %v1593_v56 = vld [vmem:[#allocation2 + $0xb8] sm:$0xff]  ;;  %v982_v51 = vpop.f32.mrf.mxu2  ;;  %v2294_v45 = vunpack.c.l.b16 %v2240_v34 }
 0x1a8   : > { %1562 = vst.msk [vmem:[#allocation2 + $0xc0] sm:$0xff] %vm256_vm5, %v1530_v41  ;;  %v1751_v13 = vadd.f32 %v4360_v27, %v1593_v56  ;;  %v1491_v37 = vpop.f32.mrf.mxu3 }
 0x1a9   : > { %v778_v31 = vpop.f32.mrf.mxu1 }
 0x1aa   : > { %1783 = vst.msk [vmem:[#allocation2 + $0xb8] sm:$0xff] %vm256_vm5, %v1751_v13  ;;  %v818_v5 = vadd.f32 %v778_v31, %v676_v52  ;;  %v4422_v53 = vpop.f32.mrf.mxu0  ;;  %v2051_v31 = vld [vmem:[%s3646_s29 + $0x94] sm:$0xf] }
 0x1ab   : > { %v881_v26 = vld [vmem:[#allocation2 + $0xd0] sm:$0xff] }
 0x1ac   : > { %v1023_v33 = vadd.f32 %v982_v51, %v881_v26  ;;  %850 = vst.msk [vmem:[#allocation2 + $0xd8] sm:$0xff] %vm256_vm5, %v818_v5  ;;  %v679_v5 = vld [vmem:[#allocation2 + $0xf0] sm:$0xff] }
 0x1ad   : > { %v1146_v27 = vld [vmem:[#allocation2 + $0xc8] sm:$0xff] }
 0x1ae   : > { %v1531_v32 = vadd.f32 %v1488_v21, %v1146_v27  ;;  %1055 = vst.msk [vmem:[#allocation2 + $0xd0] sm:$0xff] %vm256_vm5, %v1023_v33  ;;  %v3441_v21 = vrot.slane %v2047_v54, 10  ;;  %v2243_v27 = vrot.slane %v2051_v31, 6 }
 0x1af   : > { %v1594_v38 = vld [vmem:[#allocation2 + $0xc0] sm:$0xff]  ;;  %v984_v49 = vpop.f32.mrf.mxu2 }
 0x1b0   : > { %1563 = vst.msk [vmem:[#allocation2 + $0xc8] sm:$0xff] %vm256_vm5, %v1531_v32  ;;  %v1752_v1 = vadd.f32 %v4374_v48, %v1594_v38  ;;  %v1493_v29 = vpop.f32.mrf.mxu3  ;;  %v2237_v44 = vsel %vm4197_vm7, %v3441_v21, %v2236_v12  ;;  %v2052_v32 = vld [vmem:[%s3646_s29 + $0x98] sm:$0x3] }
 0x1b1   : > { %v781_v8 = vpop.f32.mrf.mxu1  ;;  %v2293_v30 = vunpack.c.l.b16 %v2237_v44  ;;  %v2246_v46 = vrot.slane %v2052_v32, 6  ;;  %v2054_v44 = vld [vmem:[%s3646_s29 + $0xa0] sm:$0xf] }
 0x1b2   : > { %1784 = vst.msk [vmem:[#allocation2 + $0xc0] sm:$0xff] %vm256_vm5, %v1752_v1  ;;  %v819_v23 = vadd.f32 %v781_v8, %v677_v15  ;;  %v4436_v4 = vpop.f32.mrf.mxu0  ;;  %v3442_v1 = vrot.slane %v2050_v63, 10 }
 0x1b3   : > { %v882_v25 = vld [vmem:[#allocation2 + $0xd8] sm:$0xff]  ;;  %v4464_v18 = vpack.c.b16 %v2294_v45, %v2293_v30  ;;  %v2055_v45 = vld [vmem:[%s3646_s29 + $0xa4] sm:$0x3] }
 0x1b4   : > { %v1024_v10 = vadd.f32 %v984_v49, %v882_v25  ;;  %851 = vst.msk [vmem:[#allocation2 + $0xe0] sm:$0xff] %vm256_vm5, %v819_v23  ;;  %3420 = vmatmul.msk.bf16.gmra.mxu1 %vm442_vm1, %v3956_v58  ;;  %3453 = vmatmul.msk.bf16.gmra.mxu2 %vm442_vm1, %v4309_v9  ;;  %v680_v23 = vld [vmem:[#allocation2 + $0xf8] sm:$0xff]  ;;  %v2244_v36 = vsel %vm4197_vm7, %v3442_v1, %v2243_v27 }
 0x1b5   : > { %v1147_v48 = vld [vmem:[#allocation2 + $0xd0] sm:$0xff]  ;;  %3472 = vmatmul.msk.bf16.gmra.mxu3 %vm442_vm1, %v4371_v59  ;;  %3491 = vmatmul.msk.bf16.gmra.mxu0 %vm442_vm1, %v4433_v0  ;;  %v2295_v21 = vunpack.c.l.b16 %v2244_v36  ;;  %v2053_v30 = vld [vmem:[%s3646_s29 + $0x9c] sm:$0xc] }
 0x1b6   : > { %v1532_v20 = vadd.f32 %v1491_v37, %v1147_v48  ;;  %1056 = vst.msk [vmem:[#allocation2 + $0xd8] sm:$0xff] %vm256_vm5, %v1024_v10 }
 0x1b7   : > { %v1595_v7 = vld [vmem:[#allocation2 + $0xc8] sm:$0xff]  ;;  %v987_v11 = vpop.f32.mrf.mxu2 }
 0x1b8   : > { %1564 = vst.msk [vmem:[#allocation2 + $0xd0] sm:$0xff] %vm256_vm5, %v1532_v20  ;;  %v1753_v58 = vadd.f32 %v4391_v57, %v1595_v7  ;;  %v1496_v9 = vpop.f32.mrf.mxu3 }
 0x1b9   : > { %v783_v19 = vpop.f32.mrf.mxu1 }
 0x1ba   : > { %1785 = vst.msk [vmem:[#allocation2 + $0xc8] sm:$0xff] %vm256_vm5, %v1753_v58  ;;  %v820_v40 = vadd.f32 %v783_v19, %v678_v6  ;;  %v4453_v61 = vpop.f32.mrf.mxu0  ;;  %v1792_v6 = vld [vmem:[#allocation2] sm:$0xff] }
 0x1bb   : > { %v883_v41 = vld [vmem:[#allocation2 + $0xe0] sm:$0xff] }
 0x1bc   : > { %v1025_v43 = vadd.f32 %v987_v11, %v883_v41  ;;  %852 = vst.msk [vmem:[#allocation2 + $0xe8] sm:$0xff] %vm256_vm5, %v820_v40 }
 0x1bd   : > { %v1148_v57 = vld [vmem:[#allocation2 + $0xd8] sm:$0xff] }
 0x1be   : > { %v1533_v56 = vadd.f32 %v1493_v29, %v1148_v57  ;;  %1057 = vst.msk [vmem:[#allocation2 + $0xe0] sm:$0xff] %vm256_vm5, %v1025_v43  ;;  %v2245_v29 = vrot.slane %v2243_v27, 4  ;;  %v2250_v43 = vrot.slane %v2054_v44, 6 }
 0x1bf   : > { %v1596_v51 = vld [vmem:[#allocation2 + $0xd0] sm:$0xff]  ;;  %v989_v13 = vpop.f32.mrf.mxu2 }
 0x1c0   : > { %1565 = vst.msk [vmem:[#allocation2 + $0xd8] sm:$0xff] %vm256_vm5, %v1533_v56  ;;  %v1754_v37 = vadd.f32 %v4405_v42, %v1596_v51  ;;  %v1498_v52 = vpop.f32.mrf.mxu3  ;;  %v2247_v10 = vsel %vm4197_vm7, %v2245_v29, %v2246_v46 }
 0x1c1   : > { %v786_v22 = vpop.f32.mrf.mxu1  ;;  %v2296_v16 = vunpack.c.l.b16 %v2247_v10 }
 0x1c2   : > { %1786 = vst.msk [vmem:[#allocation2 + $0xd0] sm:$0xff] %vm256_vm5, %v1754_v37  ;;  %v821_v26 = vadd.f32 %v786_v22, %v679_v5  ;;  %v4467_v33 = vpop.f32.mrf.mxu0  ;;  %v2252_v37 = vrot.slane %v2250_v43, 4  ;;  %v1793_v22 = vld [vmem:[#allocation2 + $0x8] sm:$0xff] }
 0x1c3   : > { %v884_v62 = vld [vmem:[#allocation2 + $0xe8] sm:$0xff]  ;;  %v4494_v40 = vpack.c.b16 %v2296_v16, %v2295_v21  ;;  %v2058_v21 = vld [vmem:[%s3646_s29 + $0xb0] sm:$0x3] }
 0x1c4   : > { %v1026_v38 = vadd.f32 %v989_v13, %v884_v62  ;;  %853 = vst.msk [vmem:[#allocation2 + $0xf0] sm:$0xff] %vm256_vm5, %v821_v26  ;;  %3421 = vmatmul.msk.bf16.gmra.mxu1 %vm442_vm1, %v3982_v28  ;;  %3454 = vmatmul.msk.bf16.gmra.mxu2 %vm442_vm1, %v4340_v17  ;;  %v3443_v13 = vrot.slane %v2053_v30, 10 }
 0x1c5   : > { %v1149_v42 = vld [vmem:[#allocation2 + $0xe0] sm:$0xff]  ;;  %3473 = vmatmul.msk.bf16.gmra.mxu3 %vm442_vm1, %v4402_v39  ;;  %3492 = vmatmul.msk.bf16.gmra.mxu0 %vm442_vm1, %v4464_v18 }
 0x1c6   : > { %v1534_v49 = vadd.f32 %v1496_v9, %v1149_v42  ;;  %1058 = vst.msk [vmem:[#allocation2 + $0xe8] sm:$0xff] %vm256_vm5, %v1026_v38  ;;  %v2251_v63 = vsel %vm4197_vm7, %v3443_v13, %v2250_v43 }
 0x1c7   : > { %v1597_v15 = vld [vmem:[#allocation2 + $0xd8] sm:$0xff]  ;;  %v992_v8 = vpop.f32.mrf.mxu2 }
 0x1c8   : > { %1566 = vst.msk [vmem:[#allocation2 + $0xe0] sm:$0xff] %vm256_vm5, %v1534_v49  ;;  %v1755_v28 = vadd.f32 %v4422_v53, %v1597_v15  ;;  %v1501_v17 = vpop.f32.mrf.mxu3  ;;  %v2297_v49 = vunpack.c.l.b16 %v2251_v63 }
 0x1c9   : > { %v788_v12 = vpop.f32.mrf.mxu1 }
 0x1ca   : > { %1787 = vst.msk [vmem:[#allocation2 + $0xd8] sm:$0xff] %vm256_vm5, %v1755_v28  ;;  %v822_v25 = vadd.f32 %v788_v12, %v680_v23  ;;  %v4484_v54 = vpop.f32.mrf.mxu0 }
 0x1cb   : > { %v885_v48 = vld [vmem:[#allocation2 + $0xf0] sm:$0xff] }
 0x1cc   : > { %v1027_v20 = vadd.f32 %v992_v8, %v885_v48  ;;  %854 = vst.msk [vmem:[#allocation2 + $0xf8] sm:$0xff] %vm256_vm5, %v822_v25  ;;  %v2057_v25 = vld [vmem:[%s3646_s29 + $0xac] sm:$0xf] }
 0x1cd   : > { %v1150_v53 = vld [vmem:[#allocation2 + $0xe8] sm:$0xff]  ;;  %v2257_v48 = vrot.slane %v2057_v25, 6 }
 0x1ce   : > { %v1535_v24 = vadd.f32 %v1498_v52, %v1150_v53  ;;  %1059 = vst.msk [vmem:[#allocation2 + $0xf0] sm:$0xff] %vm256_vm5, %v1027_v20  ;;  %v2253_v52 = vrot.slane %v2055_v45, 6  ;;  %v2056_v53 = vld [vmem:[%s3646_s29 + $0xa8] sm:$0xc] }
 0x1cf   : > { %v1598_v7 = vld [vmem:[#allocation2 + $0xe0] sm:$0xff]  ;;  %v994_v11 = vpop.f32.mrf.mxu2  ;;  %v1797_v25 = vld [vmem:[#allocation2 + $0x28] sm:$0xff] }
 0x1d0   : > { %1567 = vst.msk [vmem:[#allocation2 + $0xe8] sm:$0xff] %vm256_vm5, %v1535_v24  ;;  %v1756_v58 = vadd.f32 %v4436_v4, %v1598_v7  ;;  %v1503_v9 = vpop.f32.mrf.mxu3  ;;  %v2254_v32 = vsel %vm4197_vm7, %v2252_v37, %v2253_v52  ;;  %v3444_v7 = vrot.slane %v2056_v53, 10 }
 0x1d1   : > { %v1870_v19 = vpop.f32.mrf.mxu1  ;;  %v2298_v1 = vunpack.c.l.b16 %v2254_v32 }
 0x1d2   : > { %1788 = vst.msk [vmem:[#allocation2 + $0xe0] sm:$0xff] %vm256_vm5, %v1756_v58  ;;  %v1950_v34 = vadd.f32 %v1870_v19, %v1792_v6  ;;  %v4498_v41 = vpop.f32.mrf.mxu0  ;;  %v2260_v58 = vrot.slane %v2058_v21, 6  ;;  %v1795_v19 = vld [vmem:[#allocation2 + $0x18] sm:$0xff] }
 0x1d3   : > { %v886_v57 = vld [vmem:[#allocation2 + $0xf8] sm:$0xff]  ;;  %v4525_v12 = vpack.c.b16 %v2298_v1, %v2297_v49  ;;  %v4576_v1 = vld [vmem:[%s4947_s2] ss:$0 sm:$0xff] }
 0x1d4   : > { %v1028_v56 = vadd.f32 %v994_v11, %v886_v57  ;;  %1982 = vst.msk [vmem:[#allocation2] sm:$0xff] %vm256_vm5, %v1950_v34  ;;  %3422 = vmatmul.msk.bf16.gmra.mxu1 %vm442_vm1, %v4010_v2  ;;  %3455 = vmatmul.msk.bf16.gmra.mxu2 %vm442_vm1, %v4371_v59  ;;  %v2259_v11 = vrot.slane %v2257_v48, 4  ;;  %v2258_v57 = vsel %vm4197_vm7, %v3444_v7, %v2257_v48 }
 0x1d5   : > { %v1151_v4 = vld [vmem:[#allocation2 + $0xf0] sm:$0xff]  ;;  %3474 = vmatmul.msk.bf16.gmra.mxu3 %vm442_vm1, %v4433_v0  ;;  %3493 = vmatmul.msk.bf16.gmra.mxu0 %vm442_vm1, %v4494_v40 }
 0x1d6   : > { %v1536_v51 = vadd.f32 %v1501_v17, %v1151_v4  ;;  %1060 = vst.msk [vmem:[#allocation2 + $0xf8] sm:$0xff] %vm256_vm5, %v1028_v56  ;;  %v1794_v17 = vld [vmem:[#allocation2 + $0x10] sm:$0xff]  ;;  %v2261_v30 = vsel %vm4197_vm7, %v2259_v11, %v2260_v58  ;;  %v2299_v4 = vunpack.c.l.b16 %v2258_v57 }
 0x1d7   : > { %v1599_v31 = vld [vmem:[#allocation2 + $0xe8] sm:$0xff]  ;;  %v2379_v5 = vpop.f32.mrf.mxu2 }
 0x1d8   : > { %1568 = vst.msk [vmem:[#allocation2 + $0xf0] sm:$0xff] %vm256_vm5, %v1536_v51  ;;  %v1757_v2 = vadd.f32 %v4453_v61, %v1599_v31  ;;  %v2601_v59 = vpop.f32.mrf.mxu3  ;;  %v2300_v51 = vunpack.c.l.b16 %v2261_v30 }
 0x1d9   : > { %v1872_v26 = vpop.f32.mrf.mxu1 }
 0x1da   : > { %1789 = vst.msk [vmem:[#allocation2 + $0xe8] sm:$0xff] %vm256_vm5, %v1757_v2  ;;  %v1951_v27 = vadd.f32 %v1872_v26, %v1793_v22  ;;  %v4515_v62 = vpop.f32.mrf.mxu0  ;;  %v1796_v2 = vld [vmem:[#allocation2 + $0x20] sm:$0xff]  ;;  %v4556_v22 = vpack.c.b16 %v2300_v51, %v2299_v4  ;;  %v2060_v26 = vld [vmem:[%s3646_s29 + $0xb8] sm:$0xf] }
 0x1db   : > { %v2074_v38 = vld [vmem:[#allocation2] sm:$0xff]  ;;  %v2264_v32 = vrot.slane %v2060_v26, 6 }
 0x1dc   : > { %v2459_v42 = vadd.f32 %v2379_v5, %v2074_v38  ;;  %1983 = vst.msk [vmem:[#allocation2 + $0x8] sm:$0xff] %vm256_vm5, %v1951_v27 }
 0x1dd   : > { %v1152_v61 = vld [vmem:[#allocation2 + $0xf8] sm:$0xff] }
 0x1de   : > { %v1537_v29 = vadd.f32 %v1503_v9, %v1152_v61  ;;  %2491 = vst.msk [vmem:[#allocation2] sm:$0xff] %vm256_vm5, %v2459_v42  ;;  %v2059_v42 = vld [vmem:[%s3646_s29 + $0xb4] sm:$0xc]  ;;  %v2061_v61 = vld [vmem:[%s3646_s29 + $0xbc] sm:$0x3] }
 0x1df   : > { %v1600_v46 = vld [vmem:[#allocation2 + $0xf0] sm:$0xff]  ;;  %v2381_v15 = vpop.f32.mrf.mxu2 }
 0x1e0   : > { %1569 = vst.msk [vmem:[#allocation2 + $0xf8] sm:$0xff] %vm256_vm5, %v1537_v29  ;;  %v1758_v8 = vadd.f32 %v4467_v33, %v1600_v46  ;;  %v2603_v28 = vpop.f32.mrf.mxu3  ;;  %v3445_v46 = vrot.slane %v2059_v42, 10 }
 0x1e1   : > { %v1875_v23 = vpop.f32.mrf.mxu1 }
 0x1e2   : > { %1790 = vst.msk [vmem:[#allocation2 + $0xf0] sm:$0xff] %vm256_vm5, %v1758_v8  ;;  %v1952_v36 = vadd.f32 %v1875_v23, %v1794_v17  ;;  %v4529_v10 = vpop.f32.mrf.mxu0  ;;  %v2265_v21 = vsel %vm4197_vm7, %v3445_v46, %v2264_v32 }
 0x1e3   : > { %v2075_v20 = vld [vmem:[#allocation2 + $0x8] sm:$0xff]  ;;  %v2301_v11 = vunpack.c.l.b16 %v2265_v21 }
 0x1e4   : > { %v2460_v16 = vadd.f32 %v2381_v15, %v2075_v20  ;;  %1984 = vst.msk [vmem:[#allocation2 + $0x10] sm:$0xff] %vm256_vm5, %v1952_v36  ;;  %3423 = vmatmul.msk.bf16.gmra.mxu1 %vm442_vm1, %v4041_v50  ;;  %3456 = vmatmul.msk.bf16.gmra.mxu2 %vm442_vm1, %v4402_v39  ;;  %v2267_v15 = vrot.slane %v2061_v61, 6  ;;  %v1799_v61 = vld [vmem:[#allocation2 + $0x38] sm:$0xff] }
 0x1e5   : > { %v2523_v33 = vld [vmem:[#allocation2] sm:$0xff]  ;;  %3475 = vmatmul.msk.bf16.gmra.mxu3 %vm442_vm1, %v4464_v18  ;;  %3494 = vmatmul.msk.bf16.gmra.mxu0 %vm442_vm1, %v4525_v12 }
 0x1e6   : > { %v2681_v24 = vadd.f32 %v2601_v59, %v2523_v33  ;;  %2492 = vst.msk [vmem:[#allocation2 + $0x8] sm:$0xff] %vm256_vm5, %v2460_v16 }
 0x1e7   : > { %v1601_v9 = vld [vmem:[#allocation2 + $0xf8] sm:$0xff]  ;;  %v2384_v6 = vpop.f32.mrf.mxu2 }
 0x1e8   : > { %2713 = vst.msk [vmem:[#allocation2] sm:$0xff] %vm256_vm5, %v2681_v24  ;;  %v1759_v50 = vadd.f32 %v4484_v54, %v1601_v9  ;;  %v2606_v39 = vpop.f32.mrf.mxu3 }
 0x1e9   : > { %v1877_v44 = vpop.f32.mrf.mxu1 }
 0x1ea   : > { %1791 = vst.msk [vmem:[#allocation2 + $0xf8] sm:$0xff] %vm256_vm5, %v1759_v50  ;;  %v1953_v34 = vadd.f32 %v1877_v44, %v1795_v19  ;;  %v4546_v43 = vpop.f32.mrf.mxu0 }
 0x1eb   : > { %v2076_v45 = vld [vmem:[#allocation2 + $0x10] sm:$0xff] }
 0x1ec   : > { %v2461_v56 = vadd.f32 %v2384_v6, %v2076_v45  ;;  %1985 = vst.msk [vmem:[#allocation2 + $0x18] sm:$0xff] %vm256_vm5, %v1953_v34  ;;  %v1798_v34 = vld [vmem:[#allocation2 + $0x30] sm:$0xff]  ;;  %v2063_v45 = vld [vmem:[%s3646_s29 + $0xc4] sm:$0xf] }
 0x1ed   : > { %v2524_v54 = vld [vmem:[#allocation2 + $0x8] sm:$0xff]  ;;  %v2563_v51 = vrot.slane %v2063_v45, 6 }
 0x1ee   : > { %v2682_v13 = vadd.f32 %v2603_v28, %v2524_v54  ;;  %2493 = vst.msk [vmem:[#allocation2 + $0x10] sm:$0xff] %vm256_vm5, %v2461_v56 }
 0x1ef   : > { %v2745_v37 = vld [vmem:[#allocation2] sm:$0xff]  ;;  %v2386_v52 = vpop.f32.mrf.mxu2 }
 0x1f0   : > { %2714 = vst.msk [vmem:[#allocation2 + $0x8] sm:$0xff] %vm256_vm5, %v2682_v13  ;;  %v2903_v31 = vadd.f32 %v4498_v41, %v2745_v37  ;;  %v2608_v5 = vpop.f32.mrf.mxu3  ;;  %v2062_v37 = vld [vmem:[%s3646_s29 + $0xc0] sm:$0xc] }
 0x1f1   : > { %v1880_v59 = vpop.f32.mrf.mxu1 }
 0x1f2   : > { %2935 = vst.msk [vmem:[#allocation2] sm:$0xff] %vm256_vm5, %v2903_v31  ;;  %v1954_v27 = vadd.f32 %v1880_v59, %v1796_v2  ;;  %v4560_v63 = vpop.f32.mrf.mxu0  ;;  %v3463_v2 = vrot.slane %v2062_v37, 10  ;;  %v2565_v59 = vrot.slane %v2563_v51, 4  ;;  %v1801_v37 = vld [vmem:[#allocation2 + $0x48] sm:$0xff] }
 0x1f3   : > { %v2077_v38 = vld [vmem:[#allocation2 + $0x18] sm:$0xff] }
 0x1f4   : > { %v2462_v49 = vadd.f32 %v2386_v52, %v2077_v38  ;;  %1986 = vst.msk [vmem:[#allocation2 + $0x20] sm:$0xff] %vm256_vm5, %v1954_v27  ;;  %3424 = vmatmul.msk.bf16.gmra.mxu1 %vm442_vm1, %v4075_v35  ;;  %3457 = vmatmul.msk.bf16.gmra.mxu2 %vm442_vm1, %v4433_v0  ;;  %v2266_v35 = vrot.slane %v2264_v32, 4  ;;  %v2064_v52 = vld [vmem:[%s3646_s29 + $0xc8] sm:$0x3] }
 0x1f5   : > { %v2525_v41 = vld [vmem:[#allocation2 + $0x10] sm:$0xff]  ;;  %3476 = vmatmul.msk.bf16.gmra.mxu3 %vm442_vm1, %v4494_v40  ;;  %3495 = vmatmul.msk.bf16.gmra.mxu0 %vm442_vm1, %v4556_v22  ;;  %v2566_v26 = vrot.slane %v2064_v52, 6 }
 0x1f6   : > { %v2683_v29 = vadd.f32 %v2606_v39, %v2525_v41  ;;  %2494 = vst.msk [vmem:[#allocation2 + $0x18] sm:$0xff] %vm256_vm5, %v2462_v49  ;;  %v2268_v16 = vsel %vm4197_vm7, %v2266_v35, %v2267_v15  ;;  %v2564_v35 = vsel %vm4197_vm7, %v3463_v2, %v2563_v51 }
 0x1f7   : > { %v2746_v8 = vld [vmem:[#allocation2 + $0x8] sm:$0xff]  ;;  %v2389_v0 = vpop.f32.mrf.mxu2  ;;  %v2302_v58 = vunpack.c.l.b16 %v2268_v16 }
 0x1f8   : > { %2715 = vst.msk [vmem:[#allocation2 + $0x10] sm:$0xff] %vm256_vm5, %v2683_v29  ;;  %v2904_v28 = vadd.f32 %v4515_v62, %v2746_v8  ;;  %v2611_v17 = vpop.f32.mrf.mxu3 }
 0x1f9   : > { %v2970_v23 = vld [vmem:[#allocation2] sm:$0xff]  ;;  %v1882_v36 = vpop.f32.mrf.mxu1  ;;  %v4601_v30 = vpack.c.b16 %v2302_v58, %v2301_v11 }
 0x1fa   : > { %v3006_v48 = vadd.f32 %v4576_v1, %v2970_v23  ;;  %2936 = vst.msk [vmem:[#allocation2 + $0x8] sm:$0xff] %vm256_vm5, %v2904_v28  ;;  %v1955_v20 = vadd.f32 %v1882_v36, %v1797_v25  ;;  %v4584_v53 = vpop.f32.mrf.mxu0  ;;  %v2577_v28 = vunpack.c.l.b16 %v2564_v35 }
 0x1fb   : > { %v2078_v62 = vld [vmem:[#allocation2 + $0x20] sm:$0xff] }
 0x1fc   : > { %v3038_v33 = vmax.f32 %v3006_v48, 0.0  ;;  %v2463_v24 = vadd.f32 %v2389_v0, %v2078_v62  ;;  %1987 = vst.msk [vmem:[#allocation2 + $0x28] sm:$0xff] %vm256_vm5, %v1955_v20  ;;  %v1800_v62 = vld [vmem:[#allocation2 + $0x40] sm:$0xff] }
 0x1fd   : > { %v2526_v7 = vld [vmem:[#allocation2 + $0x18] sm:$0xff] }
 0x1fe   : > { %3070 = vst.msk [vmem:[%s4593_s19] sm:$0xff] %vm256_vm5, %v3038_v33  ;;  %v2684_v9 = vadd.f32 %v2608_v5, %v2526_v7  ;;  %v2066_v7 = vld [vmem:[%s3646_s29 + $0xd0] sm:$0xf] }
 0x1ff   : > { %2495 = vst.msk [vmem:[#allocation2 + $0x20] sm:$0xff] %vm256_vm5, %v2463_v24  ;;  %v2747_v6 = vld [vmem:[#allocation2 + $0x10] sm:$0xff]  ;;  %v2391_v50 = vpop.f32.mrf.mxu2 }
 0x200   : > { %2716 = vst.msk [vmem:[#allocation2 + $0x18] sm:$0xff] %vm256_vm5, %v2684_v9  ;;  %v2905_v39 = vadd.f32 %v4529_v10, %v2747_v6  ;;  %v2613_v19 = vpop.f32.mrf.mxu3  ;;  %v2570_v6 = vrot.slane %v2066_v7, 6 }
 0x201   : > { %v2971_v44 = vld [vmem:[#allocation2 + $0x8] sm:$0xff]  ;;  %v1885_v57 = vpop.f32.mrf.mxu1 }
 0x202   : > { %v3007_v56 = vadd.f32 %v4576_v1, %v2971_v44  ;;  %2937 = vst.msk [vmem:[#allocation2 + $0x10] sm:$0xff] %vm256_vm5, %v2905_v39  ;;  %v1956_v54 = vadd.f32 %v1885_v57, %v1798_v34  ;;  %v4606_v4 = vpop.f32.mrf.mxu0  ;;  %v2065_v39 = vld [vmem:[%s3646_s29 + $0xcc] sm:$0xc]  ;;  %v2572_v45 = vrot.slane %v2570_v6, 4 }
 0x203   : > { %v2079_v13 = vld [vmem:[#allocation2 + $0x28] sm:$0xff]  ;;  %v3464_v57 = vrot.slane %v2065_v39, 10 }
 0x204   : > { %v3039_v10 = vmax.f32 %v3007_v56, 0.0  ;;  %v2464_v31 = vadd.f32 %v2391_v50, %v2079_v13  ;;  %1988 = vst.msk [vmem:[#allocation2 + $0x30] sm:$0xff] %vm256_vm5, %v1956_v54  ;;  %3425 = vmatmul.msk.bf16.gmra.mxu1 %vm442_vm1, %v4109_v60  ;;  %3458 = vmatmul.msk.bf16.gmra.mxu2 %vm442_vm1, %v4464_v18 }
 0x205   : > { %3477 = vmatmul.msk.bf16.gmra.mxu3 %vm442_vm1, %v4525_v12  ;;  %3496 = vmatmul.msk.bf16.gmra.mxu0 %vm442_vm1, %v4601_v30  ;;  %v2571_v2 = vsel %vm4197_vm7, %v3464_v57, %v2570_v6 }
 0x206   : > { %3071 = vst.msk [vmem:[%s4593_s19 + $0x8] sm:$0xff] %vm256_vm5, %v3039_v10  ;;  %v2527_v5 = vld [vmem:[#allocation2 + $0x20] sm:$0xff] }
 0x207   : > { %v2685_v27 = vadd.f32 %v2611_v17, %v2527_v5  ;;  %2496 = vst.msk [vmem:[#allocation2 + $0x28] sm:$0xff] %vm256_vm5, %v2464_v31  ;;  %v2748_v32 = vld [vmem:[#allocation2 + $0x18] sm:$0xff]  ;;  %v2394_v60 = vpop.f32.mrf.mxu2 }
 0x208   : > { %v2906_v38 = vadd.f32 %v4546_v43, %v2748_v32  ;;  %v2616_v18 = vpop.f32.mrf.mxu3  ;;  %v2567_v43 = vsel %vm4197_vm7, %v2565_v59, %v2566_v26 }
 0x209   : > { %v2972_v42 = vld [vmem:[#allocation2 + $0x10] sm:$0xff]  ;;  %2717 = vst.msk [vmem:[#allocation2 + $0x20] sm:$0xff] %vm256_vm5, %v2685_v27  ;;  %v1887_v49 = vpop.f32.mrf.mxu1  ;;  %v2578_v17 = vunpack.c.l.b16 %v2567_v43 }
 0x20a   : > { %v3008_v41 = vadd.f32 %v4576_v1, %v2972_v42  ;;  %2938 = vst.msk [vmem:[#allocation2 + $0x18] sm:$0xff] %vm256_vm5, %v2906_v38  ;;  %v1957_v29 = vadd.f32 %v1887_v49, %v1799_v61  ;;  %v4626_v46 = vpop.f32.mrf.mxu0  ;;  %v1116_v42 = vld [vmem:[%s3646_s29 + $0xdc] sm:$0xf]  ;;  %v1802_v43 = vld [vmem:[#allocation2 + $0x50] sm:$0xff] }
 0x20b   : > { %v2080_v15 = vld [vmem:[#allocation2 + $0x30] sm:$0xff]  ;;  %v4638_v24 = vpack.c.b16 %v2578_v17, %v2577_v28  ;;  %v2069_v28 = vld [vmem:[%s3646_s29 + $0xdc] sm:$0xf] }
 0x20c   : > { %v3040_v8 = vmax.f32 %v3008_v41, 0.0  ;;  %v2465_v0 = vadd.f32 %v2394_v60, %v2080_v15  ;;  %1989 = vst.msk [vmem:[#allocation2 + $0x38] sm:$0xff] %vm256_vm5, %v1957_v29  ;;  %v2579_v60 = vunpack.c.l.b16 %v2571_v2 }
 0x20e   : > { %3072 = vst.msk [vmem:[%s4593_s19 + $0x10] sm:$0xff] %vm256_vm5, %v3040_v8  ;;  %v2528_v23 = vld [vmem:[#allocation2 + $0x28] sm:$0xff]  ;;  %v1832_v8 = vrot.slane %v1116_v42, 5 }
 0x20f   : > { %v2686_v25 = vadd.f32 %v2613_v19, %v2528_v23  ;;  %2497 = vst.msk [vmem:[#allocation2 + $0x30] sm:$0xff] %vm256_vm5, %v2465_v0  ;;  %v2396_v36 = vpop.f32.mrf.mxu2  ;;  %v2067_v19 = vld [vmem:[%s3646_s29 + $0xd4] sm:$0x3] }
 0x210   : > { %v2749_v48 = vld [vmem:[#allocation2 + $0x20] sm:$0xff]  ;;  %v2618_v20 = vpop.f32.mrf.mxu3  ;;  %v2573_v56 = vrot.slane %v2067_v19, 6  ;;  %v1834_v6 = vrot.slane %v1832_v8, 4 }
 0x211   : > { %v2973_v21 = vld [vmem:[#allocation2 + $0x18] sm:$0xff]  ;;  %2718 = vst.msk [vmem:[#allocation2 + $0x28] sm:$0xff] %vm256_vm5, %v2686_v25  ;;  %v2907_v16 = vadd.f32 %v4560_v63, %v2749_v48  ;;  %v1890_v33 = vpop.f32.mrf.mxu1 }
 0x212   : > { %v3009_v11 = vadd.f32 %v4576_v1, %v2973_v21  ;;  %v1958_v58 = vadd.f32 %v1890_v33, %v1800_v62  ;;  %v4642_v9 = vpop.f32.mrf.mxu0  ;;  %v2574_v59 = vsel %vm4197_vm7, %v2572_v45, %v2573_v56  ;;  %v1115_v25 = vld [vmem:[%s3646_s29 + $0xd8] sm:$0xe]  ;;  %v2070_v62 = vld [vmem:[%s3646_s29 + $0xe0] sm:$0x3] }
 0x213   : > { %2939 = vst.msk [vmem:[#allocation2 + $0x20] sm:$0xff] %vm256_vm5, %v2907_v16  ;;  %v2081_v50 = vld [vmem:[#allocation2 + $0x38] sm:$0xff]  ;;  %v2580_v38 = vunpack.c.l.b16 %v2574_v59 }
 0x214   : > { %v3041_v44 = vmax.f32 %v3009_v11, 0.0  ;;  %v2466_v34 = vadd.f32 %v2396_v36, %v2081_v50  ;;  %1990 = vst.msk [vmem:[#allocation2 + $0x40] sm:$0xff] %vm256_vm5, %v1958_v58  ;;  %3426 = vmatmul.msk.bf16.gmra.mxu1 %vm442_vm1, %v4141_v14  ;;  %3459 = vmatmul.msk.bf16.gmra.mxu2 %vm442_vm1, %v4494_v40  ;;  %v1117_v36 = vld [vmem:[%s3646_s29 + $0xe0] sm:$0x1]  ;;  %v3411_v58 = vrot.slane %v1115_v25, 9  ;;  %v1803_v45 = vld [vmem:[#allocation2 + $0x58] sm:$0xff] }
 0x215   : > { %3478 = vmatmul.msk.bf16.gmra.mxu3 %vm442_vm1, %v4556_v22  ;;  %3497 = vmatmul.msk.bf16.gmra.mxu0 %vm442_vm1, %v4638_v24  ;;  %v4676_v0 = vpack.c.b16 %v2580_v38, %v2579_v60  ;;  %v1835_v50 = vrot.slane %v1117_v36, 5  ;;  %v1119_v38 = vld [vmem:[%s3646_s29 + $0xe8] sm:$0xf]  ;;  %v1120_v25 = vld [vmem:[%s3646_s29 + $0xec] sm:$0x1] }
 0x216   : > { %3073 = vst.msk [vmem:[%s4593_s19 + $0x18] sm:$0xff] %vm256_vm5, %v3041_v44  ;;  %v2529_v63 = vld [vmem:[#allocation2 + $0x30] sm:$0xff] }
 0x217   : > { %v2687_v54 = vadd.f32 %v2616_v18, %v2529_v63  ;;  %2498 = vst.msk [vmem:[#allocation2 + $0x38] sm:$0xff] %vm256_vm5, %v2466_v34  ;;  %v2399_v51 = vpop.f32.mrf.mxu2 }
 0x218   : > { %v2750_v14 = vld [vmem:[#allocation2 + $0x28] sm:$0xff]  ;;  %v2621_v13 = vpop.f32.mrf.mxu3 }
 0x219   : > { %2719 = vst.msk [vmem:[#allocation2 + $0x30] sm:$0xff] %vm256_vm5, %v2687_v54  ;;  %v2908_v40 = vadd.f32 %v4584_v53, %v2750_v14  ;;  %v1892_v52 = vpop.f32.mrf.mxu1  ;;  %v1833_v54 = vsel %vm3740_vm4, %v3411_v58, %v1832_v8 }
 0x21a   : > { %v2974_v10 = vld [vmem:[#allocation2 + $0x20] sm:$0xff]  ;;  %v1959_v31 = vadd.f32 %v1892_v52, %v1801_v37  ;;  %v4661_v5 = vpop.f32.mrf.mxu0  ;;  %v1846_v2 = vunpack.c.l.b16 %v1833_v54 }
 0x21b   : > { %v3010_v26 = vadd.f32 %v4576_v1, %v2974_v10  ;;  %2940 = vst.msk [vmem:[#allocation2 + $0x28] sm:$0xff] %vm256_vm5, %v2908_v40  ;;  %v2082_v27 = vld [vmem:[#allocation2 + $0x40] sm:$0xff] }
 0x21c   : > { %v2467_v53 = vadd.f32 %v2399_v51, %v2082_v27  ;;  %1991 = vst.msk [vmem:[#allocation2 + $0x48] sm:$0xff] %vm256_vm5, %v1959_v31  ;;  %v1836_v51 = vsel %vm3740_vm4, %v1834_v6, %v1835_v50  ;;  %v1842_v6 = vrot.slane %v1120_v25, 5 }
 0x21d   : > { %v3042_v32 = vmax.f32 %v3010_v26, 0.0  ;;  %v1847_v59 = vunpack.c.l.b16 %v1836_v51 }
 0x21e   : > { %v2530_v18 = vld [vmem:[#allocation2 + $0x38] sm:$0xff]  ;;  %2499 = vst.msk [vmem:[#allocation2 + $0x40] sm:$0xff] %vm256_vm5, %v2467_v53 }
 0x21f   : > { %3074 = vst.msk [vmem:[%s4593_s19 + $0x20] sm:$0xff] %vm256_vm5, %v3042_v32  ;;  %v2688_v61 = vadd.f32 %v2618_v20, %v2530_v18  ;;  %v2401_v49 = vpop.f32.mrf.mxu2  ;;  %v2785_v20 = vrot.slane %v2069_v28, 6  ;;  %v2072_v28 = vld [vmem:[%s3646_s29 + $0xe8] sm:$0xf] }
 0x220   : > { %v2751_v41 = vld [vmem:[#allocation2 + $0x30] sm:$0xff]  ;;  %v2623_v29 = vpop.f32.mrf.mxu3 }
 0x221   : > { %2720 = vst.msk [vmem:[#allocation2 + $0x38] sm:$0xff] %vm256_vm5, %v2688_v61  ;;  %v2909_v35 = vadd.f32 %v4606_v4, %v2751_v41  ;;  %v1895_v15 = vpop.f32.mrf.mxu1  ;;  %v2068_v4 = vld [vmem:[%s3646_s29 + $0xd8] sm:$0xc]  ;;  %v2787_v44 = vrot.slane %v2785_v20, 4 }
 0x222   : > { %v2975_v17 = vld [vmem:[#allocation2 + $0x28] sm:$0xff]  ;;  %v1960_v23 = vadd.f32 %v1895_v15, %v1802_v43  ;;  %v4681_v48 = vpop.f32.mrf.mxu0  ;;  %v3482_v19 = vrot.slane %v2068_v4, 10  ;;  %v1118_v15 = vld [vmem:[%s3646_s29 + $0xe4] sm:$0xe] }
 0x223   : > { %v3011_v21 = vadd.f32 %v4576_v1, %v2975_v17  ;;  %2941 = vst.msk [vmem:[#allocation2 + $0x30] sm:$0xff] %vm256_vm5, %v2909_v35  ;;  %v2083_v16 = vld [vmem:[#allocation2 + $0x48] sm:$0xff]  ;;  %v1804_v35 = vld [vmem:[#allocation2 + $0x60] sm:$0xff] }
 0x224   : > { %v2468_v33 = vadd.f32 %v2401_v49, %v2083_v16  ;;  %1992 = vst.msk [vmem:[#allocation2 + $0x50] sm:$0xff] %vm256_vm5, %v1960_v23  ;;  %3427 = vmatmul.msk.bf16.gmra.mxu1 %vm442_vm1, %v4178_v55  ;;  %3460 = vmatmul.msk.bf16.gmra.mxu2 %vm442_vm1, %v4525_v12  ;;  %v2788_v55 = vrot.slane %v2070_v62, 6  ;;  %v2786_v37 = vsel %vm4197_vm7, %v3482_v19, %v2785_v20  ;;  %v2792_v20 = vrot.slane %v2072_v28, 6  ;;  %v2071_v16 = vld [vmem:[%s3646_s29 + $0xe4] sm:$0xc] }
 0x225   : > { %v3043_v7 = vmax.f32 %v3011_v21, 0.0  ;;  %v2531_v11 = vld [vmem:[#allocation2 + $0x40] sm:$0xff]  ;;  %3479 = vmatmul.msk.bf16.gmra.mxu3 %vm442_vm1, %v4601_v30  ;;  %3498 = vmatmul.msk.bf16.gmra.mxu0 %vm442_vm1, %v4676_v0  ;;  %v2799_v53 = vunpack.c.l.b16 %v2786_v37  ;;  %v1850_v49 = vpack.c.b16 %v1847_v59, %v1846_v2  ;;  %v2073_v4 = vld [vmem:[%s3646_s29 + $0xec] sm:$0x3] }
 0x226   : > { %v2689_v39 = vadd.f32 %v2621_v13, %v2531_v11  ;;  %2500 = vst.msk [vmem:[#allocation2 + $0x48] sm:$0xff] %vm256_vm5, %v2468_v33  ;;  %v3412_v11 = vrot.slane %v1118_v15, 9  ;;  %v2794_v19 = vrot.slane %v2792_v20, 4 }
 0x227   : > { %3075 = vst.msk [vmem:[%s4593_s19 + $0x28] sm:$0xff] %vm256_vm5, %v3043_v7  ;;  %v2404_v12 = vpop.f32.mrf.mxu2 }
 0x228   : > { %2721 = vst.msk [vmem:[#allocation2 + $0x40] sm:$0xff] %vm256_vm5, %v2689_v39  ;;  %v2752_v34 = vld [vmem:[#allocation2 + $0x38] sm:$0xff]  ;;  %v2626_v63 = vpop.f32.mrf.mxu3  ;;  %v3483_v39 = vrot.slane %v2071_v16, 10 }
 0x229   : > { %v2910_v57 = vadd.f32 %v4626_v46, %v2752_v34  ;;  %v1897_v56 = vpop.f32.mrf.mxu1  ;;  %v2789_v46 = vsel %vm4197_vm7, %v2787_v44, %v2788_v55  ;;  %v2795_v44 = vrot.slane %v2073_v4, 6 }
 0x22a   : > { %v2976_v14 = vld [vmem:[#allocation2 + $0x30] sm:$0xff]  ;;  %v1961_v13 = vadd.f32 %v1897_v56, %v1803_v45  ;;  %v4705_v40 = vpop.f32.mrf.mxu0  ;;  %v2800_v32 = vunpack.c.l.b16 %v2789_v46 }
 0x22b   : > { %v3012_v52 = vadd.f32 %v4576_v1, %v2976_v14  ;;  %2942 = vst.msk [vmem:[#allocation2 + $0x38] sm:$0xff] %vm256_vm5, %v2910_v57  ;;  %v2084_v10 = vld [vmem:[#allocation2 + $0x50] sm:$0xff]  ;;  %v1805_v57 = vld [vmem:[#allocation2 + $0x68] sm:$0xff] }
 0x22c   : > { %v2469_v31 = vadd.f32 %v2404_v12, %v2084_v10  ;;  %1993 = vst.msk [vmem:[#allocation2 + $0x58] sm:$0xff] %vm256_vm5, %v1961_v13  ;;  %v2803_v8 = vpack.c.b16 %v2800_v32, %v2799_v53  ;;  %v2796_v13 = vsel %vm4197_vm7, %v2794_v19, %v2795_v44  ;;  %v1808_v19 = vld [vmem:[#allocation2 + $0x80] sm:$0xff] }
 0x22d   : > { %v3044_v26 = vmax.f32 %v3012_v52, 0.0  ;;  %v2532_v27 = vld [vmem:[#allocation2 + $0x48] sm:$0xff]  ;;  %v2802_v59 = vunpack.c.l.b16 %v2796_v13 }
 0x22e   : > { %v2690_v60 = vadd.f32 %v2623_v29, %v2532_v27  ;;  %2501 = vst.msk [vmem:[#allocation2 + $0x50] sm:$0xff] %vm256_vm5, %v2469_v31  ;;  %v1839_v29 = vrot.slane %v1119_v38, 5 }
 0x22f   : > { %3076 = vst.msk [vmem:[%s4593_s19 + $0x30] sm:$0xff] %vm256_vm5, %v3044_v26  ;;  %v2753_v18 = vld [vmem:[#allocation2 + $0x40] sm:$0xff]  ;;  %v2406_v42 = vpop.f32.mrf.mxu2 }
 0x230   : > { %2722 = vst.msk [vmem:[#allocation2 + $0x48] sm:$0xff] %vm256_vm5, %v2690_v60  ;;  %v2911_v61 = vadd.f32 %v4642_v9, %v2753_v18  ;;  %v2628_v41 = vpop.f32.mrf.mxu3  ;;  %v1841_v58 = vrot.slane %v1839_v29, 4  ;;  %v1806_v18 = vld [vmem:[#allocation2 + $0x70] sm:$0xff] }
 0x231   : > { %v1900_v43 = vpop.f32.mrf.mxu1 }
 0x232   : > { %v2977_v17 = vld [vmem:[#allocation2 + $0x38] sm:$0xff]  ;;  %2943 = vst.msk [vmem:[#allocation2 + $0x40] sm:$0xff] %vm256_vm5, %v2911_v61  ;;  %v1962_v23 = vadd.f32 %v1900_v43, %v1804_v35  ;;  %v4724_v36 = vpop.f32.mrf.mxu0  ;;  %v1843_v56 = vsel %vm3740_vm4, %v1841_v58, %v1842_v6 }
 0x233   : > { %v3013_v9 = vadd.f32 %v4576_v1, %v2977_v17  ;;  %v2085_v21 = vld [vmem:[#allocation2 + $0x58] sm:$0xff]  ;;  %v1849_v10 = vunpack.c.l.b16 %v1843_v56 }
 0x234   : > { %v2470_v62 = vadd.f32 %v2406_v42, %v2085_v21  ;;  %1994 = vst.msk [vmem:[#allocation2 + $0x60] sm:$0xff] %vm256_vm5, %v1962_v23  ;;  %3428 = vmatmul.msk.bf16.gmra.mxu1 %vm442_vm1, %v1850_v49  ;;  %3461 = vmatmul.msk.bf16.gmra.mxu2 %vm442_vm1, %v4556_v22 }
 0x235   : > { %v3045_v33 = vmax.f32 %v3013_v9, 0.0  ;;  %v2533_v7 = vld [vmem:[#allocation2 + $0x50] sm:$0xff]  ;;  %3480 = vmatmul.msk.bf16.gmra.mxu3 %vm442_vm1, %v4638_v24  ;;  %3499 = vmatmul.msk.bf16.gmra.mxu0 %vm442_vm1, %v2803_v8 }
 0x236   : > { %v2691_v50 = vadd.f32 %v2626_v63, %v2533_v7  ;;  %2502 = vst.msk [vmem:[#allocation2 + $0x58] sm:$0xff] %vm256_vm5, %v2470_v62  ;;  %v1840_v63 = vsel %vm3740_vm4, %v3412_v11, %v1839_v29 }
 0x237   : > { %3077 = vst.msk [vmem:[%s4593_s19 + $0x38] sm:$0xff] %vm256_vm5, %v3045_v33  ;;  %v2754_v55 = vld [vmem:[#allocation2 + $0x48] sm:$0xff]  ;;  %v2409_v22 = vpop.f32.mrf.mxu2  ;;  %v1848_v47 = vunpack.c.l.b16 %v1840_v63 }
 0x238   : > { %2723 = vst.msk [vmem:[#allocation2 + $0x50] sm:$0xff] %vm256_vm5, %v2691_v50  ;;  %v2912_v12 = vadd.f32 %v4661_v5, %v2754_v55  ;;  %v2631_v24 = vpop.f32.mrf.mxu3  ;;  %v2793_v5 = vsel %vm4197_vm7, %v3483_v39, %v2792_v20 }
 0x239   : > { %v2978_v34 = vld [vmem:[#allocation2 + $0x40] sm:$0xff]  ;;  %v1902_v45 = vpop.f32.mrf.mxu1  ;;  %v2801_v2 = vunpack.c.l.b16 %v2793_v5  ;;  %v1851_v32 = vpack.c.b16 %v1849_v10, %v1848_v47  ;;  %v1809_v5 = vld [vmem:[#allocation2 + $0x88] sm:$0xff] }
 0x23a   : > { %v3014_v54 = vadd.f32 %v4576_v1, %v2978_v34  ;;  %2944 = vst.msk [vmem:[#allocation2 + $0x48] sm:$0xff] %vm256_vm5, %v2912_v12  ;;  %v1963_v51 = vadd.f32 %v1902_v45, %v1805_v57  ;;  %v4747_v14 = vpop.f32.mrf.mxu0 }
 0x23b   : > { %v2086_v37 = vld [vmem:[#allocation2 + $0x60] sm:$0xff]  ;;  %v2804_v61 = vpack.c.b16 %v2802_v59, %v2801_v2 }
 0x23c   : > { %v3046_v46 = vmax.f32 %v3014_v54, 0.0  ;;  %v2471_v52 = vadd.f32 %v2409_v22, %v2086_v37  ;;  %1995 = vst.msk [vmem:[#allocation2 + $0x68] sm:$0xff] %vm256_vm5, %v1963_v51 }
 0x23d   : > { %v2534_v31 = vld [vmem:[#allocation2 + $0x58] sm:$0xff] }
 0x23e   : > { %3078 = vst.msk [vmem:[%s4593_s19 + $0x40] sm:$0xff] %vm256_vm5, %v3046_v46  ;;  %v2692_v26 = vadd.f32 %v2628_v41, %v2534_v31 }
 0x23f   : > { %2503 = vst.msk [vmem:[#allocation2 + $0x60] sm:$0xff] %vm256_vm5, %v2471_v52  ;;  %v2755_v27 = vld [vmem:[#allocation2 + $0x50] sm:$0xff]  ;;  %v2411_v53 = vpop.f32.mrf.mxu2 }
 0x240   : > { %2724 = vst.msk [vmem:[#allocation2 + $0x58] sm:$0xff] %vm256_vm5, %v2692_v26  ;;  %v2913_v3 = vadd.f32 %v4681_v48, %v2755_v27  ;;  %v2633_v60 = vpop.f32.mrf.mxu3 }
 0x241   : > { %v2979_v38 = vld [vmem:[#allocation2 + $0x48] sm:$0xff]  ;;  %v1905_v42 = vpop.f32.mrf.mxu1 }
 0x242   : > { %v3015_v49 = vadd.f32 %v4576_v1, %v2979_v38  ;;  %2945 = vst.msk [vmem:[#allocation2 + $0x50] sm:$0xff] %vm256_vm5, %v2913_v3  ;;  %v1964_v41 = vadd.f32 %v1905_v42, %v1806_v18  ;;  %v4761_v35 = vpop.f32.mrf.mxu0 }
 0x243   : > { %v2087_v43 = vld [vmem:[#allocation2 + $0x68] sm:$0xff] }
 0x244   : > { %v3047_v15 = vmax.f32 %v3015_v49, 0.0  ;;  %v2472_v29 = vadd.f32 %v2411_v53, %v2087_v43  ;;  %1996 = vst.msk [vmem:[#allocation2 + $0x70] sm:$0xff] %vm256_vm5, %v1964_v41  ;;  %3429 = vmatmul.msk.bf16.gmra.mxu1 %vm442_vm1, %v1851_v32  ;;  %3462 = vmatmul.msk.bf16.gmra.mxu2 %vm442_vm1, %v4601_v30  ;;  %v1807_v30 = vld [vmem:[#allocation2 + $0x78] sm:$0xff]  ;;  %v1810_v32 = vld [vmem:[#allocation2 + $0x90] sm:$0xff] }
 0x245   : > { %3481 = vmatmul.msk.bf16.gmra.mxu3 %vm442_vm1, %v4676_v0  ;;  %3500 = vmatmul.msk.bf16.gmra.mxu0 %vm442_vm1, %v2804_v61 }
 0x246   : > { %3079 = vst.msk [vmem:[%s4593_s19 + $0x48] sm:$0xff] %vm256_vm5, %v3047_v15  ;;  %v2535_v48 = vld [vmem:[#allocation2 + $0x60] sm:$0xff] }
 0x247   : > { %v2693_v8 = vadd.f32 %v2631_v24, %v2535_v48  ;;  %2504 = vst.msk [vmem:[#allocation2 + $0x68] sm:$0xff] %vm256_vm5, %v2472_v29  ;;  %v2756_v28 = vld [vmem:[#allocation2 + $0x58] sm:$0xff]  ;;  %v2414_v17 = vpop.f32.mrf.mxu2 }
 0x248   : > { %v2914_v23 = vadd.f32 %v4705_v40, %v2756_v28  ;;  %v2636_v25 = vpop.f32.mrf.mxu3 }
 0x249   : > { %v2980_v20 = vld [vmem:[#allocation2 + $0x50] sm:$0xff]  ;;  %2725 = vst.msk [vmem:[#allocation2 + $0x60] sm:$0xff] %vm256_vm5, %v2693_v8  ;;  %v1907_v9 = vpop.f32.mrf.mxu1 }
 0x24a   : > { %v3016_v0 = vadd.f32 %v4576_v1, %v2980_v20  ;;  %2946 = vst.msk [vmem:[#allocation2 + $0x58] sm:$0xff] %vm256_vm5, %v2914_v23  ;;  %v1965_v21 = vadd.f32 %v1907_v9, %v1807_v30  ;;  %v4777_v16 = vpop.f32.mrf.mxu0 }
 0x24b   : > { %v2088_v4 = vld [vmem:[#allocation2 + $0x70] sm:$0xff] }
 0x24c   : > { %v3048_v62 = vmax.f32 %v3016_v0, 0.0  ;;  %v2473_v33 = vadd.f32 %v2414_v17, %v2088_v4  ;;  %1997 = vst.msk [vmem:[#allocation2 + $0x78] sm:$0xff] %vm256_vm5, %v1965_v21  ;;  %v1811_v17 = vld [vmem:[#allocation2 + $0x98] sm:$0xff] }
 0x24e   : > { %3080 = vst.msk [vmem:[%s4593_s19 + $0x50] sm:$0xff] %vm256_vm5, %v3048_v62  ;;  %v2536_v40 = vld [vmem:[#allocation2 + $0x68] sm:$0xff] }
 0x24f   : > { %v2694_v7 = vadd.f32 %v2633_v60, %v2536_v40  ;;  %2505 = vst.msk [vmem:[#allocation2 + $0x70] sm:$0xff] %vm256_vm5, %v2473_v33  ;;  %v2416_v11 = vpop.f32.mrf.mxu2 }
 0x250   : > { %v2757_v58 = vld [vmem:[#allocation2 + $0x60] sm:$0xff]  ;;  %v2638_v6 = vpop.f32.mrf.mxu3 }
 0x251   : > { %v2981_v50 = vld [vmem:[#allocation2 + $0x58] sm:$0xff]  ;;  %2726 = vst.msk [vmem:[#allocation2 + $0x68] sm:$0xff] %vm256_vm5, %v2694_v7  ;;  %v2915_v39 = vadd.f32 %v4724_v36, %v2757_v58  ;;  %v1910_v44 = vpop.f32.mrf.mxu1  ;;  %v1812_v58 = vld [vmem:[#allocation2 + $0xa0] sm:$0xff] }
 0x252   : > { %v3017_v55 = vadd.f32 %v4576_v1, %v2981_v50  ;;  %v1966_v22 = vadd.f32 %v1910_v44, %v1808_v19  ;;  %v4786_v12 = vpop.f32.mrf.mxu0 }
 0x253   : > { %2947 = vst.msk [vmem:[#allocation2 + $0x60] sm:$0xff] %vm256_vm5, %v2915_v39  ;;  %v2089_v24 = vld [vmem:[#allocation2 + $0x78] sm:$0xff] }
 0x254   : > { %v3049_v34 = vmax.f32 %v3017_v55, 0.0  ;;  %v2474_v57 = vadd.f32 %v2416_v11, %v2089_v24  ;;  %1998 = vst.msk [vmem:[#allocation2 + $0x80] sm:$0xff] %vm256_vm5, %v1966_v22 }
 0x256   : > { %3081 = vst.msk [vmem:[%s4593_s19 + $0x58] sm:$0xff] %vm256_vm5, %v3049_v34  ;;  %v2537_v45 = vld [vmem:[#allocation2 + $0x70] sm:$0xff] }
 0x257   : > { %v2695_v63 = vadd.f32 %v2636_v25, %v2537_v45  ;;  %2506 = vst.msk [vmem:[#allocation2 + $0x78] sm:$0xff] %vm256_vm5, %v2474_v57  ;;  %v2419_v36 = vpop.f32.mrf.mxu2 }
 0x258   : > { %v2758_v56 = vld [vmem:[#allocation2 + $0x68] sm:$0xff]  ;;  %v2641_v54 = vpop.f32.mrf.mxu3 }
 0x259   : > { %2727 = vst.msk [vmem:[#allocation2 + $0x70] sm:$0xff] %vm256_vm5, %v2695_v63  ;;  %v2916_v51 = vadd.f32 %v4747_v14, %v2758_v56  ;;  %v1912_v13 = vpop.f32.mrf.mxu1  ;;  %v1813_v56 = vld [vmem:[#allocation2 + $0xa8] sm:$0xff] }
 0x25a   : > { %v2982_v37 = vld [vmem:[#allocation2 + $0x60] sm:$0xff]  ;;  %v1967_v46 = vadd.f32 %v1912_v13, %v1809_v5  ;;  %v4798_v31 = vpop.f32.mrf.mxu0 }
 0x25b   : > { %v3018_v52 = vadd.f32 %v4576_v1, %v2982_v37  ;;  %2948 = vst.msk [vmem:[#allocation2 + $0x68] sm:$0xff] %vm256_vm5, %v2916_v51  ;;  %v2090_v47 = vld [vmem:[#allocation2 + $0x80] sm:$0xff] }
 0x25c   : > { %v2475_v10 = vadd.f32 %v2419_v36, %v2090_v47  ;;  %1999 = vst.msk [vmem:[#allocation2 + $0x88] sm:$0xff] %vm256_vm5, %v1967_v46 }
 0x25d   : > { %v3050_v2 = vmax.f32 %v3018_v52, 0.0 }
 0x25e   : > { %v2538_v59 = vld [vmem:[#allocation2 + $0x78] sm:$0xff]  ;;  %2507 = vst.msk [vmem:[#allocation2 + $0x80] sm:$0xff] %vm256_vm5, %v2475_v10 }
 0x25f   : > { %3082 = vst.msk [vmem:[%s4593_s19 + $0x60] sm:$0xff] %vm256_vm5, %v3050_v2  ;;  %v2696_v14 = vadd.f32 %v2638_v6, %v2538_v59  ;;  %v2421_v26 = vpop.f32.mrf.mxu2 }
 0x260   : > { %v2759_v27 = vld [vmem:[#allocation2 + $0x70] sm:$0xff]  ;;  %v2643_v53 = vpop.f32.mrf.mxu3 }
 0x261   : > { %2728 = vst.msk [vmem:[#allocation2 + $0x78] sm:$0xff] %vm256_vm5, %v2696_v14  ;;  %v2917_v3 = vadd.f32 %v4761_v35, %v2759_v27  ;;  %v1915_v60 = vpop.f32.mrf.mxu1  ;;  %v1814_v27 = vld [vmem:[#allocation2 + $0xb0] sm:$0xff] }
 0x262   : > { %v2983_v38 = vld [vmem:[#allocation2 + $0x68] sm:$0xff]  ;;  %v1968_v18 = vadd.f32 %v1915_v60, %v1810_v32  ;;  %v4809_v29 = vpop.f32.mrf.mxu0 }
 0x263   : > { %v3019_v42 = vadd.f32 %v4576_v1, %v2983_v38  ;;  %2949 = vst.msk [vmem:[#allocation2 + $0x70] sm:$0xff] %vm256_vm5, %v2917_v3  ;;  %v2091_v61 = vld [vmem:[#allocation2 + $0x88] sm:$0xff] }
 0x264   : > { %v2476_v49 = vadd.f32 %v2421_v26, %v2091_v61  ;;  %2000 = vst.msk [vmem:[#allocation2 + $0x90] sm:$0xff] %vm256_vm5, %v1968_v18 }
 0x265   : > { %v3051_v41 = vmax.f32 %v3019_v42, 0.0  ;;  %v2539_v43 = vld [vmem:[#allocation2 + $0x80] sm:$0xff] }
 0x266   : > { %v2697_v15 = vadd.f32 %v2641_v54, %v2539_v43  ;;  %2508 = vst.msk [vmem:[#allocation2 + $0x88] sm:$0xff] %vm256_vm5, %v2476_v49 }
 0x267   : > { %3083 = vst.msk [vmem:[%s4593_s19 + $0x68] sm:$0xff] %vm256_vm5, %v3051_v41  ;;  %v2424_v35 = vpop.f32.mrf.mxu2 }
 0x268   : > { %2729 = vst.msk [vmem:[#allocation2 + $0x80] sm:$0xff] %vm256_vm5, %v2697_v15  ;;  %v2760_v48 = vld [vmem:[#allocation2 + $0x78] sm:$0xff]  ;;  %v2646_v8 = vpop.f32.mrf.mxu3 }
 0x269   : > { %v2918_v28 = vadd.f32 %v4777_v16, %v2760_v48  ;;  %v1917_v23 = vpop.f32.mrf.mxu1  ;;  %v1815_v48 = vld [vmem:[#allocation2 + $0xb8] sm:$0xff] }
 0x26a   : > { %v2984_v25 = vld [vmem:[#allocation2 + $0x70] sm:$0xff]  ;;  %v1969_v20 = vadd.f32 %v1917_v23, %v1811_v17  ;;  %v2870_v11 = vpop.f32.mrf.mxu0 }
 0x26b   : > { %v3020_v30 = vadd.f32 %v4576_v1, %v2984_v25  ;;  %2950 = vst.msk [vmem:[#allocation2 + $0x78] sm:$0xff] %vm256_vm5, %v2918_v28  ;;  %v2092_v9 = vld [vmem:[#allocation2 + $0x90] sm:$0xff] }
 0x26c   : > { %v2477_v0 = vadd.f32 %v2424_v35, %v2092_v9  ;;  %2001 = vst.msk [vmem:[#allocation2 + $0x98] sm:$0xff] %vm256_vm5, %v1969_v20 }
 0x26d   : > { %v3052_v21 = vmax.f32 %v3020_v30, 0.0  ;;  %v2540_v4 = vld [vmem:[#allocation2 + $0x88] sm:$0xff] }
 0x26e   : > { %v2698_v62 = vadd.f32 %v2643_v53, %v2540_v4  ;;  %2509 = vst.msk [vmem:[#allocation2 + $0x90] sm:$0xff] %vm256_vm5, %v2477_v0 }
 0x26f   : > { %3084 = vst.msk [vmem:[%s4593_s19 + $0x70] sm:$0xff] %vm256_vm5, %v3052_v21  ;;  %v2761_v16 = vld [vmem:[#allocation2 + $0x80] sm:$0xff]  ;;  %v2426_v33 = vpop.f32.mrf.mxu2 }
 0x270   : > { %2730 = vst.msk [vmem:[#allocation2 + $0x88] sm:$0xff] %vm256_vm5, %v2698_v62  ;;  %v2919_v40 = vadd.f32 %v4786_v12, %v2761_v16  ;;  %v2648_v7 = vpop.f32.mrf.mxu3 }
 0x271   : > { %v1920_v6 = vpop.f32.mrf.mxu1 }
 0x272   : > { %v2985_v50 = vld [vmem:[#allocation2 + $0x78] sm:$0xff]  ;;  %2951 = vst.msk [vmem:[#allocation2 + $0x80] sm:$0xff] %vm256_vm5, %v2919_v40  ;;  %v1970_v39 = vadd.f32 %v1920_v6, %v1812_v58  ;;  %v2873_v13 = vpop.f32.mrf.mxu0  ;;  %v1816_v40 = vld [vmem:[#allocation2 + $0xc0] sm:$0xff] }
 0x273   : > { %v3021_v19 = vadd.f32 %v4576_v1, %v2985_v50  ;;  %v2093_v44 = vld [vmem:[#allocation2 + $0x98] sm:$0xff] }
 0x274   : > { %v2478_v55 = vadd.f32 %v2426_v33, %v2093_v44  ;;  %2002 = vst.msk [vmem:[#allocation2 + $0xa0] sm:$0xff] %vm256_vm5, %v1970_v39 }
 0x275   : > { %v3053_v22 = vmax.f32 %v3021_v19, 0.0  ;;  %v2541_v24 = vld [vmem:[#allocation2 + $0x90] sm:$0xff] }
 0x276   : > { %v2699_v34 = vadd.f32 %v2646_v8, %v2541_v24  ;;  %2510 = vst.msk [vmem:[#allocation2 + $0x98] sm:$0xff] %vm256_vm5, %v2478_v55 }
 0x277   : > { %3085 = vst.msk [vmem:[%s4593_s19 + $0x78] sm:$0xff] %vm256_vm5, %v3053_v22  ;;  %v2762_v12 = vld [vmem:[#allocation2 + $0x88] sm:$0xff]  ;;  %v2429_v57 = vpop.f32.mrf.mxu2 }
 0x278   : > { %2731 = vst.msk [vmem:[#allocation2 + $0x90] sm:$0xff] %vm256_vm5, %v2699_v34  ;;  %v2920_v45 = vadd.f32 %v4798_v31, %v2762_v12  ;;  %v2651_v63 = vpop.f32.mrf.mxu3  ;;  %v1817_v12 = vld [vmem:[#allocation2 + $0xc8] sm:$0xff] }
 0x279   : > { %v2986_v36 = vld [vmem:[#allocation2 + $0x80] sm:$0xff]  ;;  %v1922_v54 = vpop.f32.mrf.mxu1 }
 0x27a   : > { %v3022_v51 = vadd.f32 %v4576_v1, %v2986_v36  ;;  %2952 = vst.msk [vmem:[#allocation2 + $0x88] sm:$0xff] %vm256_vm5, %v2920_v45  ;;  %v1971_v5 = vadd.f32 %v1922_v54, %v1813_v56  ;;  %v2875_v42 = vpop.f32.mrf.mxu0  ;;  %v4863_v36 = vld [vmem:[%s4947_s2] ss:$0 sm:$0xff] }
 0x27b   : > { %v2094_v37 = vld [vmem:[#allocation2 + $0xa0] sm:$0xff] }
 0x27c   : > { %v3054_v46 = vmax.f32 %v3022_v51, 0.0  ;;  %v2479_v52 = vadd.f32 %v2429_v57, %v2094_v37  ;;  %2003 = vst.msk [vmem:[#allocation2 + $0xa8] sm:$0xff] %vm256_vm5, %v1971_v5 }
 0x27d   : > { %v2542_v47 = vld [vmem:[#allocation2 + $0x98] sm:$0xff] }
 0x27e   : > { %3086 = vst.msk [vmem:[%s4593_s19 + $0x80] sm:$0xff] %vm256_vm5, %v3054_v46  ;;  %v2700_v10 = vadd.f32 %v2648_v7, %v2542_v47 }
 0x27f   : > { %2511 = vst.msk [vmem:[#allocation2 + $0xa0] sm:$0xff] %vm256_vm5, %v2479_v52  ;;  %v2763_v31 = vld [vmem:[#allocation2 + $0x90] sm:$0xff]  ;;  %v2431_v2 = vpop.f32.mrf.mxu2 }
 0x280   : > { %2732 = vst.msk [vmem:[#allocation2 + $0x98] sm:$0xff] %vm256_vm5, %v2700_v10  ;;  %v2921_v59 = vadd.f32 %v4809_v29, %v2763_v31  ;;  %v2653_v14 = vpop.f32.mrf.mxu3  ;;  %v1818_v10 = vld [vmem:[#allocation2 + $0xd0] sm:$0xff] }
 0x281   : > { %v2987_v26 = vld [vmem:[#allocation2 + $0x88] sm:$0xff]  ;;  %v1925_v53 = vpop.f32.mrf.mxu1 }
 0x282   : > { %v3023_v3 = vadd.f32 %v4576_v1, %v2987_v26  ;;  %2953 = vst.msk [vmem:[#allocation2 + $0x90] sm:$0xff] %vm256_vm5, %v2921_v59  ;;  %v1972_v32 = vadd.f32 %v1925_v53, %v1814_v27  ;;  %v2878_v9 = vpop.f32.mrf.mxu0 }
 0x283   : > { %v2095_v60 = vld [vmem:[#allocation2 + $0xa8] sm:$0xff] }
 0x284   : > { %v3055_v38 = vmax.f32 %v3023_v3, 0.0  ;;  %v2480_v18 = vadd.f32 %v2431_v2, %v2095_v60  ;;  %2004 = vst.msk [vmem:[#allocation2 + $0xb0] sm:$0xff] %vm256_vm5, %v1972_v32 }
 0x286   : > { %3087 = vst.msk [vmem:[%s4593_s19 + $0x88] sm:$0xff] %vm256_vm5, %v3055_v38  ;;  %v2543_v61 = vld [vmem:[#allocation2 + $0xa0] sm:$0xff] }
 0x287   : > { %v2701_v49 = vadd.f32 %v2651_v63, %v2543_v61  ;;  %2512 = vst.msk [vmem:[#allocation2 + $0xa8] sm:$0xff] %vm256_vm5, %v2480_v18  ;;  %v2764_v41 = vld [vmem:[#allocation2 + $0x98] sm:$0xff]  ;;  %v2434_v43 = vpop.f32.mrf.mxu2 }
 0x288   : > { %v2922_v15 = vadd.f32 %v2870_v11, %v2764_v41  ;;  %v2656_v29 = vpop.f32.mrf.mxu3 }
 0x289   : > { %v2988_v35 = vld [vmem:[#allocation2 + $0x90] sm:$0xff]  ;;  %2733 = vst.msk [vmem:[#allocation2 + $0xa0] sm:$0xff] %vm256_vm5, %v2701_v49  ;;  %v1927_v8 = vpop.f32.mrf.mxu1  ;;  %v1819_v49 = vld [vmem:[#allocation2 + $0xd8] sm:$0xff] }
 0x28a   : > { %v3024_v28 = vadd.f32 %v4576_v1, %v2988_v35  ;;  %2954 = vst.msk [vmem:[#allocation2 + $0x98] sm:$0xff] %vm256_vm5, %v2922_v15  ;;  %v1973_v17 = vadd.f32 %v1927_v8, %v1815_v48  ;;  %v2880_v34 = vpop.f32.mrf.mxu0 }
 0x28b   : > { %v2096_v23 = vld [vmem:[#allocation2 + $0xb0] sm:$0xff] }
 0x28c   : > { %v3056_v25 = vmax.f32 %v3024_v28, 0.0  ;;  %v2481_v20 = vadd.f32 %v2434_v43, %v2096_v23  ;;  %2005 = vst.msk [vmem:[#allocation2 + $0xb8] sm:$0xff] %vm256_vm5, %v1973_v17 }
 0x28e   : > { %3088 = vst.msk [vmem:[%s4593_s19 + $0x90] sm:$0xff] %vm256_vm5, %v3056_v25  ;;  %v2544_v30 = vld [vmem:[#allocation2 + $0xa8] sm:$0xff] }
 0x28f   : > { %v2702_v0 = vadd.f32 %v2653_v14, %v2544_v30  ;;  %2513 = vst.msk [vmem:[#allocation2 + $0xb0] sm:$0xff] %vm256_vm5, %v2481_v20  ;;  %v2436_v21 = vpop.f32.mrf.mxu2 }
 0x290   : > { %v2765_v4 = vld [vmem:[#allocation2 + $0xa0] sm:$0xff]  ;;  %v2658_v62 = vpop.f32.mrf.mxu3 }
 0x291   : > { %v2989_v16 = vld [vmem:[#allocation2 + $0x98] sm:$0xff]  ;;  %2734 = vst.msk [vmem:[#allocation2 + $0xa8] sm:$0xff] %vm256_vm5, %v2702_v0  ;;  %v2923_v33 = vadd.f32 %v2873_v13, %v2765_v4  ;;  %v1930_v7 = vpop.f32.mrf.mxu1  ;;  %v1820_v0 = vld [vmem:[#allocation2 + $0xe0] sm:$0xff] }
 0x292   : > { %v3025_v11 = vadd.f32 %v4576_v1, %v2989_v16  ;;  %v1974_v58 = vadd.f32 %v1930_v7, %v1816_v40  ;;  %v2883_v26 = vpop.f32.mrf.mxu0 }
 0x293   : > { %2955 = vst.msk [vmem:[#allocation2 + $0xa0] sm:$0xff] %vm256_vm5, %v2923_v33  ;;  %v2097_v6 = vld [vmem:[#allocation2 + $0xb8] sm:$0xff] }
 0x294   : > { %v3057_v50 = vmax.f32 %v3025_v11, 0.0  ;;  %v2482_v39 = vadd.f32 %v2436_v21, %v2097_v6  ;;  %2006 = vst.msk [vmem:[#allocation2 + $0xc0] sm:$0xff] %vm256_vm5, %v1974_v58 }
 0x296   : > { %3089 = vst.msk [vmem:[%s4593_s19 + $0x98] sm:$0xff] %vm256_vm5, %v3057_v50  ;;  %v2545_v19 = vld [vmem:[#allocation2 + $0xb0] sm:$0xff] }
 0x297   : > { %v2703_v44 = vadd.f32 %v2656_v29, %v2545_v19  ;;  %2514 = vst.msk [vmem:[#allocation2 + $0xb8] sm:$0xff] %vm256_vm5, %v2482_v39  ;;  %v2439_v55 = vpop.f32.mrf.mxu2 }
 0x298   : > { %v2766_v22 = vld [vmem:[#allocation2 + $0xa8] sm:$0xff]  ;;  %v2661_v24 = vpop.f32.mrf.mxu3 }
 0x299   : > { %2735 = vst.msk [vmem:[#allocation2 + $0xb0] sm:$0xff] %vm256_vm5, %v2703_v44  ;;  %v2924_v1 = vadd.f32 %v2875_v42, %v2766_v22  ;;  %v1932_v57 = vpop.f32.mrf.mxu1  ;;  %v1821_v22 = vld [vmem:[#allocation2 + $0xe8] sm:$0xff] }
 0x29a   : > { %v2990_v45 = vld [vmem:[#allocation2 + $0xa0] sm:$0xff]  ;;  %v1975_v63 = vadd.f32 %v1932_v57, %v1817_v12  ;;  %v2885_v28 = vpop.f32.mrf.mxu0 }
 0x29b   : > { %v3026_v56 = vadd.f32 %v4863_v36, %v2990_v45  ;;  %2956 = vst.msk [vmem:[#allocation2 + $0xa8] sm:$0xff] %vm256_vm5, %v2924_v1  ;;  %v2098_v54 = vld [vmem:[#allocation2 + $0xc0] sm:$0xff] }
 0x29c   : > { %v2483_v51 = vadd.f32 %v2439_v55, %v2098_v54  ;;  %2007 = vst.msk [vmem:[#allocation2 + $0xc8] sm:$0xff] %vm256_vm5, %v1975_v63 }
 0x29d   : > { %v3058_v5 = vmax.f32 %v3026_v56, 0.0 }
 0x29e   : > { %v2546_v13 = vld [vmem:[#allocation2 + $0xb8] sm:$0xff]  ;;  %2515 = vst.msk [vmem:[#allocation2 + $0xc0] sm:$0xff] %vm256_vm5, %v2483_v51 }
 0x29f   : > { %3090 = vst.msk [vmem:[%s4593_s19 + $0xa0] sm:$0xff] %vm256_vm5, %v3058_v5  ;;  %v2704_v37 = vadd.f32 %v2658_v62, %v2546_v13  ;;  %v2441_v46 = vpop.f32.mrf.mxu2 }
 0x2a0   : > { %v2767_v52 = vld [vmem:[#allocation2 + $0xb0] sm:$0xff]  ;;  %v2663_v14 = vpop.f32.mrf.mxu3 }
 0x2a1   : > { %2736 = vst.msk [vmem:[#allocation2 + $0xb8] sm:$0xff] %vm256_vm5, %v2704_v37  ;;  %v2925_v47 = vadd.f32 %v2878_v9, %v2767_v52  ;;  %v1935_v31 = vpop.f32.mrf.mxu1  ;;  %v1822_v52 = vld [vmem:[#allocation2 + $0xf0] sm:$0xff] }
 0x2a2   : > { %v2991_v2 = vld [vmem:[#allocation2 + $0xa8] sm:$0xff]  ;;  %v1976_v59 = vadd.f32 %v1935_v31, %v1818_v10  ;;  %v2888_v50 = vpop.f32.mrf.mxu0 }
 0x2a3   : > { %v3027_v27 = vadd.f32 %v4863_v36, %v2991_v2  ;;  %2957 = vst.msk [vmem:[#allocation2 + $0xb0] sm:$0xff] %vm256_vm5, %v2925_v47  ;;  %v2099_v53 = vld [vmem:[#allocation2 + $0xc8] sm:$0xff] }
 0x2a4   : > { %v2484_v3 = vadd.f32 %v2441_v46, %v2099_v53  ;;  %2008 = vst.msk [vmem:[#allocation2 + $0xd0] sm:$0xff] %vm256_vm5, %v1976_v59 }
 0x2a5   : > { %v3059_v32 = vmax.f32 %v3027_v27, 0.0  ;;  %v2547_v60 = vld [vmem:[#allocation2 + $0xc0] sm:$0xff] }
 0x2a6   : > { %v2705_v38 = vadd.f32 %v2661_v24, %v2547_v60  ;;  %2516 = vst.msk [vmem:[#allocation2 + $0xc8] sm:$0xff] %vm256_vm5, %v2484_v3 }
 0x2a7   : > { %3091 = vst.msk [vmem:[%s4593_s19 + $0xa8] sm:$0xff] %vm256_vm5, %v3059_v32  ;;  %v2444_v18 = vpop.f32.mrf.mxu2 }
 0x2a8   : > { %2737 = vst.msk [vmem:[#allocation2 + $0xc0] sm:$0xff] %vm256_vm5, %v2705_v38  ;;  %v2768_v42 = vld [vmem:[#allocation2 + $0xb8] sm:$0xff]  ;;  %v2666_v8 = vpop.f32.mrf.mxu3 }
 0x2a9   : > { %v2926_v61 = vadd.f32 %v2880_v34, %v2768_v42  ;;  %v1937_v41 = vpop.f32.mrf.mxu1  ;;  %v1823_v38 = vld [vmem:[#allocation2 + $0xf8] sm:$0xff] }
 0x2aa   : > { %v2992_v43 = vld [vmem:[#allocation2 + $0xb0] sm:$0xff]  ;;  %v1977_v15 = vadd.f32 %v1937_v41, %v1819_v49  ;;  %v2890_v37 = vpop.f32.mrf.mxu0 }
 0x2ab   : > { %v3028_v29 = vadd.f32 %v4863_v36, %v2992_v43  ;;  %2958 = vst.msk [vmem:[#allocation2 + $0xb8] sm:$0xff] %vm256_vm5, %v2926_v61  ;;  %v2100_v35 = vld [vmem:[#allocation2 + $0xd0] sm:$0xff] }
 0x2ac   : > { %v2485_v48 = vadd.f32 %v2444_v18, %v2100_v35  ;;  %2009 = vst.msk [vmem:[#allocation2 + $0xd8] sm:$0xff] %vm256_vm5, %v1977_v15 }
 0x2ad   : > { %v3060_v17 = vmax.f32 %v3028_v29, 0.0  ;;  %v2548_v23 = vld [vmem:[#allocation2 + $0xc8] sm:$0xff] }
 0x2ae   : > { %v2706_v25 = vadd.f32 %v2663_v14, %v2548_v23  ;;  %2517 = vst.msk [vmem:[#allocation2 + $0xd0] sm:$0xff] %vm256_vm5, %v2485_v48 }
 0x2af   : > { %3092 = vst.msk [vmem:[%s4593_s19 + $0xb0] sm:$0xff] %vm256_vm5, %v3060_v17  ;;  %v2769_v20 = vld [vmem:[#allocation2 + $0xc0] sm:$0xff]  ;;  %v2446_v30 = vpop.f32.mrf.mxu2 }
 0x2b0   : > { %2738 = vst.msk [vmem:[#allocation2 + $0xc8] sm:$0xff] %vm256_vm5, %v2706_v25  ;;  %v2927_v9 = vadd.f32 %v2883_v26, %v2769_v20  ;;  %v2668_v6 = vpop.f32.mrf.mxu3 }
 0x2b1   : > { %v1940_v21 = vpop.f32.mrf.mxu1 }
 0x2b2   : > { %v2993_v4 = vld [vmem:[#allocation2 + $0xb8] sm:$0xff]  ;;  %2959 = vst.msk [vmem:[#allocation2 + $0xc0] sm:$0xff] %vm256_vm5, %v2927_v9  ;;  %v1978_v62 = vadd.f32 %v1940_v21, %v1820_v0  ;;  %v2893_v49 = vpop.f32.mrf.mxu0 }
 0x2b3   : > { %v3029_v16 = vadd.f32 %v4863_v36, %v2993_v4  ;;  %v2101_v33 = vld [vmem:[#allocation2 + $0xd8] sm:$0xff] }
 0x2b4   : > { %v2486_v40 = vadd.f32 %v2446_v30, %v2101_v33  ;;  %2010 = vst.msk [vmem:[#allocation2 + $0xe0] sm:$0xff] %vm256_vm5, %v1978_v62 }
 0x2b5   : > { %v3061_v7 = vmax.f32 %v3029_v16, 0.0  ;;  %v2549_v11 = vld [vmem:[#allocation2 + $0xd0] sm:$0xff] }
 0x2b6   : > { %v2707_v58 = vadd.f32 %v2666_v8, %v2549_v11  ;;  %2518 = vst.msk [vmem:[#allocation2 + $0xd8] sm:$0xff] %vm256_vm5, %v2486_v40 }
 0x2b7   : > { %3093 = vst.msk [vmem:[%s4593_s19 + $0xb8] sm:$0xff] %vm256_vm5, %v3061_v7  ;;  %v2770_v39 = vld [vmem:[#allocation2 + $0xc8] sm:$0xff]  ;;  %v2449_v19 = vpop.f32.mrf.mxu2 }
 0x2b8   : > { %2739 = vst.msk [vmem:[#allocation2 + $0xd0] sm:$0xff] %vm256_vm5, %v2707_v58  ;;  %v2928_v44 = vadd.f32 %v2885_v28, %v2770_v39  ;;  %v2671_v13 = vpop.f32.mrf.mxu3 }
 0x2b9   : > { %v2994_v55 = vld [vmem:[#allocation2 + $0xc0] sm:$0xff]  ;;  %v1942_v24 = vpop.f32.mrf.mxu1 }
 0x2ba   : > { %v3030_v34 = vadd.f32 %v4863_v36, %v2994_v55  ;;  %2960 = vst.msk [vmem:[#allocation2 + $0xc8] sm:$0xff] %vm256_vm5, %v2928_v44  ;;  %v1979_v1 = vadd.f32 %v1942_v24, %v1821_v22  ;;  %v2895_v21 = vpop.f32.mrf.mxu0 }
 0x2bb   : > { %v2102_v12 = vld [vmem:[#allocation2 + $0xe0] sm:$0xff] }
 0x2bc   : > { %v3062_v57 = vmax.f32 %v3030_v34, 0.0  ;;  %v2487_v45 = vadd.f32 %v2449_v19, %v2102_v12  ;;  %2011 = vst.msk [vmem:[#allocation2 + $0xe8] sm:$0xff] %vm256_vm5, %v1979_v1 }
 0x2bd   : > { %v2550_v63 = vld [vmem:[#allocation2 + $0xd8] sm:$0xff] }
 0x2be   : > { %3094 = vst.msk [vmem:[%s4593_s19 + $0xc0] sm:$0xff] %vm256_vm5, %v3062_v57  ;;  %v2708_v56 = vadd.f32 %v2668_v6, %v2550_v63 }
 0x2bf   : > { %2519 = vst.msk [vmem:[#allocation2 + $0xe0] sm:$0xff] %vm256_vm5, %v2487_v45  ;;  %v2771_v54 = vld [vmem:[#allocation2 + $0xd0] sm:$0xff]  ;;  %v2451_v51 = vpop.f32.mrf.mxu2 }
 0x2c0   : > { %2740 = vst.msk [vmem:[#allocation2 + $0xd8] sm:$0xff] %vm256_vm5, %v2708_v56  ;;  %v2929_v5 = vadd.f32 %v2888_v50, %v2771_v54  ;;  %v2673_v61 = vpop.f32.mrf.mxu3 }
 0x2c1   : > { %v2995_v46 = vld [vmem:[#allocation2 + $0xc8] sm:$0xff]  ;;  %v1945_v47 = vpop.f32.mrf.mxu1 }
 0x2c2   : > { %v3031_v10 = vadd.f32 %v4863_v36, %v2995_v46  ;;  %2961 = vst.msk [vmem:[#allocation2 + $0xd0] sm:$0xff] %vm256_vm5, %v2929_v5  ;;  %v1980_v31 = vadd.f32 %v1945_v47, %v1822_v52  ;;  %v2898_v50 = vpop.f32.mrf.mxu0 }
 0x2c3   : > { %v2103_v2 = vld [vmem:[#allocation2 + $0xe8] sm:$0xff] }
 0x2c4   : > { %v3063_v59 = vmax.f32 %v3031_v10, 0.0  ;;  %v2488_v14 = vadd.f32 %v2451_v51, %v2103_v2  ;;  %2012 = vst.msk [vmem:[#allocation2 + $0xf0] sm:$0xff] %vm256_vm5, %v1980_v31 }
 0x2c6   : > { %3095 = vst.msk [vmem:[%s4593_s19 + $0xc8] sm:$0xff] %vm256_vm5, %v3063_v59  ;;  %v2551_v26 = vld [vmem:[#allocation2 + $0xe0] sm:$0xff] }
 0x2c7   : > { %v2709_v27 = vadd.f32 %v2671_v13, %v2551_v26  ;;  %2520 = vst.msk [vmem:[#allocation2 + $0xe8] sm:$0xff] %vm256_vm5, %v2488_v14  ;;  %v2772_v53 = vld [vmem:[#allocation2 + $0xd8] sm:$0xff]  ;;  %v2454_v60 = vpop.f32.mrf.mxu2 }
 0x2c8   : > { %v2930_v3 = vadd.f32 %v2890_v37, %v2772_v53  ;;  %v2676_v9 = vpop.f32.mrf.mxu3 }
 0x2c9   : > { %v2996_v32 = vld [vmem:[#allocation2 + $0xd0] sm:$0xff]  ;;  %2741 = vst.msk [vmem:[#allocation2 + $0xe0] sm:$0xff] %vm256_vm5, %v2709_v27  ;;  %v1947_v18 = vpop.f32.mrf.mxu1 }
 0x2ca   : > { %v3032_v42 = vadd.f32 %v4863_v36, %v2996_v32  ;;  %2962 = vst.msk [vmem:[#allocation2 + $0xd8] sm:$0xff] %vm256_vm5, %v2930_v3  ;;  %v1981_v41 = vadd.f32 %v1947_v18, %v1823_v38  ;;  %v2900_v1 = vpop.f32.mrf.mxu0 }
 0x2cb   : > { %v2104_v43 = vld [vmem:[#allocation2 + $0xf0] sm:$0xff] }
 0x2cc   : > { %v3064_v15 = vmax.f32 %v3032_v42, 0.0  ;;  %v2489_v29 = vadd.f32 %v2454_v60, %v2104_v43  ;;  %2013 = vst.msk [vmem:[#allocation2 + $0xf8] sm:$0xff] %vm256_vm5, %v1981_v41 }
 0x2ce   : > { %3096 = vst.msk [vmem:[%s4593_s19 + $0xd0] sm:$0xff] %vm256_vm5, %v3064_v15  ;;  %v2552_v35 = vld [vmem:[#allocation2 + $0xe8] sm:$0xff] }
 0x2cf   : > { %v2710_v48 = vadd.f32 %v2673_v61, %v2552_v35  ;;  %2521 = vst.msk [vmem:[#allocation2 + $0xf0] sm:$0xff] %vm256_vm5, %v2489_v29  ;;  %v2456_v20 = vpop.f32.mrf.mxu2 }
 0x2d0   : > { %v2773_v8 = vld [vmem:[#allocation2 + $0xe0] sm:$0xff]  ;;  %v2678_v6 = vpop.f32.mrf.mxu3 }
 0x2d1   : > { %v2997_v28 = vld [vmem:[#allocation2 + $0xd8] sm:$0xff]  ;;  %2742 = vst.msk [vmem:[#allocation2 + $0xe8] sm:$0xff] %vm256_vm5, %v2710_v48  ;;  %v2931_v17 = vadd.f32 %v2893_v49, %v2773_v8 }
 0x2d2   : > { %v3033_v23 = vadd.f32 %v4863_v36, %v2997_v28 }
 0x2d3   : > { %2963 = vst.msk [vmem:[#allocation2 + $0xe0] sm:$0xff] %vm256_vm5, %v2931_v17  ;;  %v2105_v25 = vld [vmem:[#allocation2 + $0xf8] sm:$0xff] }
 0x2d4   : > { %v3065_v30 = vmax.f32 %v3033_v23, 0.0  ;;  %v2490_v0 = vadd.f32 %v2456_v20, %v2105_v25 }
 0x2d6   : > { %3097 = vst.msk [vmem:[%s4593_s19 + $0xd8] sm:$0xff] %vm256_vm5, %v3065_v30  ;;  %v2553_v4 = vld [vmem:[#allocation2 + $0xf0] sm:$0xff] }
 0x2d7   : > { %v2711_v62 = vadd.f32 %v2676_v9, %v2553_v4  ;;  %2522 = vst.msk [vmem:[#allocation2 + $0xf8] sm:$0xff] %vm256_vm5, %v2490_v0 }
 0x2d8   : > { %v2774_v16 = vld [vmem:[#allocation2 + $0xe8] sm:$0xff] }
 0x2d9   : > { %2743 = vst.msk [vmem:[#allocation2 + $0xf0] sm:$0xff] %vm256_vm5, %v2711_v62  ;;  %v2932_v33 = vadd.f32 %v2895_v21, %v2774_v16 }
 0x2da   : > { %v2998_v40 = vld [vmem:[#allocation2 + $0xe0] sm:$0xff] }
 0x2db   : > { %v3034_v7 = vadd.f32 %v4863_v36, %v2998_v40  ;;  %2964 = vst.msk [vmem:[#allocation2 + $0xe8] sm:$0xff] %vm256_vm5, %v2932_v33 }
 0x2dd   : > { %v3066_v11 = vmax.f32 %v3034_v7, 0.0 }
 0x2de   : > { %v2554_v58 = vld [vmem:[#allocation2 + $0xf8] sm:$0xff] }
 0x2df   : > { %3098 = vst.msk [vmem:[%s4593_s19 + $0xe0] sm:$0xff] %vm256_vm5, %v3066_v11  ;;  %v2712_v39 = vadd.f32 %v2678_v6, %v2554_v58 }
 0x2e0   : > { %v2775_v19 = vld [vmem:[#allocation2 + $0xf0] sm:$0xff] }
 0x2e1   : > { %2744 = vst.msk [vmem:[#allocation2 + $0xf8] sm:$0xff] %vm256_vm5, %v2712_v39  ;;  %v2933_v44 = vadd.f32 %v2898_v50, %v2775_v19 }
 0x2e2   : > { %v2999_v55 = vld [vmem:[#allocation2 + $0xe8] sm:$0xff] }
 0x2e3   : > { %v3035_v22 = vadd.f32 %v4863_v36, %v2999_v55  ;;  %2965 = vst.msk [vmem:[#allocation2 + $0xf0] sm:$0xff] %vm256_vm5, %v2933_v44 }
 0x2e5   : > { %v3067_v24 = vmax.f32 %v3035_v22, 0.0 }
 0x2e7   : > { %3099 = vst.msk [vmem:[%s4593_s19 + $0xe8] sm:$0xff] %vm256_vm5, %v3067_v24 }
 0x2e8   : > { %v2776_v34 = vld [vmem:[#allocation2 + $0xf8] sm:$0xff] }
 0x2e9   : > { %v2934_v12 = vadd.f32 %v2900_v1, %v2776_v34 }
 0x2ea   : > { %v3000_v57 = vld [vmem:[#allocation2 + $0xf0] sm:$0xff] }
 0x2eb   : > { %v3036_v45 = vadd.f32 %v4863_v36, %v3000_v57  ;;  %2966 = vst.msk [vmem:[#allocation2 + $0xf8] sm:$0xff] %vm256_vm5, %v2934_v12 }
 0x2ed   : > { %v3068_v63 = vmax.f32 %v3036_v45, 0.0 }
 0x2ef   : > { %3100 = vst.msk [vmem:[%s4593_s19 + $0xf0] sm:$0xff] %vm256_vm5, %v3068_v63 }
 0x2f2   : > { %v3001_v56 = vld [vmem:[#allocation2 + $0xf8] sm:$0xff] }
 0x2f3   : > { %v3037_v54 = vadd.f32 %v4863_v36, %v3001_v56 }
 0x2f5   : > { %v3069_v51 = vmax.f32 %v3037_v54, 0.0 }
 0x2f7   : > { %3101 = vst.msk [vmem:[%s4593_s19 + $0xf8] sm:$0xff] %vm256_vm5, %v3069_v51 }
 0x2f8 PF: > { %s13_s14 = sadd.s32 1, %s3579_s14   ;;  %s4953_s12 = smov %s3575_s13 }
 0x2f9   : > { %p10_p5 = scmp.ge.s32.totalorder %s13_s14, 4   ;;  %s4954_s13 = smov %s4956_s15 }
 0x2fb   :  { %12 = sbr.rel (!%p10_p5) target bundleno = 2 (0x2), region = 84 }

</bundles_post_ra>
